<compile_context>
chip_gen: v6e
topology: v6e:2x2x1
jax: 0.10.0
libtpu: 0.0.40
codegen_flags: <defaults>
</compile_context>

<pallas_src>
import math

import jax
import jax.numpy as jnp
from jax.experimental import pallas as pl
from jax.experimental.pallas import tpu as pltpu


IN_DIM = 32
OUT_DIM = 32
H1 = 512
H2 = 1024
_LANE = 128
_SUBLANE = 16                     # bf16 sublane packing -> batch tiles multiple of 16
_MAX_TILE = 2048
_VMEM_LIMIT_BYTES = 40 * 1024 * 1024   # explicit; <= v7x 64 MiB physical, > v5e 16 MiB scoped default


def _round_up(x, m):
    return ((x + m - 1) // m) * m


def _kaiming_normal(key, out_features, in_features, dtype=jnp.float32):
    # PyTorch nn.init.kaiming_normal_ default: fan_in mode, gain = sqrt(2).
    std = math.sqrt(2.0 / in_features)
    w = jax.random.normal(key, (out_features, in_features), dtype=dtype) * std
    # the module multiplies Linear weights by 0.1 after init
    return w * 0.1


def init_generator_params(key, in_dim=IN_DIM, out_dim=OUT_DIM):
    """One-time weight prep (hoisted out of the per-call path):
    transpose to (in, out), cast to bf16, and pad the last layer to a full
    128-lane width so the final matmul + store are lane-dense every call."""
    k1, k2, k3 = jax.random.split(key, 3)
    out_pad = _round_up(out_dim, _LANE)

    w1 = _kaiming_normal(k1, H1, in_dim).T.astype(jnp.bfloat16)     # (in_dim, 512)
    b1 = jnp.zeros((1, H1), jnp.float32)
    w2 = _kaiming_normal(k2, H2, H1).T.astype(jnp.bfloat16)         # (512, 1024)
    b2 = jnp.zeros((1, H2), jnp.float32)
    w3 = _kaiming_normal(k3, out_dim, H2).T                         # (1024, out_dim)
    w3 = jnp.pad(w3, ((0, 0), (0, out_pad - out_dim))).astype(jnp.bfloat16)  # (1024, 128)
    b3 = jnp.zeros((1, out_pad), jnp.float32)
    return (w1, b1, w2, b2, w3, b3)


def _generator_kernel(x_ref, w1_ref, b1_ref, w2_ref, b2_ref, w3_ref, b3_ref, o_ref):
    # x arrives as f32 and is cast to bf16 here (no separate XLA pass over x).
    # bf16 matmul inputs, f32 accumulation on the MXU; bias add + ReLU in f32 (VPU).
    x = x_ref[...].astype(jnp.bfloat16)
    h1 = jnp.dot(x, w1_ref[...], preferred_element_type=jnp.float32) + b1_ref[...]
    h1 = jnp.maximum(h1, 0.0).astype(jnp.bfloat16)
    h2 = jnp.dot(h1, w2_ref[...], preferred_element_type=jnp.float32) + b2_ref[...]
    h2 = jnp.maximum(h2, 0.0).astype(jnp.bfloat16)
    out = jnp.dot(h2, w3_ref[...], preferred_element_type=jnp.float32) + b3_ref[...]
    o_ref[...] = out.astype(o_ref.dtype)


def _choose_batch_tile(n, batch_tile):
    """Pick the batch tile: large to fill the MXU M-dim, but never a 1-step grid
    (so the 'parallel' batch axis can shard across both v7x TensorCores)."""
    batch_tile = _round_up(max(_SUBLANE, min(int(batch_tile), _MAX_TILE)), _SUBLANE)
    if _round_up(n, _SUBLANE) <= batch_tile:
        # Whole batch would fit in a single tile -> split into >=2 grid steps.
        return max(_SUBLANE, _round_up(pl.cdiv(n, 2), _SUBLANE))
    return batch_tile


def generator_forward(x, params, *, batch_tile=_MAX_TILE, out_dim=OUT_DIM,
                      out_dtype=jnp.float32, return_padded=False):
    w1, b1, w2, b2, w3, b3 = params
    n, in_dim = x.shape
    assert in_dim == w1.shape[0]
    out_pad = w3.shape[1]           # already padded to a multiple of 128 in init

    tile = _choose_batch_tile(n, batch_tile)
    n_pad = _round_up(n, tile)

    # Only pad the batch when needed (zero rows, sliced off below); no dtype cast here.
    x_p = x if n_pad == n else jnp.pad(x, ((0, n_pad - n), (0, 0)))

    grid = (n_pad // tile,)
    in_specs = [
        pl.BlockSpec((tile, in_dim), lambda i: (i, 0)),   # x: tiled over batch
        pl.BlockSpec(w1.shape, lambda i: (0, 0)),         # weights/biases resident
        pl.BlockSpec(b1.shape, lambda i: (0, 0)),
        pl.BlockSpec(w2.shape, lambda i: (0, 0)),
        pl.BlockSpec(b2.shape, lambda i: (0, 0)),
        pl.BlockSpec(w3.shape, lambda i: (0, 0)),
        pl.BlockSpec(b3.shape, lambda i: (0, 0)),
    ]
    out_specs = pl.BlockSpec((tile, out_pad), lambda i: (i, 0))

    out_bytes = jnp.dtype(out_dtype).itemsize
    flops = 2 * n_pad * (in_dim * H1 + H1 * H2 + H2 * out_pad)
    bytes_accessed = (
        x_p.size * 4
        + n_pad * out_pad * out_bytes
        + (w1.size + w2.size + w3.size) * 2
        + (b1.size + b2.size + b3.size) * 4
    )

    out = pl.pallas_call(
        _generator_kernel,
        out_shape=jax.ShapeDtypeStruct((n_pad, out_pad), out_dtype),
        grid_spec=pltpu.PrefetchScalarGridSpec(
            num_scalar_prefetch=0,
            grid=grid,
            in_specs=in_specs,
            out_specs=out_specs,
        ),
        compiler_params=pltpu.CompilerParams(
            dimension_semantics=("parallel",),          # batch axis shards across TCs (v7x)
            vmem_limit_bytes=_VMEM_LIMIT_BYTES,
        ),
        cost_estimate=pl.CostEstimate(
            flops=flops, transcendentals=0, bytes_accessed=bytes_accessed),
    )(x_p, w1, b1, w2, b2, w3, b3)

    if return_padded:
        return out                  # (n_pad, 128): skip the extra slice pass if tolerated
    return out[:n, :out_dim]


def generator_forward_ref(x, params, out_dim=OUT_DIM):
    # Pure-JAX reference with the same bf16-input / f32-accumulate numerics.
    w1, b1, w2, b2, w3, b3 = params
    xb = x.astype(jnp.bfloat16)
    h1 = jnp.maximum(
        jnp.dot(xb, w1, preferred_element_type=jnp.float32) + b1, 0.0
    ).astype(jnp.bfloat16)
    h2 = jnp.maximum(
        jnp.dot(h1, w2, preferred_element_type=jnp.float32) + b2, 0.0
    ).astype(jnp.bfloat16)
    out = jnp.dot(h2, w3, preferred_element_type=jnp.float32) + b3
    return out[:, :out_dim]


if __name__ == "__main__":
    key = jax.random.PRNGKey(0)
    k_params, k_x = jax.random.split(key)

    params = init_generator_params(k_params)

    # Non-multiple of the tile: exercises batch padding and the forced 2-step
    # "parallel" grid (tile=112 -> n_pad=224 -> grid=(2,)).
    batch = 200
    x = jax.random.normal(k_x, (batch, IN_DIM), dtype=jnp.float32)

    out = jax.block_until_ready(generator_forward(x, params))
    ref = jax.block_until_ready(generator_forward_ref(x, params))

    assert out.shape == (batch, OUT_DIM)
    assert jnp.allclose(out, ref, atol=1e-3, rtol=1e-2), "mismatch vs JAX reference"

    print("KERNEL_OK")
</pallas_src>

<mosaic_0001>
module attributes {stable_mosaic.version = 11 : i64} {
  func.func @_generator_kernel(%arg0: i32, %arg1: memref<112x32xf32, #tpu.memory_space<vmem>>, %arg2: memref<32x512xbf16, #tpu.memory_space<vmem>>, %arg3: memref<1x512xf32, #tpu.memory_space<vmem>>, %arg4: memref<512x1024xbf16, #tpu.memory_space<vmem>>, %arg5: memref<1x1024xf32, #tpu.memory_space<vmem>>, %arg6: memref<1024x128xbf16, #tpu.memory_space<vmem>>, %arg7: memref<1x128xf32, #tpu.memory_space<vmem>>, %arg8: memref<112x128xf32, #tpu.memory_space<vmem>>) attributes {dimension_semantics = [#tpu.dimension_semantics<parallel>], iteration_bounds = array<i64: 2>, scalar_prefetch = 0 : i64, scratch_operands = 0 : i64, tpu.core_type = #tpu.core_type<tc>, window_params = [{transform_indices = @transform_0, window_bounds = array<i64: 112, 32>}, {pipeline_mode = #tpu.pipeline_mode<synchronous>, transform_indices = @transform_1, window_bounds = array<i64: 32, 512>}, {pipeline_mode = #tpu.pipeline_mode<synchronous>, transform_indices = @transform_2, window_bounds = array<i64: 1, 512>}, {pipeline_mode = #tpu.pipeline_mode<synchronous>, transform_indices = @transform_3, window_bounds = array<i64: 512, 1024>}, {pipeline_mode = #tpu.pipeline_mode<synchronous>, transform_indices = @transform_4, window_bounds = array<i64: 1, 1024>}, {pipeline_mode = #tpu.pipeline_mode<synchronous>, transform_indices = @transform_5, window_bounds = array<i64: 1024, 128>}, {pipeline_mode = #tpu.pipeline_mode<synchronous>, transform_indices = @transform_6, window_bounds = array<i64: 1, 128>}, {transform_indices = @transform_7, window_bounds = array<i64: 112, 128>}]} {
    %c0 = arith.constant 0 : index
    %c0_0 = arith.constant 0 : index
    %0 = vector.load %arg1[%c0, %c0_0] : memref<112x32xf32, #tpu.memory_space<vmem>>, vector<112x32xf32>
    %1 = arith.truncf %0 : vector<112x32xf32> to vector<112x32xbf16>
    %c0_1 = arith.constant 0 : index
    %c0_2 = arith.constant 0 : index
    %2 = vector.load %arg2[%c0_1, %c0_2] : memref<32x512xbf16, #tpu.memory_space<vmem>>, vector<32x512xbf16>
    %cst = arith.constant dense<0.000000e+00> : vector<112x512xf32>
    %3 = tpu.matmul %1, %2, %cst {dimension_numbers = #tpu.dot_dimension_numbers<[1], [0], [0], [1], [0, 0, 1, 1], [], []>} : vector<112x32xbf16>, vector<32x512xbf16>, vector<112x512xf32> -> vector<112x512xf32>
    %c0_3 = arith.constant 0 : index
    %c0_4 = arith.constant 0 : index
    %4 = vector.load %arg3[%c0_3, %c0_4] : memref<1x512xf32, #tpu.memory_space<vmem>>, vector<1x512xf32>
    %5 = vector.broadcast %4 : vector<1x512xf32> to vector<112x512xf32>
    %6 = arith.addf %3, %5 : vector<112x512xf32>
    %cst_5 = arith.constant 0.000000e+00 : f32
    %7 = vector.broadcast %cst_5 : f32 to vector<112x512xf32>
    %8 = arith.maximumf %6, %7 : vector<112x512xf32>
    %9 = arith.truncf %8 : vector<112x512xf32> to vector<112x512xbf16>
    %c0_6 = arith.constant 0 : index
    %c0_7 = arith.constant 0 : index
    %10 = vector.load %arg4[%c0_6, %c0_7] : memref<512x1024xbf16, #tpu.memory_space<vmem>>, vector<512x1024xbf16>
    %cst_8 = arith.constant dense<0.000000e+00> : vector<112x1024xf32>
    %11 = tpu.matmul %9, %10, %cst_8 {dimension_numbers = #tpu.dot_dimension_numbers<[1], [0], [0], [1], [0, 0, 1, 1], [], []>} : vector<112x512xbf16>, vector<512x1024xbf16>, vector<112x1024xf32> -> vector<112x1024xf32>
    %c0_9 = arith.constant 0 : index
    %c0_10 = arith.constant 0 : index
    %12 = vector.load %arg5[%c0_9, %c0_10] : memref<1x1024xf32, #tpu.memory_space<vmem>>, vector<1x1024xf32>
    %13 = vector.broadcast %12 : vector<1x1024xf32> to vector<112x1024xf32>
    %14 = arith.addf %11, %13 : vector<112x1024xf32>
    %cst_11 = arith.constant 0.000000e+00 : f32
    %15 = vector.broadcast %cst_11 : f32 to vector<112x1024xf32>
    %16 = arith.maximumf %14, %15 : vector<112x1024xf32>
    %17 = arith.truncf %16 : vector<112x1024xf32> to vector<112x1024xbf16>
    %c0_12 = arith.constant 0 : index
    %c0_13 = arith.constant 0 : index
    %18 = vector.load %arg6[%c0_12, %c0_13] : memref<1024x128xbf16, #tpu.memory_space<vmem>>, vector<1024x128xbf16>
    %cst_14 = arith.constant dense<0.000000e+00> : vector<112x128xf32>
    %19 = tpu.matmul %17, %18, %cst_14 {dimension_numbers = #tpu.dot_dimension_numbers<[1], [0], [0], [1], [0, 0, 1, 1], [], []>} : vector<112x1024xbf16>, vector<1024x128xbf16>, vector<112x128xf32> -> vector<112x128xf32>
    %c0_15 = arith.constant 0 : index
    %c0_16 = arith.constant 0 : index
    %20 = vector.load %arg7[%c0_15, %c0_16] : memref<1x128xf32, #tpu.memory_space<vmem>>, vector<1x128xf32>
    %21 = vector.broadcast %20 : vector<1x128xf32> to vector<112x128xf32>
    %22 = arith.addf %19, %21 : vector<112x128xf32>
    %c0_17 = arith.constant 0 : index
    %c0_18 = arith.constant 0 : index
    %23 = vector.load %arg8[%c0_17, %c0_18] : memref<112x128xf32, #tpu.memory_space<vmem>>, vector<112x128xf32>
    tpu.vector_store %arg8[%c0_17, %c0_18], %22 {strides = array<i32>} : memref<112x128xf32, #tpu.memory_space<vmem>>, vector<112x128xf32>,
    return
  }
  func.func @transform_0(%arg0: i32) -> (i32, i32) {
    %c0_i32 = arith.constant 0 : i32
    %c0_i32_0 = arith.constant 0 : i32
    return %arg0, %c0_i32 : i32, i32
  }
  func.func @transform_1(%arg0: i32) -> (i32, i32) {
    %c0_i32 = arith.constant 0 : i32
    %c0_i32_0 = arith.constant 0 : i32
    %c0_i32_1 = arith.constant 0 : i32
    return %c0_i32, %c0_i32_0 : i32, i32
  }
  func.func @transform_2(%arg0: i32) -> (i32, i32) {
    %c0_i32 = arith.constant 0 : i32
    %c0_i32_0 = arith.constant 0 : i32
    %c0_i32_1 = arith.constant 0 : i32
    return %c0_i32, %c0_i32_0 : i32, i32
  }
  func.func @transform_3(%arg0: i32) -> (i32, i32) {
    %c0_i32 = arith.constant 0 : i32
    %c0_i32_0 = arith.constant 0 : i32
    %c0_i32_1 = arith.constant 0 : i32
    return %c0_i32, %c0_i32_0 : i32, i32
  }
  func.func @transform_4(%arg0: i32) -> (i32, i32) {
    %c0_i32 = arith.constant 0 : i32
    %c0_i32_0 = arith.constant 0 : i32
    %c0_i32_1 = arith.constant 0 : i32
    return %c0_i32, %c0_i32_0 : i32, i32
  }
  func.func @transform_5(%arg0: i32) -> (i32, i32) {
    %c0_i32 = arith.constant 0 : i32
    %c0_i32_0 = arith.constant 0 : i32
    %c0_i32_1 = arith.constant 0 : i32
    return %c0_i32, %c0_i32_0 : i32, i32
  }
  func.func @transform_6(%arg0: i32) -> (i32, i32) {
    %c0_i32 = arith.constant 0 : i32
    %c0_i32_0 = arith.constant 0 : i32
    %c0_i32_1 = arith.constant 0 : i32
    return %c0_i32, %c0_i32_0 : i32, i32
  }
  func.func @transform_7(%arg0: i32) -> (i32, i32) {
    %c0_i32 = arith.constant 0 : i32
    %c0_i32_0 = arith.constant 0 : i32
    return %arg0, %c0_i32 : i32, i32
  }
}

</mosaic_0001>

<bundles_post_ra>
// kernel: tpu_custom_call.1
= control target key start
LH: loop header
LB: loop body
LE: loop exit
PB: predicated region body
PF: predicated region fallthrough
CT: control target
= control target key end

     0   :  { %12 = vsyncpa [#allocation3], 0  ;;  %s6351_s0 = inlined_call_operand.vmem [shape: f32[224,32], index: 0, kind: input, shape index: {}]   ;;  %s6352_s1 = inlined_call_operand.vmem [shape: bf16[32,512], index: 1, kind: input, shape index: {}]   ;;  %s6353_s2 = inlined_call_operand.vmem [shape: f32[1,512], index: 2, kind: input, shape index: {}]   ;;  %s6354_s3 = inlined_call_operand.hbm [shape: bf16[512,1024], index: 3, kind: input, shape index: {}]   ;;  %s6355_s4 = inlined_call_operand.vmem [shape: f32[1,1024], index: 4, kind: input, shape index: {}]   ;;  %s6356_s5 = inlined_call_operand.hbm [shape: bf16[1024,128], index: 5, kind: input, shape index: {}]   ;;  %s6357_s6 = inlined_call_operand.vmem [shape: f32[1,128], index: 6, kind: input, shape index: {}]   ;;  %s6358_s7 = inlined_call_operand.hbm [shape: f32[224,128], index: 7, kind: output, shape index: {}]  }
   0x1   :  { %13 = vsyncpa [#allocation6], 0 }
   0x2   :  { %14 = vsyncpa [#allocation4], 0 }
   0x3   :  { %16 = vsyncpa [#allocation4 + $0x1], 0  ;;  %s5176_s24 = smov 0   ;;  %s5178_s25 = smov 0  }
   0x4   :  { %s5180_s26 = smov 0   ;;  %s5182_s27 = smov 0  }
   0x5 LB: > { %s5197_s28 = sadd.s32 4294967295, %s5124_s27   ;;  %s4271_s29 = sadd.s32 4294967294, %s5124_s27   ;;  %s5124_s27 = sphi %s5182_s27, %s6410_s27   ;;  %s5120_s26 = sphi %s5180_s26, %s6409_s26   ;;  %s5116_s25 = sphi %s5178_s25, %s6408_s25   ;;  %s5112_s24 = sphi %s5176_s24, %s6407_s24  }
   0x6   : > { %s5201_s30 = sadd.s32 1, %s5124_s27   ;;  %s181_s8 = sadd.s32 1, %s5120_s26 }
   0x7   : > { %s178_s9 = ssub.s32 %s5124_s27, %s5201_s30  ;;  %p191_p0 = scmp.ne.s32.totalorder %s5120_s26, %s5116_s25 }
   0x8   : > { %p179_p1 = scmp.eq.s32.totalorder %s178_s9, 0  ;;  %p192_p2 = scmp.eq.s32.totalorder %s5197_s28, 1 }
   0x9   : > { %p197_p3 = scmp.ne.s32.totalorder %s5116_s25, %s5112_s24  ;;  %p198_p4 = scmp.eq.s32.totalorder %s4271_s29, 1 }
   0xa   : > { %s5212_s10 = scalar_select %p179_p1, %s5120_s26, %s181_s8  }
   0xb   : > { %p5214_p5 = por %p192_p2, %p191_p0  ;;  %p5218_p6 = por %p198_p4, %p197_p3 }
   0xc   : > { %p4272_p7 = scmp.ge.s32.totalorder %s5124_s27, 1  ;;  %p205_p8 = scmp.lt.s32.totalorder %s5124_s27, 3 }
   0xd   : > { %s6361_s12 = scalar_select %p5218_p6, 1, 0 }
   0xe   : > { %p6359_p9 = scmp.eq.s32.totalorder %s5197_s28, 0  ;;  %p5225_p10 = pnand %p4272_p7, %p205_p8 }
   0xf   : > { %s5126_s14 = smov [#allocation2]   ;;  %s5127_s17 = smov [#allocation5]  }
  0x10   : > { %s223_s15 = sshll.u32 %s5126_s14, 4  ;;  %p4870_p11 = pneg %p5225_p10  ;;  %s224_s15 = int_to_ptr.vmem [resolvable:$true] %s223_s15 }
  0x11   : > { %s239_s18 = sshll.u32 %s5127_s17, 4  ;;  %s5015_s19 = scalar_lea.vmem %s224_s15, 32768  ;;  %s240_s18 = int_to_ptr.vmem [resolvable:$true] %s239_s18 }
  0x12   : > { %p5233_p12 = pnand %p6359_p9, %p4870_p11  ;;  %p5016_p0 = scmp.ne.s32.totalorder %s224_s15, %s5015_s19 }
  0x13   : > { %p5023_p3 = scmp.lt.s32.totalorder %s224_s15, %s224_s15  ;;  %p5024_p4 = scmp.lt.s32.totalorder %s5015_s19, %s5015_s19 }
  0x14   : > { %p5006_p13 = pneg %p5233_p12 }
  0x15   : > { %p5025_p7 = por %p5024_p4, %p5023_p3 }
  0x16   : > { %p5018_p1 = pnand %p5016_p0, %p5006_p13 }
  0x18   : > { %p5019_p2 = pneg %p5018_p1 }
  0x1a   : > { %p5026_p8 = pnand %p5025_p7, %p5019_p2 }
  0x1c   : > { %5029 = shalt.err (!%p5026_p8)
}
  0x1d   : > { %s5128_s20 = smov 512   ;;  %s5129_s21 = smov 32  }
  0x1e   : > { %4873 = dma.hbm_to_vmem [thread:$0]  (!%p5233_p12), %s6354_s3, 32768, %s224_s15, [#allocation3], %s5128_s20, %s5128_s20, %s5129_s21  }
  0x1f   : > { %s5041_s29 = scalar_lea.vmem %s240_s18, 8192  ;;  %p5049_p9 = scmp.lt.s32.totalorder %s240_s18, %s240_s18 }
  0x20   : > { %p5042_p11 = scmp.ne.s32.totalorder %s240_s18, %s5041_s29  ;;  %p5050_p6 = scmp.lt.s32.totalorder %s5041_s29, %s5041_s29 }
  0x22   : > { %p5044_p0 = pnand %p5042_p11, %p5006_p13  ;;  %p5051_p3 = por %p5050_p6, %p5049_p9 }
  0x24   : > { %p5045_p1 = pneg %p5044_p0 }
  0x26   : > { %p5052_p2 = pnand %p5051_p3, %p5045_p1 }
  0x28   : > { %5055 = shalt.err (!%p5052_p2)
}
  0x29   : > { %s5130_s8 = smov 64   ;;  %s5131_s9 = smov 4  }
  0x2a   : > { %4876 = dma.hbm_to_vmem [thread:$0]  (!%p5233_p12), %s6356_s5, 8192, %s240_s18, [#allocation6], %s5130_s8, %s5130_s8, %s5131_s9  }
  0x2b   : > { %267 = sbr.rel (%p5225_p10) target bundleno = 937 (0x3a9), region = 48 }
  0x30   : > { %p6364_p4 = scmp.eq.s32.totalorder %s5197_s28, 0 }
  0x32   : > { %5099 = dma.done.wait (%p6364_p4), [#allocation3], 32768   ;;  %p6365_p13 = pmov %p6364_p4 }
  0x33   : > { %p6366_p6 = pmov %p6364_p4 }
  0x34   : > { %5101 = vsyncadd (%p6365_p13), [#allocation3], 4294934528 }
  0x35   : > { %5103 = dma.done.wait (%p6366_p6), [#allocation6], 8192   ;;  %p6367_p9 = pmov %p6364_p4 }
  0x36   : > { %s303_s15 = smul.u32 14, %s5197_s28  ;;  %v5132_v0 = vmov 0   ;;  %v4927_v1 = vld [vmem:[%s6352_s1 + $0x24] ss:$16 sps:$4 sm:$0xff]   ;;  %v4929_v2 = vld [vmem:[%s6352_s1 + $0x2c] ss:$16 sps:$4 sm:$0xff]  }
  0x37   : > { %5105 = vsyncadd (%p6367_p9), [#allocation6], 4294959104  ;;  %456 = vmatprep.mubr.bf16.mxu0 %v5132_v0  ;;  %559 = vmatprep.mubr.bf16.mxu1 %v5132_v0  ;;  %v4931_v3 = vld [vmem:[%s6352_s1 + $0x20] ss:$16 sps:$4 sm:$0xff]   ;;  %v4932_v4 = vld [vmem:[%s6352_s1 + $0x28] ss:$16 sps:$4 sm:$0xff]  }
  0x38   : > { %p304_p10 = scmp.lt.s32.totalorder %s303_s15, 27  ;;  %436 = vmatprep.subr.bf16.mxu0 %v4927_v1  ;;  %539 = vmatprep.subr.bf16.mxu1 %v4929_v2  ;;  %v4933_v5 = vld [vmem:[%s6352_s1 + $0x4] ss:$16 sps:$4 sm:$0xff]   ;;  %v4935_v6 = vld [vmem:[%s6352_s1 + $0xc] ss:$16 sps:$4 sm:$0xff]   ;;  %vm402_vm0 = vcmask 261120  }
  0x39   : > { %437 = vmatpush1.bf16.msra.mxu0 %v4931_v3  ;;  %540 = vmatpush1.bf16.msra.mxu1 %v4932_v4  ;;  %v4937_v7 = vld [vmem:[%s6352_s1] ss:$16 sps:$4 sm:$0xff]   ;;  %v4938_v8 = vld [vmem:[%s6352_s1 + $0x8] ss:$16 sps:$4 sm:$0xff]   ;;  %s300_s16 = sand.u32 1, %s5116_s25   ;;  %s4626_s20 = smul.u32 1792, %s5197_s28 }
  0x3a   : > { %s6412_s15 = smov (!%p304_p10, %s303_s15), 27  ;;  %438 = vmatprep.subr.bf16.mxu0 %v4933_v5  ;;  %541 = vmatprep.subr.bf16.mxu1 %v4935_v6  ;;  %v770_v13 = vld [vmem:[#allocation2 + $0x1c0] sm:$0xff]  ;;  %s4859_s18 = smul.u32 112, %s300_s16 }
  0x3b   : > { %s4279_s13 = sshll.u32 %s6412_s15, 3  ;;  %v774_v14 = vld [vmem:[#allocation2 + $0x1e0] sm:$0xff]  ;;  %s6304_s23 = scalar_lea.hbm %s6358_s7, %s4626_s20 }
  0x3c   : > { %s5283_s14 = scalar_lea.vmem %s6351_s0, %s4279_s13  ;;  %v898_v15 = vld [vmem:[#allocation2 + $0x5c0] sm:$0xff]  ;;  %v4358_v16 = vcombine.low %v770_v13, %v774_v14  ;;  %v4359_v17 = vcombine.high %v770_v13, %v774_v14  ;;  %s6216_s19 = scalar_lea.vmem [#allocation7], %s4859_s18 }
  0x3d   : > { %v311_v9 = vld [vmem:[%s5283_s14] sm:$0xff]  ;;  %v312_v10 = vld [vmem:[%s5283_s14 + $0x8] sm:$0xff]  ;;  %439 = vmatpush1.bf16.msra.mxu0 %v4937_v7  ;;  %542 = vmatpush1.bf16.msra.mxu1 %v4938_v8  ;;  %v313_v12 = vld [vmem:[%s5283_s14 + $0x10] sm:$0xff]  ;;  %s4187_s13 = sshll.u32 %s6216_s19, 4  ;;  %s6311_s28 = scalar_lea.sflag [#allocation4], %s300_s16  ;;  %s6306_s13 = int_to_ptr.vmem [resolvable:$true] %s4187_s13 }
  0x3e   : > { %v325_v11 = vpack.c.bf16 %v312_v10, %v311_v9  ;;  %v902_v18 = vld [vmem:[#allocation2 + $0x5e0] sm:$0xff]  ;;  %v314_v21 = vld [vmem:[%s5283_s14 + $0x18] sm:$0xff]  ;;  %2292 = vmatprep.subr.bf16.mxu0 %v4359_v17  ;;  %v316_v44 = vld [vmem:[%s5283_s14 + $0x28] sm:$0xff]  ;;  %s5056_s29 = scalar_lea.vmem %s6306_s13, 1792  ;;  %s5133_s8 = smov [#allocation7]  }
  0x3f   : > { %v762_v19 = vld [vmem:[#allocation2 + $0x180] sm:$0xff]  ;;  %v4486_v22 = vcombine.low %v898_v15, %v902_v18  ;;  %v4487_v23 = vcombine.high %v898_v15, %v902_v18  ;;  %v326_v31 = vpack.c.bf16 %v314_v21, %v313_v12  ;;  %v317_v57 = vld [vmem:[%s5283_s14 + $0x30] sm:$0xff]  ;;  %v318_v58 = vld [vmem:[%s5283_s14 + $0x38] sm:$0xff]  ;;  %p5057_p12 = scmp.ne.s32.totalorder %s6306_s13, %s5056_s29  ;;  %s5060_s9 = sshll.u32 %s5133_s8, 4  ;;  %s5061_s9 = int_to_ptr.vmem [resolvable:$false] %s5060_s9 }
  0x40   : > { %4288 = vmatmul.mubr.msk.bf16.vlgmr.msra.gmra.mxu0 %vm402_vm0, %v325_v11  ;;  %4295 = vmatmul.mubr.msk.bf16.vlgmr.msra.gmra.mxu1 %vm402_vm0, %v325_v11  ;;  %v766_v20 = vld [vmem:[#allocation2 + $0x1a0] sm:$0xff]  ;;  %v328_v10 = vpack.c.bf16 %v318_v58, %v317_v57  ;;  %p5063_p11 = scmp.lt.s32.totalorder %s6306_s13, %s5061_s9 }
  0x41   : > { %466 = vmatprep.mubr.bf16.mxu0 %v5132_v0  ;;  %569 = vmatprep.mubr.bf16.mxu1 %v5132_v0  ;;  %v890_v24 = vld [vmem:[#allocation2 + $0x580] sm:$0xff]  ;;  %v4351_v26 = vcombine.high %v762_v19, %v766_v20  ;;  %v4350_v28 = vcombine.low %v762_v19, %v766_v20  ;;  %p5058_p7 = pnand %p5057_p12, %p5214_p5 }
  0x42   : > { %v894_v25 = vld [vmem:[#allocation2 + $0x5a0] sm:$0xff]  ;;  %2395 = vmatprep.subr.bf16.mxu1 %v4487_v23  ;;  %2293 = vmatpush1.bf16.msra.mxu0 %v4358_v16  ;;  %v320_v16 = vld [vmem:[%s5283_s14 + $0x48] sm:$0xff] }
  0x43   : > { %v4479_v27 = vcombine.high %v890_v24, %v894_v25  ;;  %v754_v29 = vld [vmem:[#allocation2 + $0x140] sm:$0xff]  ;;  %2396 = vmatpush1.bf16.msra.mxu1 %v4486_v22  ;;  %2294 = vmatprep.subr.bf16.mxu0 %v4351_v26  ;;  %v4478_v36 = vcombine.low %v890_v24, %v894_v25  ;;  %p5059_p8 = pneg %p5058_p7 }
  0x44   : > { %v758_v30 = vld [vmem:[#allocation2 + $0x160] sm:$0xff] }
  0x45   : > { %v882_v32 = vld [vmem:[#allocation2 + $0x540] sm:$0xff]  ;;  %2397 = vmatprep.subr.bf16.mxu1 %v4479_v27  ;;  %v4343_v37 = vcombine.high %v754_v29, %v758_v30  ;;  %v4342_v38 = vcombine.low %v754_v29, %v758_v30 }
  0x46   : > { %v886_v33 = vld [vmem:[#allocation2 + $0x560] sm:$0xff]  ;;  %2295 = vmatpush1.bf16.msra.mxu0 %v4350_v28 }
  0x47   : > { %v746_v34 = vld [vmem:[#allocation2 + $0x100] sm:$0xff]  ;;  %v4471_v39 = vcombine.high %v882_v32, %v886_v33  ;;  %2398 = vmatpush1.bf16.msra.mxu1 %v4478_v36  ;;  %2296 = vmatprep.subr.bf16.mxu0 %v4343_v37  ;;  %v4470_v45 = vcombine.low %v882_v32, %v886_v33 }
  0x48   : > { %v750_v35 = vld [vmem:[#allocation2 + $0x120] sm:$0xff]  ;;  %4289 = vmatmul.mubr.msk.bf16.gmra.mxu0 %vm402_vm0, %v326_v31  ;;  %4296 = vmatmul.mubr.msk.bf16.gmra.mxu1 %vm402_vm0, %v326_v31 }
  0x49   : > { %v4335_v40 = vcombine.high %v746_v34, %v750_v35  ;;  %v874_v41 = vld [vmem:[#allocation2 + $0x500] sm:$0xff]  ;;  %476 = vmatprep.mubr.bf16.mxu0 %v5132_v0  ;;  %579 = vmatprep.mubr.bf16.mxu1 %v5132_v0  ;;  %v4334_v46 = vcombine.low %v746_v34, %v750_v35  ;;  %v321_v34 = vld [vmem:[%s5283_s14 + $0x50] sm:$0xff]  ;;  %v322_v35 = vld [vmem:[%s5283_s14 + $0x58] sm:$0xff] }
  0x4a   : > { %v878_v42 = vld [vmem:[#allocation2 + $0x520] sm:$0xff]  ;;  %2399 = vmatprep.subr.bf16.mxu1 %v4471_v39  ;;  %2297 = vmatpush1.bf16.msra.mxu0 %v4342_v38 }
  0x4b   : > { %v315_v43 = vld [vmem:[%s5283_s14 + $0x20] sm:$0xff]  ;;  %v4463_v47 = vcombine.high %v874_v41, %v878_v42  ;;  %2298 = vmatprep.subr.bf16.mxu0 %v4335_v40  ;;  %2400 = vmatpush1.bf16.msra.mxu1 %v4470_v45  ;;  %v4462_v55 = vcombine.low %v874_v41, %v878_v42 }
  0x4c   : > { %v738_v48 = vld [vmem:[#allocation2 + $0xc0] sm:$0xff]  ;;  %v327_v50 = vpack.c.bf16 %v316_v44, %v315_v43 }
  0x4d   : > { %v742_v49 = vld [vmem:[#allocation2 + $0xe0] sm:$0xff]  ;;  %2401 = vmatprep.subr.bf16.mxu1 %v4463_v47 }
  0x4e   : > { %v866_v51 = vld [vmem:[#allocation2 + $0x4c0] sm:$0xff]  ;;  %v4327_v56 = vcombine.high %v738_v48, %v742_v49  ;;  %2299 = vmatpush1.bf16.msra.mxu0 %v4334_v46  ;;  %v4326_v59 = vcombine.low %v738_v48, %v742_v49  ;;  %v330_v48 = vpack.c.bf16 %v322_v35, %v321_v34  ;;  %v5345_v35 = vld [vmem:[#allocation2 + $0x5e8] sm:$0xff] }
  0x4f   : > { %v870_v52 = vld [vmem:[#allocation2 + $0x4e0] sm:$0xff]  ;;  %2402 = vmatpush1.bf16.msra.mxu1 %v4462_v55 }
  0x50   : > { %v730_v53 = vld [vmem:[#allocation2 + $0x80] sm:$0xff]  ;;  %v4455_v60 = vcombine.high %v866_v51, %v870_v52  ;;  %4290 = vmatmul.mubr.msk.bf16.gmra.mxu0 %vm402_vm0, %v327_v50  ;;  %4297 = vmatmul.mubr.msk.bf16.gmra.mxu1 %vm402_vm0, %v327_v50  ;;  %v4454_v3 = vcombine.low %v866_v51, %v870_v52 }
  0x51   : > { %v734_v54 = vld [vmem:[#allocation2 + $0xa0] sm:$0xff]  ;;  %486 = vmatprep.mubr.bf16.mxu0 %v5132_v0  ;;  %589 = vmatprep.mubr.bf16.mxu1 %v5132_v0 }
  0x52   : > { %v4319_v61 = vcombine.high %v730_v53, %v734_v54  ;;  %v858_v62 = vld [vmem:[#allocation2 + $0x480] sm:$0xff]  ;;  %2300 = vmatprep.subr.bf16.mxu0 %v4327_v56  ;;  %2403 = vmatprep.subr.bf16.mxu1 %v4455_v60  ;;  %v4318_v6 = vcombine.low %v730_v53, %v734_v54  ;;  %v324_v54 = vld [vmem:[%s5283_s14 + $0x68] sm:$0xff] }
  0x53   : > { %v862_v63 = vld [vmem:[#allocation2 + $0x4a0] sm:$0xff]  ;;  %2301 = vmatpush1.bf16.msra.mxu0 %v4326_v59  ;;  %2404 = vmatpush1.bf16.msra.mxu1 %v4454_v3 }
  0x54   : > { %v722_v1 = vld [vmem:[#allocation2 + $0x40] sm:$0xff]  ;;  %v4447_v7 = vcombine.high %v858_v62, %v862_v63  ;;  %2302 = vmatprep.subr.bf16.mxu0 %v4319_v61  ;;  %v4446_v11 = vcombine.low %v858_v62, %v862_v63 }
  0x55   : > { %v726_v2 = vld [vmem:[#allocation2 + $0x60] sm:$0xff] }
  0x56   : > { %v850_v4 = vld [vmem:[#allocation2 + $0x440] sm:$0xff]  ;;  %v4311_v12 = vcombine.high %v722_v1, %v726_v2  ;;  %2405 = vmatprep.subr.bf16.mxu1 %v4447_v7  ;;  %v4310_v17 = vcombine.low %v722_v1, %v726_v2 }
  0x57   : > { %v854_v5 = vld [vmem:[#allocation2 + $0x460] sm:$0xff]  ;;  %2303 = vmatpush1.bf16.msra.mxu0 %v4318_v6  ;;  %2406 = vmatpush1.bf16.msra.mxu1 %v4446_v11 }
  0x58   : > { %v714_v8 = vld [vmem:[#allocation2] sm:$0xff]  ;;  %v4439_v18 = vcombine.high %v850_v4, %v854_v5  ;;  %4291 = vmatmul.mubr.msk.bf16.gmra.mxu0 %vm402_vm0, %v328_v10  ;;  %4298 = vmatmul.mubr.msk.bf16.gmra.mxu1 %vm402_vm0, %v328_v10  ;;  %v4438_v22 = vcombine.low %v850_v4, %v854_v5 }
  0x59   : > { %v718_v9 = vld [vmem:[#allocation2 + $0x20] sm:$0xff]  ;;  %496 = vmatprep.mubr.bf16.mxu0 %v5132_v0  ;;  %599 = vmatprep.mubr.bf16.mxu1 %v5132_v0 }
  0x5a   : > { %v842_v13 = vld [vmem:[#allocation2 + $0x400] sm:$0xff]  ;;  %v4303_v19 = vcombine.high %v714_v8, %v718_v9  ;;  %2304 = vmatprep.subr.bf16.mxu0 %v4311_v12  ;;  %2407 = vmatprep.subr.bf16.mxu1 %v4439_v18  ;;  %v4302_v25 = vcombine.low %v714_v8, %v718_v9 }
  0x5b   : > { %v846_v14 = vld [vmem:[#allocation2 + $0x420] sm:$0xff]  ;;  %2305 = vmatpush1.bf16.msra.mxu0 %v4310_v17  ;;  %2408 = vmatpush1.bf16.msra.mxu1 %v4438_v22 }
  0x5c   : > { %v319_v15 = vld [vmem:[%s5283_s14 + $0x40] sm:$0xff]  ;;  %v4431_v26 = vcombine.high %v842_v13, %v846_v14  ;;  %2306 = vmatprep.subr.bf16.mxu0 %v4303_v19  ;;  %v4430_v30 = vcombine.low %v842_v13, %v846_v14 }
  0x5d   : > { %v834_v20 = vld [vmem:[#allocation2 + $0x3c0] sm:$0xff]  ;;  %v329_v29 = vpack.c.bf16 %v320_v16, %v319_v15 }
  0x5e   : > { %v838_v21 = vld [vmem:[#allocation2 + $0x3e0] sm:$0xff]  ;;  %2409 = vmatprep.subr.bf16.mxu1 %v4431_v26 }
  0x5f   : > { %v962_v23 = vld [vmem:[#allocation2 + $0x7c0] sm:$0xff]  ;;  %v4423_v31 = vcombine.high %v834_v20, %v838_v21  ;;  %2307 = vmatpush1.bf16.msra.mxu0 %v4302_v25  ;;  %v4422_v36 = vcombine.low %v834_v20, %v838_v21  ;;  %2410 = vmatpush1.bf16.msra.mxu1 %v4430_v30 }
  0x60   : > { %v966_v24 = vld [vmem:[#allocation2 + $0x7e0] sm:$0xff]  ;;  %4292 = vmatmul.mubr.msk.bf16.gmra.mxu0 %vm402_vm0, %v329_v29  ;;  %4299 = vmatmul.mubr.msk.bf16.gmra.mxu1 %vm402_vm0, %v329_v29 }
  0x61   : > { %v826_v27 = vld [vmem:[#allocation2 + $0x380] sm:$0xff]  ;;  %v4551_v37 = vcombine.high %v962_v23, %v966_v24  ;;  %506 = vmatprep.mubr.bf16.mxu0 %v5132_v0  ;;  %609 = vmatprep.mubr.bf16.mxu1 %v5132_v0  ;;  %v4550_v41 = vcombine.low %v962_v23, %v966_v24 }
  0x62   : > { %v830_v28 = vld [vmem:[#allocation2 + $0x3a0] sm:$0xff]  ;;  %2308 = vmatprep.subr.bf16.mxu0 %v4423_v31  ;;  %v5337_v31 = vld [vmem:[#allocation2 + $0x1c8] sm:$0xff] }
  0x63   : > { %v954_v32 = vld [vmem:[#allocation2 + $0x780] sm:$0xff]  ;;  %v4415_v38 = vcombine.high %v826_v27, %v830_v28  ;;  %2411 = vmatprep.subr.bf16.mxu1 %v4551_v37  ;;  %2309 = vmatpush2.bf16.msra.mxu0 %v4422_v36  ;;  %v4414_v44 = vcombine.low %v826_v27, %v830_v28 }
  0x64   : > { %v958_v33 = vld [vmem:[#allocation2 + $0x7a0] sm:$0xff]  ;;  %2412 = vmatpush2.bf16.msra.mxu1 %v4550_v41 }
  0x65   : > { %v818_v39 = vld [vmem:[#allocation2 + $0x340] sm:$0xff]  ;;  %v4543_v45 = vcombine.high %v954_v32, %v958_v33  ;;  %2310 = vmatprep.subr.bf16.mxu0 %v4415_v38  ;;  %v4542_v49 = vcombine.low %v954_v32, %v958_v33  ;;  %v5339_v32 = vld [vmem:[#allocation2 + $0x1e8] sm:$0xff] }
  0x66   : > { %v822_v40 = vld [vmem:[#allocation2 + $0x360] sm:$0xff]  ;;  %v5341_v33 = vld [vmem:[#allocation2 + $0x5c8] sm:$0xff]  ;;  %v4361_v34 = vcombine.high %v5337_v31, %v5339_v32  ;;  %v4360_v36 = vcombine.low %v5337_v31, %v5339_v32 }
  0x67   : > { %v946_v42 = vld [vmem:[#allocation2 + $0x740] sm:$0xff]  ;;  %v4407_v50 = vcombine.high %v818_v39, %v822_v40  ;;  %2413 = vmatprep.subr.bf16.mxu1 %v4543_v45  ;;  %2311 = vmatpush2.bf16.msra.mxu0 %v4414_v44  ;;  %v4406_v55 = vcombine.low %v818_v39, %v822_v40  ;;  %v4488_v37 = vcombine.low %v5341_v33, %v5345_v35  ;;  %v342_v39 = vlaneseq }
  0x68   : > { %v950_v43 = vld [vmem:[#allocation2 + $0x760] sm:$0xff]  ;;  %4293 = vmatmul.mubr.msk.bf16.gmra.mxu0 %vm402_vm0, %v330_v48  ;;  %4300 = vmatmul.mubr.msk.bf16.gmra.mxu1 %vm402_vm0, %v330_v48  ;;  %v4489_v38 = vcombine.high %v5341_v33, %v5345_v35  ;;  %v5441_v33 = vld [vmem:[#allocation2 + $0x128] sm:$0xff] }
  0x69   : > { %v810_v46 = vld [vmem:[#allocation2 + $0x300] sm:$0xff]  ;;  %v4535_v56 = vcombine.high %v946_v42, %v950_v43  ;;  %516 = vmatprep.mubr.bf16.mxu0 %v5132_v0  ;;  %619 = vmatprep.mubr.bf16.mxu1 %v5132_v0  ;;  %v4534_v60 = vcombine.low %v946_v42, %v950_v43  ;;  %v5353_v40 = vshrl.u32 %v342_v39, 7  ;;  %v5416_v39 = vld [vmem:[#allocation2 + $0x148] sm:$0xff] }
  0x6a   : > { %v814_v47 = vld [vmem:[#allocation2 + $0x320] sm:$0xff]  ;;  %2414 = vmatpush2.bf16.msra.mxu1 %v4542_v49  ;;  %2312 = vmatprep.subr.bf16.mxu0 %v4407_v50 }
  0x6b   : > { %v938_v51 = vld [vmem:[#allocation2 + $0x700] sm:$0xff]  ;;  %v4399_v57 = vcombine.high %v810_v46, %v814_v47  ;;  %2415 = vmatprep.subr.bf16.mxu1 %v4535_v56  ;;  %2313 = vmatpush2.bf16.msra.mxu0 %v4406_v55  ;;  %v4398_v63 = vcombine.low %v810_v46, %v814_v47  ;;  %v348_v41 = vsub.s32 1, %v5353_v40  ;;  %v356_v42 = vsub.s32 3, %v5353_v40 }
  0x6c   : > { %v942_v52 = vld [vmem:[#allocation2 + $0x720] sm:$0xff]  ;;  %v344_v43 = vsub.s32 0, %v5353_v40  ;;  %v352_v44 = vsub.s32 2, %v5353_v40 }
  0x6d   : > { %v323_v53 = vld [vmem:[%s5283_s14 + $0x60] sm:$0xff]  ;;  %v4527_v1 = vcombine.high %v938_v51, %v942_v52  ;;  %2314 = vmatprep.subr.bf16.mxu0 %v4399_v57  ;;  %v4526_v4 = vcombine.low %v938_v51, %v942_v52  ;;  %s5062_s14 = scalar_lea.vmem %s5061_s9, 3584 }
  0x6e   : > { %v802_v58 = vld [vmem:[#allocation2 + $0x2c0] sm:$0xff]  ;;  %v331_v2 = vpack.c.bf16 %v324_v54, %v323_v53  ;;  %2416 = vmatpush2.bf16.msra.mxu1 %v4534_v60  ;;  %p5064_p0 = scmp.lt.s32.totalorder %s5062_s14, %s5056_s29 }
  0x6f   : > { %v806_v59 = vld [vmem:[#allocation2 + $0x2e0] sm:$0xff]  ;;  %2417 = vmatprep.subr.bf16.mxu1 %v4527_v1  ;;  %2315 = vmatpush2.bf16.msra.mxu0 %v4398_v63 }
  0x70   : > { %v930_v61 = vld [vmem:[#allocation2 + $0x6c0] sm:$0xff]  ;;  %v4391_v3 = vcombine.high %v802_v58, %v806_v59  ;;  %v4390_v5 = vcombine.low %v802_v58, %v806_v59  ;;  %4294 = vmatmul.mubr.msk.bf16.gmra.mxu0 %vm402_vm0, %v331_v2  ;;  %4301 = vmatmul.mubr.msk.bf16.gmra.mxu1 %vm402_vm0, %v331_v2  ;;  %p5065_p1 = por %p5064_p0, %p5063_p11 }
  0x71   : > { %v934_v62 = vld [vmem:[#allocation2 + $0x6e0] sm:$0xff] }
  0x72   : > { %v4519_v6 = vcombine.high %v930_v61, %v934_v62  ;;  %2316 = vmatprep.subr.bf16.mxu0 %v4391_v3  ;;  %2418 = vmatpush2.bf16.msra.mxu1 %v4526_v4  ;;  %v4518_v0 = vcombine.low %v930_v61, %v934_v62  ;;  %v794_v7 = vld [vmem:[#allocation2 + $0x280] sm:$0xff]  ;;  %p5066_p3 = pnand %p5065_p1, %p5059_p8 }
  0x73   : > { %2317 = vmatpush2.bf16.msra.mxu0 %v4390_v5  ;;  %v798_v8 = vld [vmem:[#allocation2 + $0x2a0] sm:$0xff] }
  0x74   : > { %2419 = vmatprep.subr.bf16.mxu1 %v4519_v6  ;;  %v922_v9 = vld [vmem:[#allocation2 + $0x680] sm:$0xff]  ;;  %v4383_v10 = vcombine.high %v794_v7, %v798_v8  ;;  %v4382_v12 = vcombine.low %v794_v7, %v798_v8  ;;  %v5388_v7 = vld [vmem:[#allocation2 + $0x1a8] sm:$0xff] }
  0x75   : > { %v926_v11 = vld [vmem:[#allocation2 + $0x6a0] sm:$0xff] }
  0x76   : > { %2420 = vmatpush2.bf16.msra.mxu1 %v4518_v0  ;;  %v4510_v13 = vcombine.low %v922_v9, %v926_v11  ;;  %v4511_v14 = vcombine.high %v922_v9, %v926_v11  ;;  %2318 = vmatprep.subr.bf16.mxu0 %v4383_v10  ;;  %v786_v15 = vld [vmem:[#allocation2 + $0x240] sm:$0xff]  ;;  %v5386_v0 = vld [vmem:[#allocation2 + $0x188] sm:$0xff] }
  0x77   : > { %2319 = vmatpush2.bf16.msra.mxu0 %v4382_v12  ;;  %v790_v16 = vld [vmem:[#allocation2 + $0x260] sm:$0xff]  ;;  %v5390_v12 = vld [vmem:[#allocation2 + $0x588] sm:$0xff] }
  0x78   : > { %2421 = vmatprep.subr.bf16.mxu1 %v4511_v14  ;;  %v914_v17 = vld [vmem:[#allocation2 + $0x640] sm:$0xff]  ;;  %v4375_v18 = vcombine.high %v786_v15, %v790_v16  ;;  %v4374_v20 = vcombine.low %v786_v15, %v790_v16 }
  0x79   : > { %v918_v19 = vld [vmem:[#allocation2 + $0x660] sm:$0xff] }
  0x7a   : > { %2422 = vmatpush2.bf16.msra.mxu1 %v4510_v13  ;;  %v4502_v21 = vcombine.low %v914_v17, %v918_v19  ;;  %v4503_v22 = vcombine.high %v914_v17, %v918_v19  ;;  %2320 = vmatprep.subr.bf16.mxu0 %v4375_v18  ;;  %v778_v23 = vld [vmem:[#allocation2 + $0x200] sm:$0xff]  ;;  %v5392_v13 = vld [vmem:[#allocation2 + $0x5a8] sm:$0xff] }
  0x7b   : > { %2321 = vmatpush2.bf16.msra.mxu0 %v4374_v20  ;;  %v782_v24 = vld [vmem:[#allocation2 + $0x220] sm:$0xff] }
  0x7c   : > { %2423 = vmatprep.subr.bf16.mxu1 %v4503_v22  ;;  %v906_v25 = vld [vmem:[#allocation2 + $0x600] sm:$0xff]  ;;  %v4367_v26 = vcombine.high %v778_v23, %v782_v24  ;;  %v4366_v28 = vcombine.low %v778_v23, %v782_v24 }
  0x7d   : > { %v910_v27 = vld [vmem:[#allocation2 + $0x620] sm:$0xff] }
  0x7e   : > { %2424 = vmatpush2.bf16.msra.mxu1 %v4502_v21  ;;  %v4494_v29 = vcombine.low %v906_v25, %v910_v27  ;;  %v4495_v30 = vcombine.high %v906_v25, %v910_v27  ;;  %2322 = vmatprep.subr.bf16.mxu0 %v4367_v26  ;;  %v340_v45 = vld [vmem:[%s6353_s2] sm:$0xf] }
  0x7f   : > { %2323 = vmatpush2.bf16.msra.mxu0 %v4366_v28  ;;  %v5364_v48 = vrot.slane %v340_v45, %v348_v41  ;;  %v5368_v49 = vrot.slane %v340_v45, %v356_v42  ;;  %v5372_v50 = vrot.slane %v340_v45, %v344_v43  ;;  %v5376_v51 = vrot.slane %v340_v45, %v352_v44  ;;  %v5418_v45 = vld [vmem:[#allocation2 + $0x168] sm:$0xff] }
  0x80   : > { %2425 = vmatprep.subr.bf16.mxu1 %v4495_v30  ;;  %2498 = vmatprep.subr.bf16.mxu0 %v4361_v34  ;;  %v4353_v28 = vcombine.high %v5386_v0, %v5388_v7  ;;  %v4344_v31 = vcombine.low %v5416_v39, %v5418_v45 }
  0x82   : > { %2426 = vmatpush2.bf16.msra.mxu1 %v4494_v29  ;;  %v4481_v29 = vcombine.high %v5390_v12, %v5392_v13 }
  0x83   : > { %2601 = vmatprep.subr.bf16.mxu1 %v4489_v38  ;;  %v4352_v38 = vcombine.low %v5386_v0, %v5388_v7 }
 0x100   : > { %v458_v46 = vpop.f32.mrf.mxu0  ;;  %v561_v47 = vpop.f32.mrf.mxu1 }
 0x101   : > { %v459_v60 = vadd.f32 %v458_v46, %v5372_v50  ;;  %v562_v61 = vadd.f32 %v561_v47, %v5376_v51 }
 0x102   : > { %v460_v52 = vpop.f32.mrf.mxu0  ;;  %v563_v53 = vpop.f32.mrf.mxu1 }
 0x103   : > { %v461_v56 = vadd.f32 %v460_v52, %v5364_v48  ;;  %v564_v57 = vadd.f32 %v563_v53, %v5368_v49  ;;  %v630_v14 = vmax.f32 %v459_v60, 0.0  ;;  %v632_v15 = vmax.f32 %v562_v61, 0.0 }
 0x104   : > { %v462_v54 = vpop.f32.mrf.mxu0  ;;  %v565_v55 = vpop.f32.mrf.mxu1 }
 0x105   : > { %v463_v58 = vadd.f32 %v462_v54, %v5372_v50  ;;  %v566_v59 = vadd.f32 %v565_v55, %v5376_v51  ;;  %v631_v8 = vmax.f32 %v461_v56, 0.0  ;;  %v633_v9 = vmax.f32 %v564_v57, 0.0  ;;  %v5422_v56 = vld [vmem:[#allocation2 + $0x548] sm:$0xff] }
 0x106   : > { %v464_v62 = vpop.f32.mrf.mxu0  ;;  %v567_v63 = vpop.f32.mrf.mxu1  ;;  %v887_v57 = vld [vmem:[#allocation2 + $0x568] sm:$0xff] }
 0x107   : > { %v465_v1 = vadd.f32 %v464_v62, %v5364_v48  ;;  %v568_v2 = vadd.f32 %v567_v63, %v5368_v49  ;;  %v634_v3 = vmax.f32 %v463_v58, 0.0  ;;  %v636_v4 = vmax.f32 %v566_v59, 0.0 }
 0x108   : > { %v468_v5 = vpop.f32.mrf.mxu0  ;;  %v571_v6 = vpop.f32.mrf.mxu1  ;;  %v4473_v32 = vcombine.high %v5422_v56, %v887_v57 }
 0x109   : > { %v635_v10 = vmax.f32 %v465_v1, 0.0  ;;  %v637_v11 = vmax.f32 %v568_v2, 0.0  ;;  %v469_v16 = vadd.f32 %v468_v5, %v5372_v50  ;;  %v572_v17 = vadd.f32 %v571_v6, %v5376_v51 }
 0x10a   : > { %v470_v18 = vpop.f32.mrf.mxu0  ;;  %v573_v19 = vpop.f32.mrf.mxu1  ;;  %v5402_v24 = vpack.c.bf16 %v634_v3, %v630_v14  ;;  %v5404_v25 = vpack.c.bf16 %v636_v4, %v632_v15  ;;  %v4480_v1 = vcombine.low %v5390_v12, %v5392_v13  ;;  %v4345_v2 = vcombine.high %v5416_v39, %v5418_v45  ;;  %v5472_v45 = vld [vmem:[#allocation2 + $0x4c8] sm:$0xff] }
 0x10b   : > { %v5396_v20 = vpack.c.bf16 %v635_v10, %v631_v8  ;;  %v5398_v21 = vpack.c.bf16 %v637_v11, %v633_v9  ;;  %v471_v22 = vadd.f32 %v470_v18, %v5364_v48  ;;  %v574_v23 = vadd.f32 %v573_v19, %v5368_v49  ;;  %v5449_v8 = vld [vmem:[#allocation2 + $0x508] sm:$0xff] }
 0x10c   : > { %v472_v26 = vpop.f32.mrf.mxu0  ;;  %v575_v27 = vpop.f32.mrf.mxu1  ;;  %v638_v46 = vmax.f32 %v469_v16, 0.0  ;;  %v640_v47 = vmax.f32 %v572_v17, 0.0  ;;  %v879_v9 = vld [vmem:[#allocation2 + $0x528] sm:$0xff]  ;;  %v4472_v16 = vcombine.low %v5422_v56, %v887_v57 }
 0x10d   : > { %v473_v30 = vadd.f32 %v472_v26, %v5372_v50  ;;  %v576_v34 = vadd.f32 %v575_v27, %v5376_v51  ;;  %2324 = vmatprep.mubr.bf16.mxu0 %v5396_v20  ;;  %2427 = vmatprep.mubr.bf16.mxu1 %v5398_v21  ;;  %v639_v52 = vmax.f32 %v471_v22, 0.0  ;;  %v641_v53 = vmax.f32 %v574_v23, 0.0  ;;  %v5467_v26 = vld [vmem:[#allocation2 + $0xc8] sm:$0xff] }
 0x10e   : > { %v474_v54 = vpop.f32.mrf.mxu0  ;;  %v577_v55 = vpop.f32.mrf.mxu1  ;;  %2325 = vmatmul.mubr.bf16.vlgmr.msra.gmra.mxu0 %v5402_v24  ;;  %2428 = vmatmul.mubr.bf16.vlgmr.msra.gmra.mxu1 %v5404_v25  ;;  %v4465_v23 = vcombine.high %v5449_v8, %v879_v9  ;;  %v5469_v27 = vld [vmem:[#allocation2 + $0xe8] sm:$0xff]  ;;  %v4464_v57 = vcombine.low %v5449_v8, %v879_v9 }
 0x10f   : > { %v642_v58 = vmax.f32 %v473_v30, 0.0  ;;  %v644_v59 = vmax.f32 %v576_v34, 0.0  ;;  %v475_v60 = vadd.f32 %v474_v54, %v5364_v48  ;;  %v578_v61 = vadd.f32 %v577_v55, %v5368_v49  ;;  %2499 = vmatpush1.bf16.msra.mxu0 %v4360_v36  ;;  %2602 = vmatpush1.bf16.msra.mxu1 %v4488_v37  ;;  %v5439_v36 = vld [vmem:[#allocation2 + $0x108] sm:$0xff] }
 0x110   : > { %v478_v62 = vpop.f32.mrf.mxu0  ;;  %v581_v63 = vpop.f32.mrf.mxu1  ;;  %2500 = vmatprep.subr.bf16.mxu0 %v4353_v28  ;;  %2603 = vmatprep.subr.bf16.mxu1 %v4481_v29  ;;  %v4336_v17 = vcombine.low %v5439_v36, %v5441_v33  ;;  %v4337_v18 = vcombine.high %v5439_v36, %v5441_v33  ;;  %v5496_v33 = vld [vmem:[#allocation2 + $0x488] sm:$0xff] }
 0x111   : > { %v643_v3 = vmax.f32 %v475_v60, 0.0  ;;  %v645_v4 = vmax.f32 %v578_v61, 0.0  ;;  %v5443_v35 = vpack.c.bf16 %v642_v58, %v638_v46  ;;  %v5445_v37 = vpack.c.bf16 %v644_v59, %v640_v47  ;;  %v5474_v46 = vld [vmem:[#allocation2 + $0x4e8] sm:$0xff] }
 0x112   : > { %v479_v5 = vadd.f32 %v478_v62, %v5372_v50  ;;  %v582_v6 = vadd.f32 %v581_v63, %v5376_v51  ;;  %v480_v0 = vpop.f32.mrf.mxu0  ;;  %v583_v7 = vpop.f32.mrf.mxu1  ;;  %v4329_v58 = vcombine.high %v5467_v26, %v5469_v27  ;;  %v4328_v61 = vcombine.low %v5467_v26, %v5469_v27  ;;  %v5486_v63 = vld [vmem:[#allocation2 + $0x88] sm:$0xff] }
 0x113   : > { %v5451_v10 = vpack.c.bf16 %v643_v3, %v639_v52  ;;  %v5453_v11 = vpack.c.bf16 %v645_v4, %v641_v53  ;;  %v481_v12 = vadd.f32 %v480_v0, %v5364_v48  ;;  %v584_v13 = vadd.f32 %v583_v7, %v5368_v49  ;;  %2501 = vmatpush1.bf16.msra.mxu0 %v4352_v38 }
 0x114   : > { %2604 = vmatpush1.bf16.msra.mxu1 %v4480_v1  ;;  %v482_v14 = vpop.f32.mrf.mxu0  ;;  %v585_v15 = vpop.f32.mrf.mxu1  ;;  %2502 = vmatprep.subr.bf16.mxu0 %v4345_v2  ;;  %v646_v28 = vmax.f32 %v479_v5, 0.0  ;;  %v648_v29 = vmax.f32 %v582_v6, 0.0  ;;  %v4457_v62 = vcombine.high %v5472_v45, %v5474_v46  ;;  %v5488_v1 = vld [vmem:[#allocation2 + $0xa8] sm:$0xff] }
 0x115   : > { %v483_v19 = vadd.f32 %v482_v14, %v5372_v50  ;;  %v586_v22 = vadd.f32 %v585_v15, %v5376_v51  ;;  %2334 = vmatprep.mubr.bf16.mxu0 %v5451_v10  ;;  %2437 = vmatprep.mubr.bf16.mxu1 %v5453_v11  ;;  %v647_v30 = vmax.f32 %v481_v12, 0.0  ;;  %v649_v34 = vmax.f32 %v584_v13, 0.0  ;;  %v863_v5 = vld [vmem:[#allocation2 + $0x4a8] sm:$0xff] }
 0x116   : > { %2605 = vmatprep.subr.bf16.mxu1 %v4473_v32  ;;  %v484_v38 = vpop.f32.mrf.mxu0  ;;  %v587_v39 = vpop.f32.mrf.mxu1  ;;  %2335 = vmatmul.mubr.bf16.gmra.mxu0 %v5443_v35  ;;  %v4456_v13 = vcombine.low %v5472_v45, %v5474_v46  ;;  %v4320_v14 = vcombine.low %v5486_v63, %v5488_v1  ;;  %v4321_v15 = vcombine.high %v5486_v63, %v5488_v1 }
 0x117   : > { %v650_v47 = vmax.f32 %v483_v19, 0.0  ;;  %v652_v52 = vmax.f32 %v586_v22, 0.0  ;;  %v485_v53 = vadd.f32 %v484_v38, %v5364_v48  ;;  %v588_v54 = vadd.f32 %v587_v39, %v5368_v49  ;;  %2438 = vmatmul.mubr.bf16.gmra.mxu1 %v5445_v37  ;;  %2503 = vmatpush1.bf16.msra.mxu0 %v4344_v31  ;;  %v5515_v19 = vld [vmem:[#allocation2 + $0x48] sm:$0xff] }
 0x118   : > { %2606 = vmatpush1.bf16.msra.mxu1 %v4472_v16  ;;  %v488_v55 = vpop.f32.mrf.mxu0  ;;  %v591_v56 = vpop.f32.mrf.mxu1  ;;  %2504 = vmatprep.subr.bf16.mxu0 %v4337_v18  ;;  %v5517_v22 = vld [vmem:[#allocation2 + $0x68] sm:$0xff] }
 0x119   : > { %v651_v59 = vmax.f32 %v485_v53, 0.0  ;;  %v653_v60 = vmax.f32 %v588_v54, 0.0  ;;  %2607 = vmatprep.subr.bf16.mxu1 %v4465_v23  ;;  %v5490_v2 = vpack.c.bf16 %v650_v47, %v646_v28  ;;  %v5492_v3 = vpack.c.bf16 %v652_v52, %v648_v29  ;;  %v5522_v38 = vld [vmem:[#allocation2 + $0x468] sm:$0xff] }
 0x11a   : > { %v489_v4 = vadd.f32 %v488_v55, %v5372_v50  ;;  %v592_v31 = vadd.f32 %v591_v56, %v5376_v51  ;;  %v490_v32 = vpop.f32.mrf.mxu0  ;;  %v593_v36 = vpop.f32.mrf.mxu1  ;;  %v4448_v54 = vcombine.low %v5496_v33, %v863_v5  ;;  %v4313_v55 = vcombine.high %v5515_v19, %v5517_v22 }
 0x11b   : > { %v5498_v6 = vpack.c.bf16 %v651_v59, %v647_v30  ;;  %v5500_v0 = vpack.c.bf16 %v653_v60, %v649_v34  ;;  %v491_v7 = vadd.f32 %v490_v32, %v5364_v48  ;;  %v594_v8 = vadd.f32 %v593_v36, %v5368_v49  ;;  %2505 = vmatpush1.bf16.msra.mxu0 %v4336_v17  ;;  %v5520_v34 = vld [vmem:[#allocation2 + $0x448] sm:$0xff] }
 0x11c   : > { %2608 = vmatpush1.bf16.msra.mxu1 %v4464_v57  ;;  %v492_v9 = vpop.f32.mrf.mxu0  ;;  %v595_v12 = vpop.f32.mrf.mxu1  ;;  %2506 = vmatprep.subr.bf16.mxu0 %v4329_v58  ;;  %v4449_v17 = vcombine.high %v5496_v33, %v863_v5  ;;  %v654_v23 = vmax.f32 %v489_v4, 0.0  ;;  %v656_v26 = vmax.f32 %v592_v31, 0.0  ;;  %v4312_v58 = vcombine.low %v5515_v19, %v5517_v22  ;;  %v5534_v60 = vld [vmem:[#allocation2 + $0x8] sm:$0xff] }
 0x11d   : > { %v493_v16 = vadd.f32 %v492_v9, %v5372_v50  ;;  %v596_v18 = vadd.f32 %v595_v12, %v5376_v51  ;;  %2344 = vmatprep.mubr.bf16.mxu0 %v5498_v6  ;;  %2447 = vmatprep.mubr.bf16.mxu1 %v5500_v0  ;;  %v655_v27 = vmax.f32 %v491_v7, 0.0  ;;  %v657_v28 = vmax.f32 %v594_v8, 0.0  ;;  %v5544_v36 = vld [vmem:[#allocation2 + $0x408] sm:$0xff] }
 0x11e   : > { %2609 = vmatprep.subr.bf16.mxu1 %v4457_v62  ;;  %v494_v29 = vpop.f32.mrf.mxu0  ;;  %v597_v30 = vpop.f32.mrf.mxu1  ;;  %2345 = vmatmul.mubr.bf16.gmra.mxu0 %v5490_v2  ;;  %v4441_v59 = vcombine.high %v5520_v34, %v5522_v38  ;;  %v847_v33 = vld [vmem:[#allocation2 + $0x428] sm:$0xff] }
 0x11f   : > { %v658_v39 = vmax.f32 %v493_v16, 0.0  ;;  %v660_v45 = vmax.f32 %v596_v18, 0.0  ;;  %v495_v46 = vadd.f32 %v494_v29, %v5364_v48  ;;  %v598_v47 = vadd.f32 %v597_v30, %v5368_v49  ;;  %2448 = vmatmul.mubr.bf16.gmra.mxu1 %v5492_v3  ;;  %2507 = vmatpush1.bf16.msra.mxu0 %v4328_v61  ;;  %v5536_v61 = vld [vmem:[#allocation2 + $0x28] sm:$0xff] }
 0x120   : > { %2610 = vmatpush1.bf16.msra.mxu1 %v4456_v13  ;;  %v498_v52 = vpop.f32.mrf.mxu0  ;;  %v601_v53 = vpop.f32.mrf.mxu1  ;;  %2508 = vmatprep.subr.bf16.mxu0 %v4321_v15  ;;  %v4440_v15 = vcombine.low %v5520_v34, %v5522_v38  ;;  %v4304_v16 = vcombine.low %v5534_v60, %v5536_v61  ;;  %v4305_v18 = vcombine.high %v5534_v60, %v5536_v61  ;;  %v5563_v22 = vld [vmem:[#allocation2 + $0x3c8] sm:$0xff] }
 0x121   : > { %v659_v56 = vmax.f32 %v495_v46, 0.0  ;;  %v661_v57 = vmax.f32 %v598_v47, 0.0  ;;  %2611 = vmatprep.subr.bf16.mxu1 %v4449_v17  ;;  %v5538_v62 = vpack.c.bf16 %v658_v39, %v654_v23  ;;  %v5540_v63 = vpack.c.bf16 %v660_v45, %v656_v26  ;;  %v5565_v23 = vld [vmem:[#allocation2 + $0x3e8] sm:$0xff] }
 0x122   : > { %v499_v1 = vadd.f32 %v498_v52, %v5372_v50  ;;  %v602_v4 = vadd.f32 %v601_v53, %v5376_v51  ;;  %v500_v31 = vpop.f32.mrf.mxu0  ;;  %v603_v32 = vpop.f32.mrf.mxu1  ;;  %v5568_v38 = vld [vmem:[#allocation2 + $0x7c8] sm:$0xff]  ;;  %v4424_v60 = vcombine.low %v5563_v22, %v5565_v23 }
 0x123   : > { %v5546_v5 = vpack.c.bf16 %v659_v56, %v655_v27  ;;  %v5548_v7 = vpack.c.bf16 %v661_v57, %v657_v28  ;;  %v501_v8 = vadd.f32 %v500_v31, %v5364_v48  ;;  %v604_v9 = vadd.f32 %v603_v32, %v5368_v49  ;;  %2509 = vmatpush1.bf16.msra.mxu0 %v4320_v14  ;;  %v5570_v39 = vld [vmem:[#allocation2 + $0x7e8] sm:$0xff] }
 0x124   : > { %2612 = vmatpush1.bf16.msra.mxu1 %v4448_v54  ;;  %v502_v12 = vpop.f32.mrf.mxu0  ;;  %v605_v13 = vpop.f32.mrf.mxu1  ;;  %2510 = vmatprep.subr.bf16.mxu0 %v4313_v55  ;;  %v4433_v14 = vcombine.high %v5544_v36, %v847_v33  ;;  %v662_v26 = vmax.f32 %v499_v1, 0.0  ;;  %v664_v27 = vmax.f32 %v602_v4, 0.0  ;;  %v4432_v55 = vcombine.low %v5544_v36, %v847_v33  ;;  %v5582_v1 = vld [vmem:[#allocation2 + $0x388] sm:$0xff] }
 0x125   : > { %v503_v17 = vadd.f32 %v502_v12, %v5372_v50  ;;  %v606_v19 = vadd.f32 %v605_v13, %v5376_v51  ;;  %2354 = vmatprep.mubr.bf16.mxu0 %v5546_v5  ;;  %2457 = vmatprep.mubr.bf16.mxu1 %v5548_v7  ;;  %v663_v28 = vmax.f32 %v501_v8, 0.0  ;;  %v665_v29 = vmax.f32 %v604_v9, 0.0  ;;  %v5592_v9 = vld [vmem:[#allocation2 + $0x788] sm:$0xff] }
 0x126   : > { %2613 = vmatprep.subr.bf16.mxu1 %v4441_v59  ;;  %v504_v30 = vpop.f32.mrf.mxu0  ;;  %v607_v34 = vpop.f32.mrf.mxu1  ;;  %2355 = vmatmul.mubr.bf16.gmra.mxu0 %v5538_v62  ;;  %v4425_v56 = vcombine.high %v5563_v22, %v5565_v23  ;;  %v4553_v61 = vcombine.high %v5568_v38, %v5570_v39  ;;  %v959_v12 = vld [vmem:[#allocation2 + $0x7a8] sm:$0xff]  ;;  %v4552_v22 = vcombine.low %v5568_v38, %v5570_v39 }
 0x127   : > { %v666_v45 = vmax.f32 %v503_v17, 0.0  ;;  %v668_v46 = vmax.f32 %v606_v19, 0.0  ;;  %v505_v47 = vadd.f32 %v504_v30, %v5364_v48  ;;  %v608_v52 = vadd.f32 %v607_v34, %v5368_v49  ;;  %2458 = vmatmul.mubr.bf16.gmra.mxu1 %v5540_v63  ;;  %2511 = vmatpush1.bf16.msra.mxu0 %v4312_v58  ;;  %v5584_v58 = vld [vmem:[#allocation2 + $0x3a8] sm:$0xff] }
 0x128   : > { %2614 = vmatpush1.bf16.msra.mxu1 %v4440_v15  ;;  %v508_v53 = vpop.f32.mrf.mxu0  ;;  %v611_v54 = vpop.f32.mrf.mxu1  ;;  %2512 = vmatprep.subr.bf16.mxu0 %v4305_v18  ;;  %v4416_v23 = vcombine.low %v5582_v1, %v5584_v58  ;;  %v5613_v30 = vld [vmem:[#allocation2 + $0x368] sm:$0xff] }
 0x129   : > { %v667_v57 = vmax.f32 %v505_v47, 0.0  ;;  %v669_v59 = vmax.f32 %v608_v52, 0.0  ;;  %2615 = vmatprep.subr.bf16.mxu1 %v4433_v14  ;;  %v5586_v4 = vpack.c.bf16 %v666_v45, %v662_v26  ;;  %v5588_v31 = vpack.c.bf16 %v668_v46, %v664_v27  ;;  %v5616_v52 = vld [vmem:[#allocation2 + $0x748] sm:$0xff] }
 0x12a   : > { %v509_v32 = vadd.f32 %v508_v53, %v5372_v50  ;;  %v612_v36 = vadd.f32 %v611_v54, %v5376_v51  ;;  %v510_v33 = vpop.f32.mrf.mxu0  ;;  %v613_v8 = vpop.f32.mrf.mxu1  ;;  %v4417_v26 = vcombine.high %v5582_v1, %v5584_v58  ;;  %v5618_v53 = vld [vmem:[#allocation2 + $0x768] sm:$0xff]  ;;  %v4544_v1 = vcombine.low %v5592_v9, %v959_v12 }
 0x12b   : > { %v5594_v13 = vpack.c.bf16 %v667_v57, %v663_v28  ;;  %v5596_v15 = vpack.c.bf16 %v669_v59, %v665_v29  ;;  %v511_v18 = vadd.f32 %v510_v33, %v5364_v48  ;;  %v614_v17 = vadd.f32 %v613_v8, %v5368_v49  ;;  %2513 = vmatpush1.bf16.msra.mxu0 %v4304_v16  ;;  %v5611_v29 = vld [vmem:[#allocation2 + $0x348] sm:$0xff] }
 0x12c   : > { %2616 = vmatpush1.bf16.msra.mxu1 %v4432_v55  ;;  %v512_v19 = vpop.f32.mrf.mxu0  ;;  %v615_v14 = vpop.f32.mrf.mxu1  ;;  %2514 = vmatprep.subr.bf16.mxu0 %v4425_v56  ;;  %v4545_v16 = vcombine.high %v5592_v9, %v959_v12  ;;  %v670_v34 = vmax.f32 %v509_v32, 0.0  ;;  %v672_v38 = vmax.f32 %v612_v36, 0.0  ;;  %v4409_v58 = vcombine.high %v5611_v29, %v5613_v30 }
 0x12d   : > { %v513_v27 = vadd.f32 %v512_v19, %v5372_v50  ;;  %v616_v28 = vadd.f32 %v615_v14, %v5376_v51  ;;  %2364 = vmatprep.mubr.bf16.mxu0 %v5594_v13  ;;  %2467 = vmatprep.mubr.bf16.mxu1 %v5596_v15  ;;  %v671_v39 = vmax.f32 %v511_v18, 0.0  ;;  %v673_v45 = vmax.f32 %v614_v17, 0.0  ;;  %v811_v18 = vld [vmem:[#allocation2 + $0x308] sm:$0xff] }
 0x12e   : > { %2617 = vmatprep.subr.bf16.mxu1 %v4553_v61  ;;  %v514_v46 = vpop.f32.mrf.mxu0  ;;  %v617_v47 = vpop.f32.mrf.mxu1  ;;  %2365 = vmatmul.mubr.bf16.gmra.mxu0 %v5586_v4  ;;  %v4408_v33 = vcombine.low %v5611_v29, %v5613_v30  ;;  %v4537_v8 = vcombine.high %v5616_v52, %v5618_v53 }
 0x12f   : > { %v674_v54 = vmax.f32 %v513_v27, 0.0  ;;  %v676_v55 = vmax.f32 %v616_v28, 0.0  ;;  %v515_v56 = vadd.f32 %v514_v46, %v5364_v48  ;;  %v618_v57 = vadd.f32 %v617_v47, %v5368_v49  ;;  %2468 = vmatmul.mubr.bf16.gmra.mxu1 %v5588_v31  ;;  %2515 = vmatpush2.bf16.msra.mxu0 %v4424_v60  ;;  %v815_v60 = vld [vmem:[#allocation2 + $0x328] sm:$0xff] }
 0x130   : > { %2618 = vmatpush2.bf16.msra.mxu1 %v4552_v22  ;;  %v518_v59 = vpop.f32.mrf.mxu0  ;;  %v621_v61 = vpop.f32.mrf.mxu1  ;;  %2516 = vmatprep.subr.bf16.mxu0 %v4417_v26  ;;  %v939_v26 = vld [vmem:[#allocation2 + $0x708] sm:$0xff]  ;;  %v4536_v46 = vcombine.low %v5616_v52, %v5618_v53  ;;  %v4400_v47 = vcombine.low %v811_v18, %v815_v60 }
 0x131   : > { %v675_v32 = vmax.f32 %v515_v56, 0.0  ;;  %v677_v36 = vmax.f32 %v618_v57, 0.0  ;;  %2619 = vmatprep.subr.bf16.mxu1 %v4545_v16  ;;  %v5630_v17 = vpack.c.bf16 %v674_v54, %v670_v34  ;;  %v5632_v19 = vpack.c.bf16 %v676_v55, %v672_v38  ;;  %v943_v27 = vld [vmem:[#allocation2 + $0x728] sm:$0xff] }
 0x132   : > { %v519_v9 = vadd.f32 %v518_v59, %v5372_v50  ;;  %v622_v12 = vadd.f32 %v621_v61, %v5376_v51  ;;  %v520_v14 = vpop.f32.mrf.mxu0  ;;  %v623_v22 = vpop.f32.mrf.mxu1  ;;  %v4401_v54 = vcombine.high %v811_v18, %v815_v60  ;;  %v803_v56 = vld [vmem:[#allocation2 + $0x2c8] sm:$0xff]  ;;  %v4528_v60 = vcombine.low %v939_v26, %v943_v27 }
 0x133   : > { %v5636_v28 = vpack.c.bf16 %v675_v32, %v671_v39  ;;  %v5638_v16 = vpack.c.bf16 %v677_v36, %v673_v45  ;;  %v521_v29 = vadd.f32 %v520_v14, %v5364_v48  ;;  %v624_v30 = vadd.f32 %v623_v22, %v5368_v49  ;;  %2517 = vmatpush2.bf16.msra.mxu0 %v4416_v23  ;;  %v807_v23 = vld [vmem:[#allocation2 + $0x2e8] sm:$0xff] }
 0x134   : > { %2620 = vmatpush2.bf16.msra.mxu1 %v4544_v1  ;;  %v522_v34 = vpop.f32.mrf.mxu0  ;;  %v625_v38 = vpop.f32.mrf.mxu1  ;;  %2518 = vmatprep.subr.bf16.mxu0 %v4409_v58  ;;  %v4529_v45 = vcombine.high %v939_v26, %v943_v27  ;;  %v678_v57 = vmax.f32 %v519_v9, 0.0  ;;  %v680_v59 = vmax.f32 %v622_v12, 0.0  ;;  %v931_v36 = vld [vmem:[#allocation2 + $0x6c8] sm:$0xff]  ;;  %v4393_v9 = vcombine.high %v803_v56, %v807_v23 }
 0x135   : > { %v523_v55 = vadd.f32 %v522_v34, %v5372_v50  ;;  %v626_v39 = vadd.f32 %v625_v38, %v5376_v51  ;;  %2374 = vmatprep.mubr.bf16.mxu0 %v5636_v28  ;;  %2477 = vmatprep.mubr.bf16.mxu1 %v5638_v16  ;;  %v679_v61 = vmax.f32 %v521_v29, 0.0  ;;  %v681_v1 = vmax.f32 %v624_v30, 0.0  ;;  %v935_v18 = vld [vmem:[#allocation2 + $0x6e8] sm:$0xff] }
 0x136   : > { %2621 = vmatprep.subr.bf16.mxu1 %v4537_v8  ;;  %v524_v58 = vpop.f32.mrf.mxu0  ;;  %v627_v52 = vpop.f32.mrf.mxu1  ;;  %2375 = vmatmul.mubr.bf16.gmra.mxu0 %v5630_v17  ;;  %v4521_v22 = vcombine.high %v931_v36, %v935_v18  ;;  %v795_v29 = vld [vmem:[#allocation2 + $0x288] sm:$0xff]  ;;  %v4520_v26 = vcombine.low %v931_v36, %v935_v18  ;;  %v772_v36 = vld [vmem:[#allocation2 + $0x1d0] sm:$0xff] }
 0x137   : > { %v682_v53 = vmax.f32 %v523_v55, 0.0  ;;  %v684_v50 = vmax.f32 %v626_v39, 0.0  ;;  %v525_v51 = vadd.f32 %v524_v58, %v5364_v48  ;;  %v628_v32 = vadd.f32 %v627_v52, %v5368_v49  ;;  %2478 = vmatmul.mubr.bf16.gmra.mxu1 %v5632_v19  ;;  %2519 = vmatpush2.bf16.msra.mxu0 %v4408_v33  ;;  %v799_v30 = vld [vmem:[#allocation2 + $0x2a8] sm:$0xff]  ;;  %v776_v18 = vld [vmem:[#allocation2 + $0x1f0] sm:$0xff] }
 0x138   : > { %2622 = vmatpush2.bf16.msra.mxu1 %v4536_v46  ;;  %2520 = vmatprep.subr.bf16.mxu0 %v4401_v54  ;;  %v4392_v33 = vcombine.low %v803_v56, %v807_v23  ;;  %v923_v38 = vld [vmem:[#allocation2 + $0x688] sm:$0xff]  ;;  %v4385_v27 = vcombine.high %v795_v29, %v799_v30 }
 0x139   : > { %v683_v8 = vmax.f32 %v525_v51, 0.0  ;;  %v685_v12 = vmax.f32 %v628_v32, 0.0  ;;  %2623 = vmatprep.subr.bf16.mxu1 %v4529_v45  ;;  %v5652_v14 = vpack.c.bf16 %v682_v53, %v678_v57  ;;  %v5654_v48 = vpack.c.bf16 %v684_v50, %v680_v59  ;;  %v927_v46 = vld [vmem:[#allocation2 + $0x6a8] sm:$0xff] }
 0x13a   : > { %v787_v54 = vld [vmem:[#allocation2 + $0x248] sm:$0xff]  ;;  %v4513_v39 = vcombine.high %v923_v38, %v927_v46  ;;  %v4512_v56 = vcombine.low %v923_v38, %v927_v46  ;;  %v892_v38 = vld [vmem:[#allocation2 + $0x590] sm:$0xff] }
 0x13b   : > { %v5656_v49 = vpack.c.bf16 %v683_v8, %v679_v61  ;;  %v5658_v34 = vpack.c.bf16 %v685_v12, %v681_v1  ;;  %2521 = vmatpush2.bf16.msra.mxu0 %v4400_v47  ;;  %v791_v55 = vld [vmem:[#allocation2 + $0x268] sm:$0xff]  ;;  %v4384_v47 = vcombine.low %v795_v29, %v799_v30  ;;  %v764_v30 = vld [vmem:[#allocation2 + $0x190] sm:$0xff] }
 0x13c   : > { %2624 = vmatpush2.bf16.msra.mxu1 %v4528_v60  ;;  %2522 = vmatprep.subr.bf16.mxu0 %v4393_v9  ;;  %v915_v45 = vld [vmem:[#allocation2 + $0x648] sm:$0xff]  ;;  %v4377_v23 = vcombine.high %v787_v54, %v791_v55  ;;  %v4376_v53 = vcombine.low %v787_v54, %v791_v55  ;;  %v900_v60 = vld [vmem:[#allocation2 + $0x5d0] sm:$0xff] }
 0x13d   : > { %2384 = vmatprep.mubr.bf16.mxu0 %v5656_v49  ;;  %2487 = vmatprep.mubr.bf16.mxu1 %v5658_v34  ;;  %v919_v57 = vld [vmem:[#allocation2 + $0x668] sm:$0xff]  ;;  %v904_v9 = vld [vmem:[#allocation2 + $0x5f0] sm:$0xff] }
 0x13e   : > { %2625 = vmatprep.subr.bf16.mxu1 %v4521_v22  ;;  %2385 = vmatmul.mubr.bf16.gmra.mxu0 %v5652_v14  ;;  %v4505_v59 = vcombine.high %v915_v45, %v919_v57  ;;  %v779_v61 = vld [vmem:[#allocation2 + $0x208] sm:$0xff]  ;;  %v4504_v50 = vcombine.low %v915_v45, %v919_v57  ;;  %v4363_v22 = vcombine.high %v772_v36, %v776_v18  ;;  %v896_v46 = vld [vmem:[#allocation2 + $0x5b0] sm:$0xff] }
 0x13f   : > { %2488 = vmatmul.mubr.bf16.gmra.mxu1 %v5654_v48  ;;  %2523 = vmatpush2.bf16.msra.mxu0 %v4392_v33  ;;  %v783_v1 = vld [vmem:[#allocation2 + $0x228] sm:$0xff]  ;;  %v4491_v29 = vcombine.high %v900_v60, %v904_v9  ;;  %v768_v33 = vld [vmem:[#allocation2 + $0x1b0] sm:$0xff]  ;;  %v4483_v55 = vcombine.high %v892_v38, %v896_v46 }
 0x140   : > { %2626 = vmatpush2.bf16.msra.mxu1 %v4520_v26  ;;  %2530 = vmatprep.mubr.bf16.mxu0 %v5396_v20  ;;  %v907_v58 = vld [vmem:[#allocation2 + $0x608] sm:$0xff]  ;;  %v4369_v51 = vcombine.high %v779_v61, %v783_v1  ;;  %v4368_v8 = vcombine.low %v779_v61, %v783_v1  ;;  %v4362_v26 = vcombine.low %v772_v36, %v776_v18  ;;  %v760_v45 = vld [vmem:[#allocation2 + $0x170] sm:$0xff] }
 0x141   : > { %2633 = vmatprep.mubr.bf16.mxu1 %v5398_v21  ;;  %2524 = vmatprep.subr.bf16.mxu0 %v4385_v27  ;;  %v911_v52 = vld [vmem:[#allocation2 + $0x628] sm:$0xff]  ;;  %v4490_v27 = vcombine.low %v900_v60, %v904_v9  ;;  %v4355_v54 = vcombine.high %v764_v30, %v768_v33  ;;  %v884_v57 = vld [vmem:[#allocation2 + $0x550] sm:$0xff] }
 0x142   : > { %2627 = vmatprep.subr.bf16.mxu1 %v4513_v39  ;;  %v4497_v32 = vcombine.high %v907_v58, %v911_v52  ;;  %v4496_v12 = vcombine.low %v907_v58, %v911_v52  ;;  %v756_v39 = vld [vmem:[#allocation2 + $0x150] sm:$0xff] }
 0x143   : > { %2525 = vmatpush2.bf16.msra.mxu0 %v4384_v47  ;;  %v888_v47 = vld [vmem:[#allocation2 + $0x570] sm:$0xff] }
 0x144   : > { %2628 = vmatpush2.bf16.msra.mxu1 %v4512_v56  ;;  %2526 = vmatprep.subr.bf16.mxu0 %v4377_v23  ;;  %v4354_v56 = vcombine.low %v764_v30, %v768_v33  ;;  %v4482_v23 = vcombine.low %v892_v38, %v896_v46  ;;  %v4475_v61 = vcombine.high %v884_v57, %v888_v47  ;;  %v748_v1 = vld [vmem:[#allocation2 + $0x110] sm:$0xff] }
 0x145   : > { %2629 = vmatprep.subr.bf16.mxu1 %v4505_v59  ;;  %v4347_v59 = vcombine.high %v756_v39, %v760_v45  ;;  %v752_v58 = vld [vmem:[#allocation2 + $0x130] sm:$0xff] }
 0x146   : > { %v876_v52 = vld [vmem:[#allocation2 + $0x510] sm:$0xff] }
 0x147   : > { %2527 = vmatpush2.bf16.msra.mxu0 %v4376_v53  ;;  %v880_v53 = vld [vmem:[#allocation2 + $0x530] sm:$0xff] }
 0x148   : > { %2630 = vmatpush2.bf16.msra.mxu1 %v4504_v50  ;;  %2528 = vmatprep.subr.bf16.mxu0 %v4369_v51  ;;  %v4346_v50 = vcombine.low %v756_v39, %v760_v45  ;;  %v4474_v51 = vcombine.low %v884_v57, %v888_v47  ;;  %v4467_v36 = vcombine.high %v876_v52, %v880_v53  ;;  %v740_v18 = vld [vmem:[#allocation2 + $0xd0] sm:$0xff] }
 0x149   : > { %2631 = vmatprep.subr.bf16.mxu1 %v4497_v32  ;;  %v4339_v32 = vcombine.high %v748_v1, %v752_v58  ;;  %v744_v60 = vld [vmem:[#allocation2 + $0xf0] sm:$0xff] }
 0x14a   : > { %v868_v9 = vld [vmem:[#allocation2 + $0x4d0] sm:$0xff] }
 0x14b   : > { %2529 = vmatpush2.bf16.msra.mxu0 %v4368_v8  ;;  %v872_v8 = vld [vmem:[#allocation2 + $0x4f0] sm:$0xff] }
 0x14c   : > { %2632 = vmatpush2.bf16.msra.mxu1 %v4496_v12  ;;  %2704 = vmatprep.subr.bf16.mxu0 %v4363_v22  ;;  %v4338_v12 = vcombine.low %v748_v1, %v752_v58  ;;  %v4466_v22 = vcombine.low %v876_v52, %v880_v53  ;;  %v4459_v30 = vcombine.high %v868_v9, %v872_v8  ;;  %v732_v33 = vld [vmem:[#allocation2 + $0x90] sm:$0xff] }
 0x14d   : > { %2807 = vmatprep.subr.bf16.mxu1 %v4491_v29  ;;  %v4331_v29 = vcombine.high %v740_v18, %v744_v60  ;;  %v736_v38 = vld [vmem:[#allocation2 + $0xb0] sm:$0xff] }
 0x14e   : > { %2531 = vmatmul.mubr.bf16.vlgmr.msra.gmra.mxu0 %v5402_v24  ;;  %v860_v46 = vld [vmem:[#allocation2 + $0x490] sm:$0xff] }
 0x14f   : > { %2634 = vmatmul.mubr.bf16.vlgmr.msra.gmra.mxu1 %v5404_v25  ;;  %2540 = vmatprep.mubr.bf16.mxu0 %v5451_v10  ;;  %v724_v45 = vld [vmem:[#allocation2 + $0x50] sm:$0xff] }
 0x150   : > { %2643 = vmatprep.mubr.bf16.mxu1 %v5453_v11  ;;  %2705 = vmatpush1.bf16.msra.mxu0 %v4362_v26  ;;  %v864_v26 = vld [vmem:[#allocation2 + $0x4b0] sm:$0xff] }
 0x151   : > { %2808 = vmatpush1.bf16.msra.mxu1 %v4490_v27  ;;  %2706 = vmatprep.subr.bf16.mxu0 %v4355_v54  ;;  %v4330_v27 = vcombine.low %v740_v18, %v744_v60  ;;  %v4458_v54 = vcombine.low %v868_v9, %v872_v8  ;;  %v4451_v39 = vcombine.high %v860_v46, %v864_v26  ;;  %v728_v57 = vld [vmem:[#allocation2 + $0x70] sm:$0xff] }
 0x152   : > { %2809 = vmatprep.subr.bf16.mxu1 %v4483_v55  ;;  %v4323_v55 = vcombine.high %v732_v33, %v736_v38  ;;  %v852_v47 = vld [vmem:[#allocation2 + $0x450] sm:$0xff] }
 0x153   : > { %v716_v58 = vld [vmem:[#allocation2 + $0x10] sm:$0xff] }
 0x154   : > { %2707 = vmatpush1.bf16.msra.mxu0 %v4354_v56  ;;  %v856_v56 = vld [vmem:[#allocation2 + $0x470] sm:$0xff] }
 0x155   : > { %2810 = vmatpush1.bf16.msra.mxu1 %v4482_v23  ;;  %2708 = vmatprep.subr.bf16.mxu0 %v4347_v59  ;;  %v4322_v23 = vcombine.low %v732_v33, %v736_v38  ;;  %v4450_v59 = vcombine.low %v860_v46, %v864_v26  ;;  %v4443_v1 = vcombine.high %v852_v47, %v856_v56  ;;  %v720_v52 = vld [vmem:[#allocation2 + $0x30] sm:$0xff] }
 0x156   : > { %2541 = vmatmul.mubr.bf16.gmra.mxu0 %v5443_v35  ;;  %2811 = vmatprep.subr.bf16.mxu1 %v4475_v61  ;;  %v4315_v61 = vcombine.high %v724_v45, %v728_v57  ;;  %v844_v53 = vld [vmem:[#allocation2 + $0x410] sm:$0xff] }
 0x157   : > { %2644 = vmatmul.mubr.bf16.gmra.mxu1 %v5445_v37  ;;  %2550 = vmatprep.mubr.bf16.mxu0 %v5498_v6  ;;  %v836_v60 = vld [vmem:[#allocation2 + $0x3d0] sm:$0xff] }
 0x158   : > { %2653 = vmatprep.mubr.bf16.mxu1 %v5500_v0  ;;  %2709 = vmatpush1.bf16.msra.mxu0 %v4346_v50  ;;  %v848_v50 = vld [vmem:[#allocation2 + $0x430] sm:$0xff] }
 0x159   : > { %2812 = vmatpush1.bf16.msra.mxu1 %v4474_v51  ;;  %2710 = vmatprep.subr.bf16.mxu0 %v4339_v32  ;;  %v4314_v51 = vcombine.low %v724_v45, %v728_v57  ;;  %v4442_v32 = vcombine.low %v852_v47, %v856_v56  ;;  %v4435_v18 = vcombine.high %v844_v53, %v848_v50  ;;  %v840_v9 = vld [vmem:[#allocation2 + $0x3f0] sm:$0xff] }
 0x15a   : > { %2813 = vmatprep.subr.bf16.mxu1 %v4467_v36  ;;  %v4307_v36 = vcombine.high %v716_v58, %v720_v52  ;;  %v964_v8 = vld [vmem:[#allocation2 + $0x7d0] sm:$0xff] }
 0x15b   : > { %v828_v38 = vld [vmem:[#allocation2 + $0x390] sm:$0xff] }
 0x15c   : > { %2711 = vmatpush1.bf16.msra.mxu0 %v4338_v12  ;;  %v968_v12 = vld [vmem:[#allocation2 + $0x7f0] sm:$0xff] }
 0x15d   : > { %2814 = vmatpush1.bf16.msra.mxu1 %v4466_v22  ;;  %2712 = vmatprep.subr.bf16.mxu0 %v4331_v29  ;;  %v4306_v22 = vcombine.low %v716_v58, %v720_v52  ;;  %v4434_v29 = vcombine.low %v844_v53, %v848_v50  ;;  %v4555_v33 = vcombine.high %v964_v8, %v968_v12  ;;  %v832_v46 = vld [vmem:[#allocation2 + $0x3b0] sm:$0xff] }
 0x15e   : > { %2551 = vmatmul.mubr.bf16.gmra.mxu0 %v5490_v2  ;;  %2815 = vmatprep.subr.bf16.mxu1 %v4459_v30  ;;  %v4427_v30 = vcombine.high %v836_v60, %v840_v9  ;;  %v956_v26 = vld [vmem:[#allocation2 + $0x790] sm:$0xff] }
 0x15f   : > { %2654 = vmatmul.mubr.bf16.gmra.mxu1 %v5492_v3  ;;  %2560 = vmatprep.mubr.bf16.mxu0 %v5546_v5  ;;  %v820_v57 = vld [vmem:[#allocation2 + $0x350] sm:$0xff] }
 0x160   : > { %2663 = vmatprep.mubr.bf16.mxu1 %v5548_v7  ;;  %2713 = vmatpush1.bf16.msra.mxu0 %v4330_v27  ;;  %v960_v27 = vld [vmem:[#allocation2 + $0x7b0] sm:$0xff] }
 0x161   : > { %2816 = vmatpush1.bf16.msra.mxu1 %v4458_v54  ;;  %2714 = vmatprep.subr.bf16.mxu0 %v4323_v55  ;;  %v4426_v54 = vcombine.low %v836_v60, %v840_v9  ;;  %v4554_v55 = vcombine.low %v964_v8, %v968_v12  ;;  %v4547_v45 = vcombine.high %v956_v26, %v960_v27  ;;  %v824_v47 = vld [vmem:[#allocation2 + $0x370] sm:$0xff] }
 0x162   : > { %2817 = vmatprep.subr.bf16.mxu1 %v4451_v39  ;;  %v4419_v39 = vcombine.high %v828_v38, %v832_v46  ;;  %v948_v56 = vld [vmem:[#allocation2 + $0x750] sm:$0xff] }
 0x163   : > { %v812_v52 = vld [vmem:[#allocation2 + $0x310] sm:$0xff] }
 0x164   : > { %2715 = vmatpush1.bf16.msra.mxu0 %v4322_v23  ;;  %v952_v23 = vld [vmem:[#allocation2 + $0x770] sm:$0xff] }
 0x165   : > { %2818 = vmatpush1.bf16.msra.mxu1 %v4450_v59  ;;  %2716 = vmatprep.subr.bf16.mxu0 %v4315_v61  ;;  %v4418_v59 = vcombine.low %v828_v38, %v832_v46  ;;  %v4546_v61 = vcombine.low %v956_v26, %v960_v27  ;;  %v4539_v58 = vcombine.high %v948_v56, %v952_v23  ;;  %v816_v53 = vld [vmem:[#allocation2 + $0x330] sm:$0xff] }
 0x166   : > { %2561 = vmatmul.mubr.bf16.gmra.mxu0 %v5538_v62  ;;  %2819 = vmatprep.subr.bf16.mxu1 %v4443_v1  ;;  %v4411_v1 = vcombine.high %v820_v57, %v824_v47  ;;  %v940_v50 = vld [vmem:[#allocation2 + $0x710] sm:$0xff] }
 0x167   : > { %2664 = vmatmul.mubr.bf16.gmra.mxu1 %v5540_v63  ;;  %2570 = vmatprep.mubr.bf16.mxu0 %v5594_v13  ;;  %v804_v9 = vld [vmem:[#allocation2 + $0x2d0] sm:$0xff] }
 0x168   : > { %2673 = vmatprep.mubr.bf16.mxu1 %v5596_v15  ;;  %2717 = vmatpush1.bf16.msra.mxu0 %v4314_v51  ;;  %v944_v51 = vld [vmem:[#allocation2 + $0x730] sm:$0xff] }
 0x169   : > { %2820 = vmatpush1.bf16.msra.mxu1 %v4442_v32  ;;  %2718 = vmatprep.subr.bf16.mxu0 %v4307_v36  ;;  %v4410_v32 = vcombine.low %v820_v57, %v824_v47  ;;  %v4538_v36 = vcombine.low %v948_v56, %v952_v23  ;;  %v4531_v60 = vcombine.high %v940_v50, %v944_v51  ;;  %v808_v8 = vld [vmem:[#allocation2 + $0x2f0] sm:$0xff] }
 0x16a   : > { %2821 = vmatprep.subr.bf16.mxu1 %v4435_v18  ;;  %v4403_v18 = vcombine.high %v812_v52, %v816_v53  ;;  %v932_v12 = vld [vmem:[#allocation2 + $0x6d0] sm:$0xff] }
 0x16b   : > { %v796_v46 = vld [vmem:[#allocation2 + $0x290] sm:$0xff] }
 0x16c   : > { %2719 = vmatpush1.bf16.msra.mxu0 %v4306_v22  ;;  %v936_v22 = vld [vmem:[#allocation2 + $0x6f0] sm:$0xff] }
 0x16d   : > { %2822 = vmatpush1.bf16.msra.mxu1 %v4434_v29  ;;  %2720 = vmatprep.subr.bf16.mxu0 %v4427_v30  ;;  %v4402_v29 = vcombine.low %v812_v52, %v816_v53  ;;  %v4530_v30 = vcombine.low %v940_v50, %v944_v51  ;;  %v4523_v38 = vcombine.high %v932_v12, %v936_v22  ;;  %v800_v26 = vld [vmem:[#allocation2 + $0x2b0] sm:$0xff] }
 0x16e   : > { %2571 = vmatmul.mubr.bf16.gmra.mxu0 %v5586_v4  ;;  %2823 = vmatprep.subr.bf16.mxu1 %v4555_v33  ;;  %v4395_v33 = vcombine.high %v804_v9, %v808_v8  ;;  %v924_v27 = vld [vmem:[#allocation2 + $0x690] sm:$0xff] }
 0x16f   : > { %2674 = vmatmul.mubr.bf16.gmra.mxu1 %v5588_v31  ;;  %2580 = vmatprep.mubr.bf16.mxu0 %v5636_v28  ;;  %v788_v47 = vld [vmem:[#allocation2 + $0x250] sm:$0xff] }
 0x170   : > { %2683 = vmatprep.mubr.bf16.mxu1 %v5638_v16  ;;  %2721 = vmatpush2.bf16.msra.mxu0 %v4426_v54  ;;  %v928_v54 = vld [vmem:[#allocation2 + $0x6b0] sm:$0xff] }
 0x171   : > { %2824 = vmatpush2.bf16.msra.mxu1 %v4554_v55  ;;  %2722 = vmatprep.subr.bf16.mxu0 %v4419_v39  ;;  %v4394_v55 = vcombine.low %v804_v9, %v808_v8  ;;  %v4522_v39 = vcombine.low %v932_v12, %v936_v22  ;;  %v4515_v57 = vcombine.high %v924_v27, %v928_v54  ;;  %v792_v56 = vld [vmem:[#allocation2 + $0x270] sm:$0xff]  ;;  %v773_v8 = vld [vmem:[#allocation2 + $0x1d8] sm:$0xff] }
 0x172   : > { %2825 = vmatprep.subr.bf16.mxu1 %v4547_v45  ;;  %v4387_v45 = vcombine.high %v796_v46, %v800_v26  ;;  %v916_v23 = vld [vmem:[#allocation2 + $0x650] sm:$0xff]  ;;  %v777_v12 = vld [vmem:[#allocation2 + $0x1f8] sm:$0xff] }
 0x173   : > { %v780_v53 = vld [vmem:[#allocation2 + $0x210] sm:$0xff]  ;;  %v901_v22 = vld [vmem:[#allocation2 + $0x5d8] sm:$0xff] }
 0x174   : > { %2723 = vmatpush2.bf16.msra.mxu0 %v4418_v59  ;;  %v920_v59 = vld [vmem:[#allocation2 + $0x670] sm:$0xff] }
 0x175   : > { %2826 = vmatpush2.bf16.msra.mxu1 %v4546_v61  ;;  %2724 = vmatprep.subr.bf16.mxu0 %v4411_v1  ;;  %v4386_v61 = vcombine.low %v796_v46, %v800_v26  ;;  %v4514_v1 = vcombine.low %v924_v27, %v928_v54  ;;  %v4507_v52 = vcombine.high %v916_v23, %v920_v59  ;;  %v784_v50 = vld [vmem:[#allocation2 + $0x230] sm:$0xff]  ;;  %v765_v26 = vld [vmem:[#allocation2 + $0x198] sm:$0xff] }
 0x176   : > { %2581 = vmatmul.mubr.bf16.gmra.mxu0 %v5630_v17  ;;  %2827 = vmatprep.subr.bf16.mxu1 %v4539_v58  ;;  %v4379_v58 = vcombine.high %v788_v47, %v792_v56  ;;  %v908_v51 = vld [vmem:[#allocation2 + $0x610] sm:$0xff]  ;;  %v769_v27 = vld [vmem:[#allocation2 + $0x1b8] sm:$0xff] }
 0x177   : > { %2684 = vmatmul.mubr.bf16.gmra.mxu1 %v5632_v19  ;;  %2590 = vmatprep.mubr.bf16.mxu0 %v5656_v49  ;;  %v893_v54 = vld [vmem:[#allocation2 + $0x598] sm:$0xff] }
 0x178   : > { %2693 = vmatprep.mubr.bf16.mxu1 %v5658_v34  ;;  %2725 = vmatpush2.bf16.msra.mxu0 %v4410_v32  ;;  %v912_v32 = vld [vmem:[#allocation2 + $0x630] sm:$0xff] }
 0x179   : > { %2828 = vmatpush2.bf16.msra.mxu1 %v4538_v36  ;;  %2726 = vmatprep.subr.bf16.mxu0 %v4403_v18  ;;  %v4378_v36 = vcombine.low %v788_v47, %v792_v56  ;;  %v4506_v18 = vcombine.low %v916_v23, %v920_v59  ;;  %v4499_v9 = vcombine.high %v908_v51, %v912_v32  ;;  %v757_v56 = vld [vmem:[#allocation2 + $0x158] sm:$0xff] }
 0x17a   : > { %2829 = vmatprep.subr.bf16.mxu1 %v4531_v60  ;;  %v4371_v60 = vcombine.high %v780_v53, %v784_v50  ;;  %v761_v23 = vld [vmem:[#allocation2 + $0x178] sm:$0xff] }
 0x17b   : > { %v885_v59 = vld [vmem:[#allocation2 + $0x558] sm:$0xff] }
 0x17c   : > { %2727 = vmatpush2.bf16.msra.mxu0 %v4402_v29  ;;  %v905_v29 = vld [vmem:[#allocation2 + $0x5f8] sm:$0xff] }
 0x17d   : > { %2830 = vmatpush2.bf16.msra.mxu1 %v4530_v30  ;;  %2728 = vmatprep.subr.bf16.mxu0 %v4395_v33  ;;  %v4370_v30 = vcombine.low %v780_v53, %v784_v50  ;;  %v4498_v33 = vcombine.low %v908_v51, %v912_v32  ;;  %v4493_v46 = vcombine.high %v901_v22, %v905_v29  ;;  %v749_v50 = vld [vmem:[#allocation2 + $0x118] sm:$0xff] }
 0x17e   : > { %2591 = vmatmul.mubr.bf16.gmra.mxu0 %v5652_v14  ;;  %2831 = vmatprep.subr.bf16.mxu1 %v4523_v38  ;;  %v4365_v38 = vcombine.high %v773_v8, %v777_v12  ;;  %v753_v51 = vld [vmem:[#allocation2 + $0x138] sm:$0xff] }
 0x17f   : > { %2694 = vmatmul.mubr.bf16.gmra.mxu1 %v5654_v48  ;;  %2736 = vmatprep.mubr.bf16.mxu0 %v5396_v20  ;;  %v877_v32 = vld [vmem:[#allocation2 + $0x518] sm:$0xff] }
 0x180   : > { %2729 = vmatpush2.bf16.msra.mxu0 %v4394_v55  ;;  %2839 = vmatprep.mubr.bf16.mxu1 %v5398_v21  ;;  %v897_v55 = vld [vmem:[#allocation2 + $0x5b8] sm:$0xff] }
 0x181   : > { %2832 = vmatpush2.bf16.msra.mxu1 %v4522_v39  ;;  %2730 = vmatprep.subr.bf16.mxu0 %v4387_v45  ;;  %v4364_v39 = vcombine.low %v773_v8, %v777_v12  ;;  %v4492_v45 = vcombine.low %v901_v22, %v905_v29  ;;  %v4485_v47 = vcombine.high %v893_v54, %v897_v55  ;;  %v741_v12 = vld [vmem:[#allocation2 + $0xd8] sm:$0xff] }
 0x182   : > { %2833 = vmatprep.subr.bf16.mxu1 %v4515_v57  ;;  %v4357_v57 = vcombine.high %v765_v26, %v769_v27  ;;  %v745_v22 = vld [vmem:[#allocation2 + $0xf8] sm:$0xff] }
 0x183   : > { %v869_v29 = vld [vmem:[#allocation2 + $0x4d8] sm:$0xff] }
 0x184   : > { %2731 = vmatpush2.bf16.msra.mxu0 %v4386_v61  ;;  %v889_v61 = vld [vmem:[#allocation2 + $0x578] sm:$0xff] }
 0x185   : > { %2834 = vmatpush2.bf16.msra.mxu1 %v4514_v1  ;;  %2732 = vmatprep.subr.bf16.mxu0 %v4379_v58  ;;  %v4356_v1 = vcombine.low %v765_v26, %v769_v27  ;;  %v4484_v58 = vcombine.low %v893_v54, %v897_v55  ;;  %v4477_v53 = vcombine.high %v885_v59, %v889_v61  ;;  %v733_v27 = vld [vmem:[#allocation2 + $0x98] sm:$0xff] }
 0x186   : > { %2835 = vmatprep.subr.bf16.mxu1 %v4507_v52  ;;  %v4349_v52 = vcombine.high %v757_v56, %v761_v23  ;;  %v737_v54 = vld [vmem:[#allocation2 + $0xb8] sm:$0xff] }
 0x187   : > { %v861_v55 = vld [vmem:[#allocation2 + $0x498] sm:$0xff] }
 0x188   : > { %2733 = vmatpush2.bf16.msra.mxu0 %v4378_v36  ;;  %v881_v36 = vld [vmem:[#allocation2 + $0x538] sm:$0xff] }
 0x189   : > { %2836 = vmatpush2.bf16.msra.mxu1 %v4506_v18  ;;  %2734 = vmatprep.subr.bf16.mxu0 %v4371_v60  ;;  %v4348_v18 = vcombine.low %v757_v56, %v761_v23  ;;  %v4476_v60 = vcombine.low %v885_v59, %v889_v61  ;;  %v4469_v8 = vcombine.high %v877_v32, %v881_v36  ;;  %v725_v23 = vld [vmem:[#allocation2 + $0x58] sm:$0xff] }
 0x18a   : > { %2837 = vmatprep.subr.bf16.mxu1 %v4499_v9  ;;  %v4341_v9 = vcombine.high %v749_v50, %v753_v51  ;;  %v729_v59 = vld [vmem:[#allocation2 + $0x78] sm:$0xff] }
 0x18b   : > { %v853_v61 = vld [vmem:[#allocation2 + $0x458] sm:$0xff] }
 0x18c   : > { %2735 = vmatpush2.bf16.msra.mxu0 %v4370_v30  ;;  %v873_v30 = vld [vmem:[#allocation2 + $0x4f8] sm:$0xff] }
 0x18d   : > { %2838 = vmatpush2.bf16.msra.mxu1 %v4498_v33  ;;  %2910 = vmatprep.subr.bf16.mxu0 %v4365_v38  ;;  %v4340_v33 = vcombine.low %v749_v50, %v753_v51  ;;  %v4468_v38 = vcombine.low %v877_v32, %v881_v36  ;;  %v4461_v26 = vcombine.high %v869_v29, %v873_v30  ;;  %v717_v51 = vld [vmem:[#allocation2 + $0x18] sm:$0xff] }
 0x18e   : > { %3013 = vmatprep.subr.bf16.mxu1 %v4493_v46  ;;  %v4333_v46 = vcombine.high %v741_v12, %v745_v22  ;;  %v721_v32 = vld [vmem:[#allocation2 + $0x38] sm:$0xff] }
 0x18f   : > { %2737 = vmatmul.mubr.bf16.vlgmr.msra.gmra.mxu0 %v5402_v24  ;;  %v845_v36 = vld [vmem:[#allocation2 + $0x418] sm:$0xff] }
 0x190   : > { %2840 = vmatmul.mubr.bf16.vlgmr.msra.gmra.mxu1 %v5404_v25  ;;  %2746 = vmatprep.mubr.bf16.mxu0 %v5451_v10 }
 0x191   : > { %2849 = vmatprep.mubr.bf16.mxu1 %v5453_v11  ;;  %2911 = vmatpush1.bf16.msra.mxu0 %v4364_v39  ;;  %v865_v39 = vld [vmem:[#allocation2 + $0x4b8] sm:$0xff] }
 0x192   : > { %3014 = vmatpush1.bf16.msra.mxu1 %v4492_v45  ;;  %2912 = vmatprep.subr.bf16.mxu0 %v4357_v57  ;;  %v4332_v45 = vcombine.low %v741_v12, %v745_v22  ;;  %v4460_v57 = vcombine.low %v869_v29, %v873_v30  ;;  %v4453_v56 = vcombine.high %v861_v55, %v865_v39  ;;  %v837_v22 = vld [vmem:[#allocation2 + $0x3d8] sm:$0xff] }
 0x193   : > { %3015 = vmatprep.subr.bf16.mxu1 %v4485_v47  ;;  %v4325_v47 = vcombine.high %v733_v27, %v737_v54  ;;  %v841_v29 = vld [vmem:[#allocation2 + $0x3f8] sm:$0xff] }
 0x194   : > { %v965_v30 = vld [vmem:[#allocation2 + $0x7d8] sm:$0xff] }
 0x195   : > { %2913 = vmatpush1.bf16.msra.mxu0 %v4356_v1  ;;  %v857_v1 = vld [vmem:[#allocation2 + $0x478] sm:$0xff] }
 0x196   : > { %3016 = vmatpush1.bf16.msra.mxu1 %v4484_v58  ;;  %2914 = vmatprep.subr.bf16.mxu0 %v4349_v52  ;;  %v4324_v58 = vcombine.low %v733_v27, %v737_v54  ;;  %v4452_v52 = vcombine.low %v861_v55, %v865_v39  ;;  %v4445_v50 = vcombine.high %v853_v61, %v857_v1  ;;  %v829_v54 = vld [vmem:[#allocation2 + $0x398] sm:$0xff] }
 0x197   : > { %2747 = vmatmul.mubr.bf16.gmra.mxu0 %v5443_v35  ;;  %3017 = vmatprep.subr.bf16.mxu1 %v4477_v53  ;;  %v4317_v53 = vcombine.high %v725_v23, %v729_v59  ;;  %v833_v55 = vld [vmem:[#allocation2 + $0x3b8] sm:$0xff] }
 0x198   : > { %2850 = vmatmul.mubr.bf16.gmra.mxu1 %v5445_v37  ;;  %2756 = vmatprep.mubr.bf16.mxu0 %v5498_v6  ;;  %v957_v39 = vld [vmem:[#allocation2 + $0x798] sm:$0xff] }
 0x199   : > { %2859 = vmatprep.mubr.bf16.mxu1 %v5500_v0  ;;  %2915 = vmatpush1.bf16.msra.mxu0 %v4348_v18  ;;  %v849_v18 = vld [vmem:[#allocation2 + $0x438] sm:$0xff] }
 0x19a   : > { %3018 = vmatpush1.bf16.msra.mxu1 %v4476_v60  ;;  %2916 = vmatprep.subr.bf16.mxu0 %v4341_v9  ;;  %v4316_v60 = vcombine.low %v725_v23, %v729_v59  ;;  %v4444_v9 = vcombine.low %v853_v61, %v857_v1  ;;  %v4437_v12 = vcombine.high %v845_v36, %v849_v18  ;;  %v821_v59 = vld [vmem:[#allocation2 + $0x358] sm:$0xff] }
 0x19b   : > { %3019 = vmatprep.subr.bf16.mxu1 %v4469_v8  ;;  %v4309_v8 = vcombine.high %v717_v51, %v721_v32  ;;  %v825_v61 = vld [vmem:[#allocation2 + $0x378] sm:$0xff] }
 0x19c   : > { %v949_v1 = vld [vmem:[#allocation2 + $0x758] sm:$0xff] }
 0x19d   : > { %2917 = vmatpush1.bf16.msra.mxu0 %v4340_v33  ;;  %v969_v33 = vld [vmem:[#allocation2 + $0x7f8] sm:$0xff] }
 0x19e   : > { %3020 = vmatpush1.bf16.msra.mxu1 %v4468_v38  ;;  %2918 = vmatprep.subr.bf16.mxu0 %v4333_v46  ;;  %v4308_v38 = vcombine.low %v717_v51, %v721_v32  ;;  %v4436_v46 = vcombine.low %v845_v36, %v849_v18  ;;  %v4557_v27 = vcombine.high %v965_v30, %v969_v33  ;;  %v813_v32 = vld [vmem:[#allocation2 + $0x318] sm:$0xff] }
 0x19f   : > { %2757 = vmatmul.mubr.bf16.gmra.mxu0 %v5490_v2  ;;  %3021 = vmatprep.subr.bf16.mxu1 %v4461_v26  ;;  %v4429_v26 = vcombine.high %v837_v22, %v841_v29  ;;  %v817_v36 = vld [vmem:[#allocation2 + $0x338] sm:$0xff] }
 0x1a0   : > { %2860 = vmatmul.mubr.bf16.gmra.mxu1 %v5492_v3  ;;  %2766 = vmatprep.mubr.bf16.mxu0 %v5546_v5  ;;  %v941_v18 = vld [vmem:[#allocation2 + $0x718] sm:$0xff] }
 0x1a1   : > { %2869 = vmatprep.mubr.bf16.mxu1 %v5548_v7  ;;  %2919 = vmatpush1.bf16.msra.mxu0 %v4332_v45  ;;  %v961_v45 = vld [vmem:[#allocation2 + $0x7b8] sm:$0xff] }
 0x1a2   : > { %3022 = vmatpush1.bf16.msra.mxu1 %v4460_v57  ;;  %2920 = vmatprep.subr.bf16.mxu0 %v4325_v47  ;;  %v4428_v57 = vcombine.low %v837_v22, %v841_v29  ;;  %v4556_v47 = vcombine.low %v965_v30, %v969_v33  ;;  %v4549_v23 = vcombine.high %v957_v39, %v961_v45  ;;  %v805_v29 = vld [vmem:[#allocation2 + $0x2d8] sm:$0xff] }
 0x1a3   : > { %3023 = vmatprep.subr.bf16.mxu1 %v4453_v56  ;;  %v4421_v56 = vcombine.high %v829_v54, %v833_v55  ;;  %v809_v30 = vld [vmem:[#allocation2 + $0x2f8] sm:$0xff] }
 0x1a4   : > { %v933_v33 = vld [vmem:[#allocation2 + $0x6d8] sm:$0xff] }
 0x1a5   : > { %2921 = vmatpush1.bf16.msra.mxu0 %v4324_v58  ;;  %v953_v58 = vld [vmem:[#allocation2 + $0x778] sm:$0xff] }
 0x1a6   : > { %3024 = vmatpush1.bf16.msra.mxu1 %v4452_v52  ;;  %2922 = vmatprep.subr.bf16.mxu0 %v4317_v53  ;;  %v4420_v52 = vcombine.low %v829_v54, %v833_v55  ;;  %v4548_v53 = vcombine.low %v957_v39, %v961_v45  ;;  %v4541_v51 = vcombine.high %v949_v1, %v953_v58  ;;  %v797_v55 = vld [vmem:[#allocation2 + $0x298] sm:$0xff] }
 0x1a7   : > { %2767 = vmatmul.mubr.bf16.gmra.mxu0 %v5538_v62  ;;  %3025 = vmatprep.subr.bf16.mxu1 %v4445_v50  ;;  %v4413_v50 = vcombine.high %v821_v59, %v825_v61  ;;  %v801_v39 = vld [vmem:[#allocation2 + $0x2b8] sm:$0xff] }
 0x1a8   : > { %2870 = vmatmul.mubr.bf16.gmra.mxu1 %v5540_v63  ;;  %2776 = vmatprep.mubr.bf16.mxu0 %v5594_v13  ;;  %v925_v45 = vld [vmem:[#allocation2 + $0x698] sm:$0xff] }
 0x1a9   : > { %2879 = vmatprep.mubr.bf16.mxu1 %v5596_v15  ;;  %2923 = vmatpush1.bf16.msra.mxu0 %v4316_v60  ;;  %v945_v60 = vld [vmem:[#allocation2 + $0x738] sm:$0xff] }
 0x1aa   : > { %3026 = vmatpush1.bf16.msra.mxu1 %v4444_v9  ;;  %2924 = vmatprep.subr.bf16.mxu0 %v4309_v8  ;;  %v4412_v9 = vcombine.low %v821_v59, %v825_v61  ;;  %v4540_v8 = vcombine.low %v949_v1, %v953_v58  ;;  %v4533_v22 = vcombine.high %v941_v18, %v945_v60  ;;  %v789_v61 = vld [vmem:[#allocation2 + $0x258] sm:$0xff] }
 0x1ab   : > { %3027 = vmatprep.subr.bf16.mxu1 %v4437_v12  ;;  %v4405_v12 = vcombine.high %v813_v32, %v817_v36  ;;  %v793_v1 = vld [vmem:[#allocation2 + $0x278] sm:$0xff] }
 0x1ac   : > { %v917_v58 = vld [vmem:[#allocation2 + $0x658] sm:$0xff] }
 0x1ad   : > { %2925 = vmatpush1.bf16.msra.mxu0 %v4308_v38  ;;  %v937_v38 = vld [vmem:[#allocation2 + $0x6f8] sm:$0xff] }
 0x1ae   : > { %3028 = vmatpush1.bf16.msra.mxu1 %v4436_v46  ;;  %2926 = vmatprep.subr.bf16.mxu0 %v4429_v26  ;;  %v4404_v46 = vcombine.low %v813_v32, %v817_v36  ;;  %v4532_v26 = vcombine.low %v941_v18, %v945_v60  ;;  %v4525_v54 = vcombine.high %v933_v33, %v937_v38  ;;  %v781_v36 = vld [vmem:[#allocation2 + $0x218] sm:$0xff] }
 0x1af   : > { %2777 = vmatmul.mubr.bf16.gmra.mxu0 %v5586_v4  ;;  %3029 = vmatprep.subr.bf16.mxu1 %v4557_v27  ;;  %v4397_v27 = vcombine.high %v805_v29, %v809_v30  ;;  %v785_v18 = vld [vmem:[#allocation2 + $0x238] sm:$0xff] }
 0x1b0   : > { %2880 = vmatmul.mubr.bf16.gmra.mxu1 %v5588_v31  ;;  %2786 = vmatprep.mubr.bf16.mxu0 %v5636_v28  ;;  %v909_v60 = vld [vmem:[#allocation2 + $0x618] sm:$0xff] }
 0x1b1   : > { %2889 = vmatprep.mubr.bf16.mxu1 %v5638_v16  ;;  %2927 = vmatpush2.bf16.msra.mxu0 %v4428_v57  ;;  %v929_v57 = vld [vmem:[#allocation2 + $0x6b8] sm:$0xff] }
 0x1b2   : > { %3030 = vmatpush2.bf16.msra.mxu1 %v4556_v47  ;;  %2928 = vmatprep.subr.bf16.mxu0 %v4421_v56  ;;  %v4396_v47 = vcombine.low %v805_v29, %v809_v30  ;;  %v4524_v56 = vcombine.low %v933_v33, %v937_v38  ;;  %v4517_v59 = vcombine.high %v925_v45, %v929_v57  ;;  %v4939_v30 = vld [vmem:[#allocation5 + $0x78] sm:$0xff]  }
 0x1b3   : > { %3031 = vmatprep.subr.bf16.mxu1 %v4549_v23  ;;  %v4389_v23 = vcombine.high %v797_v55, %v801_v39  ;;  %v4952_v33 = vld [vmem:[#allocation5 + $0xf8] sm:$0xff]  }
 0x1b5   : > { %2929 = vmatpush2.bf16.msra.mxu0 %v4420_v52  ;;  %v921_v52 = vld [vmem:[#allocation2 + $0x678] sm:$0xff] }
 0x1b6   : > { %3032 = vmatpush2.bf16.msra.mxu1 %v4548_v53  ;;  %2930 = vmatprep.subr.bf16.mxu0 %v4413_v50  ;;  %v4388_v53 = vcombine.low %v797_v55, %v801_v39  ;;  %v4516_v50 = vcombine.low %v925_v45, %v929_v57  ;;  %v4509_v32 = vcombine.high %v917_v58, %v921_v52  ;;  %v4956_v45 = vld [vmem:[#allocation5 + $0xf0] sm:$0xff]  }
 0x1b7   : > { %2787 = vmatmul.mubr.bf16.gmra.mxu0 %v5630_v17  ;;  %3033 = vmatprep.subr.bf16.mxu1 %v4541_v51  ;;  %v4381_v51 = vcombine.high %v789_v61, %v793_v1 }
 0x1b8   : > { %2890 = vmatmul.mubr.bf16.gmra.mxu1 %v5632_v19  ;;  %2796 = vmatprep.mubr.bf16.mxu0 %v5656_v49 }
 0x1b9   : > { %2899 = vmatprep.mubr.bf16.mxu1 %v5658_v34  ;;  %2931 = vmatpush2.bf16.msra.mxu0 %v4412_v9  ;;  %v913_v9 = vld [vmem:[#allocation2 + $0x638] sm:$0xff] }
 0x1ba   : > { %3034 = vmatpush2.bf16.msra.mxu1 %v4540_v8  ;;  %2932 = vmatprep.subr.bf16.mxu0 %v4405_v12  ;;  %v4380_v8 = vcombine.low %v789_v61, %v793_v1  ;;  %v4373_v12 = vcombine.high %v781_v36, %v785_v18  ;;  %v4500_v29 = vcombine.low %v909_v60, %v913_v9 }
 0x1bb   : > { %3035 = vmatprep.subr.bf16.mxu1 %v4533_v22  ;;  %v4501_v22 = vcombine.high %v909_v60, %v913_v9  ;;  %v4962_v60 = vld [vmem:[#allocation5 + $0xa0] sm:$0xff]  }
 0x1bd   : > { %2933 = vmatpush2.bf16.msra.mxu0 %v4404_v46 }
 0x1be   : > { %3036 = vmatpush2.bf16.msra.mxu1 %v4532_v26  ;;  %2934 = vmatprep.subr.bf16.mxu0 %v4397_v27  ;;  %v4940_v26 = vld [vmem:[#allocation5 + $0x38] sm:$0xff]   ;;  %v4941_v27 = vld [vmem:[#allocation5 + $0x70] sm:$0xff]  }
 0x1bf   : > { %2797 = vmatmul.mubr.bf16.gmra.mxu0 %v5652_v14  ;;  %3037 = vmatprep.subr.bf16.mxu1 %v4525_v54  ;;  %v4954_v54 = vld [vmem:[#allocation5 + $0xb8] sm:$0xff]  }
 0x1c0   : > { %2900 = vmatmul.mubr.bf16.gmra.mxu1 %v5654_v48  ;;  %2942 = vmatprep.mubr.bf16.mxu0 %v5396_v20  ;;  %v4508_v20 = vcombine.low %v917_v58, %v921_v52  ;;  %v4945_v58 = vld [vmem:[#allocation5 + $0x60] sm:$0xff]   ;;  %v4960_v52 = vld [vmem:[#allocation5 + $0xa8] sm:$0xff]  }
 0x1c1   : > { %2935 = vmatpush2.bf16.msra.mxu0 %v4396_v47  ;;  %3045 = vmatprep.mubr.bf16.mxu1 %v5398_v21  ;;  %v4372_v21 = vcombine.low %v781_v36, %v785_v18  ;;  %v4946_v36 = vld [vmem:[#allocation5 + $0x20] sm:$0xff]  }
 0x1c2   : > { %3038 = vmatpush2.bf16.msra.mxu1 %v4524_v56  ;;  %2936 = vmatprep.subr.bf16.mxu0 %v4389_v23  ;;  %v4942_v56 = vld [vmem:[#allocation5 + $0x30] sm:$0xff]   ;;  %v4943_v23 = vld [vmem:[#allocation5 + $0x68] sm:$0xff]  }
 0x1c3   : > { %3039 = vmatprep.subr.bf16.mxu1 %v4517_v59 }
 0x1c5   : > { %2937 = vmatpush2.bf16.msra.mxu0 %v4388_v53 }
 0x1c6   : > { %3040 = vmatpush2.bf16.msra.mxu1 %v4516_v50  ;;  %2938 = vmatprep.subr.bf16.mxu0 %v4381_v51  ;;  %v4961_v50 = vld [vmem:[#allocation5 + $0xe0] sm:$0xff]  }
 0x1c7   : > { %3041 = vmatprep.subr.bf16.mxu1 %v4509_v32 }
 0x1c9   : > { %2939 = vmatpush2.bf16.msra.mxu0 %v4380_v8 }
 0x1ca   : > { %3042 = vmatpush2.bf16.msra.mxu1 %v4508_v20  ;;  %2940 = vmatprep.subr.bf16.mxu0 %v4373_v12  ;;  %v4949_v12 = vld [vmem:[#allocation5 + $0x50] sm:$0xff]  }
 0x1cb   : > { %3043 = vmatprep.subr.bf16.mxu1 %v4501_v22  ;;  %v4964_v22 = vld [vmem:[#allocation5 + $0x98] sm:$0xff]  }
 0x1cd   : > { %2941 = vmatpush2.bf16.msra.mxu0 %v4372_v21 }
 0x1ce   : > { %3044 = vmatpush2.bf16.msra.mxu1 %v4500_v29  ;;  %v5722_v38 = vpop.f32.mrf.mxu0  ;;  %v5724_v46 = vpop.f32.mrf.mxu1  ;;  %4627 = vmatprep.subr.bf16.mxu0 %v4939_v30  ;;  %v4965_v29 = vld [vmem:[#allocation5 + $0xd0] sm:$0xff]  }
 0x1cf   : > { %4685 = vmatprep.subr.bf16.mxu1 %v4952_v33 }
 0x1d0   : > { %2943 = vmatmul.mubr.bf16.vlgmr.msra.gmra.mxu0 %v5402_v24  ;;  %v5727_v55 = vpop.f32.mrf.mxu0  ;;  %v5729_v39 = vpop.f32.mrf.mxu1  ;;  %v4958_v24 = vld [vmem:[#allocation5 + $0xb0] sm:$0xff]  }
 0x1d1   : > { %3046 = vmatmul.mubr.bf16.vlgmr.msra.gmra.mxu1 %v5404_v25  ;;  %2952 = vmatprep.mubr.bf16.mxu0 %v5451_v10  ;;  %v4959_v25 = vld [vmem:[#allocation5 + $0xe8] sm:$0xff]  }
 0x1d2   : > { %3055 = vmatprep.mubr.bf16.mxu1 %v5453_v11  ;;  %v5734_v57 = vpop.f32.mrf.mxu0  ;;  %v5736_v47 = vpop.f32.mrf.mxu1  ;;  %4628 = vmatpush3.bf16.msra.mxu0 %v4940_v26  ;;  %v4944_v10 = vld [vmem:[#allocation5 + $0x28] sm:$0xff]   ;;  %v4950_v26 = vld [vmem:[#allocation5 + $0x10] sm:$0xff]  }
 0x1d3   : > { %4629 = vmatprep.subr.bf16.mxu0 %v4941_v27  ;;  %4686 = vmatpush3.bf16.msra.mxu1 %v4954_v54  ;;  %v4966_v54 = vld [vmem:[#allocation5 + $0x90] sm:$0xff]  }
 0x1d4   : > { %v5738_v59 = vpop.f32.mrf.mxu0  ;;  %v5740_v61 = vpop.f32.mrf.mxu1  ;;  %4687 = vmatprep.subr.bf16.mxu1 %v4956_v45 }
 0x1d6   : > { %v5742_v1 = vpop.f32.mrf.mxu0  ;;  %4630 = vmatpush3.bf16.msra.mxu0 %v4942_v56 }
 0x1d7   : > { %v5744_v11 = vpop.f32.mrf.mxu1  ;;  %4631 = vmatprep.subr.bf16.mxu0 %v4943_v23  ;;  %4688 = vmatpush3.bf16.msra.mxu1 %v4958_v24  ;;  %v4955_v24 = vld [vmem:[#allocation5 + $0x40] sm:$0xff]  }
 0x1d8   : > { %2953 = vmatmul.mubr.bf16.gmra.mxu0 %v5443_v35  ;;  %v5747_v53 = vpop.f32.mrf.mxu0  ;;  %4689 = vmatprep.subr.bf16.mxu1 %v4959_v25  ;;  %v4947_v35 = vld [vmem:[#allocation5 + $0x58] sm:$0xff]   ;;  %v4968_v25 = vld [vmem:[#allocation5 + $0x88] sm:$0xff]  }
 0x1d9   : > { %3056 = vmatmul.mubr.bf16.gmra.mxu1 %v5445_v37  ;;  %2962 = vmatprep.mubr.bf16.mxu0 %v5498_v6  ;;  %v5751_v51 = vpop.f32.mrf.mxu1  ;;  %v4963_v37 = vld [vmem:[#allocation5 + $0xd8] sm:$0xff]  }
 0x1da   : > { %3065 = vmatprep.mubr.bf16.mxu1 %v5500_v0  ;;  %v5754_v32 = vpop.f32.mrf.mxu0  ;;  %4632 = vmatpush3.bf16.msra.mxu0 %v4944_v10  ;;  %v4948_v0 = vld [vmem:[#allocation5 + $0x18] sm:$0xff]  }
 0x1db   : > { %v5756_v18 = vpop.f32.mrf.mxu1  ;;  %4633 = vmatprep.subr.bf16.mxu0 %v4945_v58  ;;  %4690 = vmatpush3.bf16.msra.mxu1 %v4960_v52  ;;  %v4969_v58 = vld [vmem:[#allocation5 + $0xc0] sm:$0xff]  }
 0x1dc   : > { %v5758_v9 = vpop.f32.mrf.mxu0  ;;  %4691 = vmatprep.subr.bf16.mxu1 %v4961_v50 }
 0x1dd   : > { %v5760_v8 = vpop.f32.mrf.mxu1 }
 0x1de   : > { %v5762_v6 = vpop.f32.mrf.mxu0  ;;  %4634 = vmatpush3.bf16.msra.mxu0 %v4946_v36  ;;  %v4957_v36 = vld [vmem:[#allocation5] sm:$0xff]  }
 0x1df   : > { %v5764_v20 = vpop.f32.mrf.mxu1  ;;  %4635 = vmatprep.subr.bf16.mxu0 %v4947_v35  ;;  %4692 = vmatpush3.bf16.msra.mxu1 %v4962_v60  ;;  %v4971_v60 = vld [vmem:[#allocation5 + $0x178] sm:$0xff]  }
 0x1e0   : > { %2963 = vmatmul.mubr.bf16.gmra.mxu0 %v5490_v2  ;;  %v5767_v21 = vpop.f32.mrf.mxu0  ;;  %4693 = vmatprep.subr.bf16.mxu1 %v4963_v37  ;;  %v4951_v2 = vld [vmem:[#allocation5 + $0x48] sm:$0xff]  }
 0x1e1   : > { %3066 = vmatmul.mubr.bf16.gmra.mxu1 %v5492_v3  ;;  %2972 = vmatprep.mubr.bf16.mxu0 %v5546_v5  ;;  %v5771_v30 = vpop.f32.mrf.mxu1  ;;  %v4967_v3 = vld [vmem:[#allocation5 + $0xc8] sm:$0xff]  }
 0x1e2   : > { %3075 = vmatprep.mubr.bf16.mxu1 %v5548_v7  ;;  %v5774_v33 = vpop.f32.mrf.mxu0  ;;  %4636 = vmatpush3.bf16.msra.mxu0 %v4948_v0  ;;  %v4953_v7 = vld [vmem:[#allocation5 + $0x8] sm:$0xff]  }
 0x1e3   : > { %v5776_v27 = vpop.f32.mrf.mxu1  ;;  %4637 = vmatprep.subr.bf16.mxu0 %v4949_v12  ;;  %4694 = vmatpush3.bf16.msra.mxu1 %v4964_v22  ;;  %v5809_v12 = vld [vmem:[%s6355_s4] sm:$0xff] }
 0x1e4   : > { %v5778_v45 = vpop.f32.mrf.mxu0  ;;  %4695 = vmatprep.subr.bf16.mxu1 %v4965_v29  ;;  %v5817_v29 = vrot.slane %v5809_v12, %v348_v41 }
 0x1e5   : > { %v5780_v56 = vpop.f32.mrf.mxu1 }
 0x1e6   : > { %v5782_v5 = vpop.f32.mrf.mxu0  ;;  %4638 = vmatpush3.bf16.msra.mxu0 %v4950_v26  ;;  %v2329_v41 = vadd.f32 %v5727_v55, %v5817_v29 }
 0x1e7   : > { %v5784_v23 = vpop.f32.mrf.mxu1  ;;  %4639 = vmatprep.subr.bf16.mxu0 %v4951_v2  ;;  %4696 = vmatpush3.bf16.msra.mxu1 %v4966_v54 }
 0x1e8   : > { %2973 = vmatmul.mubr.bf16.gmra.mxu0 %v5538_v62  ;;  %v5787_v10 = vpop.f32.mrf.mxu0  ;;  %4697 = vmatprep.subr.bf16.mxu1 %v4967_v3  ;;  %v4970_v62 = vld [vmem:[#allocation5 + $0x80] sm:$0xff]  }
 0x1e9   : > { %3076 = vmatmul.mubr.bf16.gmra.mxu1 %v5540_v63  ;;  %2982 = vmatprep.mubr.bf16.mxu0 %v5594_v13  ;;  %v5791_v52 = vpop.f32.mrf.mxu1  ;;  %v4987_v63 = vld [vmem:[#allocation5 + $0x1f8] sm:$0xff]  }
 0x1ea   : > { %3085 = vmatprep.mubr.bf16.mxu1 %v5596_v15  ;;  %v5794_v50 = vpop.f32.mrf.mxu0  ;;  %4640 = vmatpush3.bf16.msra.mxu0 %v4953_v7 }
 0x1eb   : > { %v5796_v35 = vpop.f32.mrf.mxu1  ;;  %4641 = vmatprep.subr.bf16.mxu0 %v4955_v24  ;;  %4698 = vmatpush3.bf16.msra.mxu1 %v4968_v25  ;;  %v2432_v25 = vadd.f32 %v5729_v39, %v2329_v41 }
 0x1ec   : > { %v5798_v37 = vpop.f32.mrf.mxu0  ;;  %4699 = vmatprep.subr.bf16.mxu1 %v4969_v58 }
 0x1ed   : > { %v5800_v0 = vpop.f32.mrf.mxu1 }
 0x1ee   : > { %v5802_v13 = vpop.f32.mrf.mxu0  ;;  %4642 = vmatpush3.bf16.msra.mxu0 %v4957_v36 }
 0x1ef   : > { %v5804_v15 = vpop.f32.mrf.mxu1  ;;  %4700 = vmatpush3.bf16.msra.mxu1 %v4970_v62  ;;  %4743 = vmatprep.subr.bf16.mxu0 %v4971_v60  ;;  %v2339_v62 = vadd.f32 %v5747_v53, %v5817_v29 }
 0x1f0   : > { %2983 = vmatmul.mubr.bf16.gmra.mxu0 %v5586_v4  ;;  %v5812_v22 = vpop.f32.mrf.mxu0  ;;  %4801 = vmatprep.subr.bf16.mxu1 %v4987_v63  ;;  %v2333_v4 = vadd.f32 %v5738_v59, %v5817_v29 }
 0x1f1   : > { %3086 = vmatmul.mubr.bf16.gmra.mxu1 %v5588_v31  ;;  %2992 = vmatprep.mubr.bf16.mxu0 %v5636_v28  ;;  %v5821_v26 = vpop.f32.mrf.mxu1 }
 0x1f2   : > { %3095 = vmatprep.mubr.bf16.mxu1 %v5638_v16  ;;  %v5824_v2 = vpop.f32.mrf.mxu0  ;;  %v2436_v28 = vadd.f32 %v5740_v61, %v2333_v4  ;;  %v5844_v16 = vrot.slane %v5809_v12, %v344_v43 }
 0x1f3   : > { %v5828_v54 = vpop.f32.mrf.mxu1 }
 0x1f4   : > { %v5830_v3 = vpop.f32.mrf.mxu0  ;;  %v2331_v61 = vadd.f32 %v5734_v57, %v5844_v16  ;;  %v3125_v43 = vmax.f32 %v2436_v28, 0.0 }
 0x1f5   : > { %v5834_v7 = vpop.f32.mrf.mxu1 }
 0x1f6   : > { %v5836_v31 = vpop.f32.mrf.mxu0 }
 0x1f7   : > { %v5839_v24 = vpop.f32.mrf.mxu1 }
 0x1f8   : > { %2993 = vmatmul.mubr.bf16.gmra.mxu0 %v5630_v17  ;;  %v5847_v59 = vpop.f32.mrf.mxu0  ;;  %v2343_v17 = vadd.f32 %v5758_v9, %v5817_v29 }
 0x1f9   : > { %3096 = vmatmul.mubr.bf16.gmra.mxu1 %v5632_v19  ;;  %3002 = vmatprep.mubr.bf16.mxu0 %v5656_v49  ;;  %v5852_v55 = vpop.f32.mrf.mxu1  ;;  %v2327_v19 = vadd.f32 %v5722_v38, %v5844_v16  ;;  %v3117_v49 = vmax.f32 %v2432_v25, 0.0  ;;  %v2442_v38 = vadd.f32 %v5751_v51, %v2339_v62 }
 0x1fa   : > { %3105 = vmatprep.mubr.bf16.mxu1 %v5658_v34  ;;  %v5857_v58 = vpop.f32.mrf.mxu0  ;;  %v2434_v34 = vadd.f32 %v5736_v47, %v2331_v61  ;;  %v2446_v60 = vadd.f32 %v5760_v8, %v2343_v17  ;;  %v2341_v47 = vadd.f32 %v5754_v32, %v5844_v16  ;;  %v2353_v8 = vadd.f32 %v5778_v45, %v5817_v29 }
 0x1fb   : > { %v5861_v36 = vpop.f32.mrf.mxu1  ;;  %v3229_v63 = vpack.c.bf16 %v3125_v43, %v3117_v49  ;;  %v2430_v9 = vadd.f32 %v5724_v46, %v2327_v19  ;;  %v3133_v51 = vmax.f32 %v2442_v38, 0.0  ;;  %v4972_v43 = vld [vmem:[#allocation5 + $0x138] sm:$0xff]   ;;  %v4973_v19 = vld [vmem:[#allocation5 + $0x170] sm:$0xff]  }
 0x1fc   : > { %v5865_v39 = vpop.f32.mrf.mxu0  ;;  %v3124_v53 = vmax.f32 %v2434_v34, 0.0  ;;  %v3141_v28 = vmax.f32 %v2446_v60, 0.0  ;;  %v2444_v32 = vadd.f32 %v5756_v18, %v2341_v47  ;;  %v2456_v49 = vadd.f32 %v5780_v56, %v2353_v8 }
 0x1fd   : > { %v5869_v57 = vpop.f32.mrf.mxu1  ;;  %v3116_v46 = vmax.f32 %v2430_v9, 0.0  ;;  %v2351_v18 = vadd.f32 %v5774_v33, %v5844_v16  ;;  %v4975_v9 = vld [vmem:[#allocation5 + $0x168] sm:$0xff]   ;;  %v5916_v33 = vrot.slane %v5809_v12, %v356_v42 }
 0x1fe   : > { %v5875_v4 = vpop.f32.mrf.mxu0  ;;  %v3237_v45 = vpack.c.bf16 %v3141_v28, %v3133_v51  ;;  %v3157_v56 = vmax.f32 %v2456_v49, 0.0  ;;  %v4977_v51 = vld [vmem:[#allocation5 + $0x160] sm:$0xff]  }
 0x1ff   : > { %v5879_v41 = vpop.f32.mrf.mxu1  ;;  %v3228_v17 = vpack.c.bf16 %v3124_v53, %v3116_v46  ;;  %v2347_v53 = vadd.f32 %v5762_v6, %v5844_v16  ;;  %v4976_v46 = vld [vmem:[#allocation5 + $0x128] sm:$0xff]   ;;  %v5922_v6 = vrot.slane %v5809_v12, %v352_v44  ;;  %v4978_v44 = vld [vmem:[#allocation5 + $0x120] sm:$0xff]  }
 0x200   : > { %3003 = vmatmul.mubr.bf16.gmra.mxu0 %v5652_v14  ;;  %v2337_v14 = vadd.f32 %v5742_v1, %v5844_v16  ;;  %v5887_v25 = vpop.f32.mrf.mxu0 }
 0x201   : > { %3106 = vmatmul.mubr.bf16.gmra.mxu1 %v5654_v48  ;;  %3835 = vmatprep.mubr.bf16.mxu0 %v3229_v63  ;;  %v2349_v48 = vadd.f32 %v5767_v21, %v5817_v29  ;;  %v5891_v61 = vpop.f32.mrf.mxu1  ;;  %v4974_v21 = vld [vmem:[#allocation5 + $0x130] sm:$0xff]   ;;  %v3140_v63 = vmax.f32 %v2444_v32, 0.0  ;;  %v2450_v42 = vadd.f32 %v5764_v20, %v2347_v53 }
 0x202   : > { %v2440_v62 = vadd.f32 %v5744_v11, %v2337_v14  ;;  %v5896_v34 = vpop.f32.mrf.mxu0  ;;  %v2363_v11 = vadd.f32 %v5798_v37, %v5817_v29  ;;  %v2454_v14 = vadd.f32 %v5776_v27, %v2351_v18 }
 0x203   : > { %v2452_v1 = vadd.f32 %v5771_v30, %v2349_v48  ;;  %v5899_v60 = vpop.f32.mrf.mxu1  ;;  %v2359_v30 = vadd.f32 %v5787_v10, %v5817_v29 }
 0x204   : > { %v3132_v38 = vmax.f32 %v2440_v62, 0.0  ;;  %v5909_v47 = vpop.f32.mrf.mxu0  ;;  %v2466_v48 = vadd.f32 %v5800_v0, %v2363_v11  ;;  %v2361_v62 = vadd.f32 %v5794_v50, %v5844_v16  ;;  %v2369_v50 = vadd.f32 %v5812_v22, %v5817_v29 }
 0x205   : > { %v3149_v28 = vmax.f32 %v2452_v1, 0.0  ;;  %v5911_v8 = vpop.f32.mrf.mxu1  ;;  %v2462_v32 = vadd.f32 %v5791_v52, %v2359_v30  ;;  %v2373_v52 = vadd.f32 %v5830_v3, %v5817_v29 }
 0x206   : > { %v3236_v37 = vpack.c.bf16 %v3140_v63, %v3132_v38  ;;  %v3173_v20 = vmax.f32 %v2466_v48, 0.0  ;;  %v4981_v48 = vld [vmem:[#allocation5 + $0x150] sm:$0xff]  }
 0x207   : > { %v3165_v11 = vmax.f32 %v2462_v32, 0.0 }
 0x208   : > { %3836 = vmatmul.mubr.bf16.vlgmr.msra.gmra.mxu0 %v3228_v17  ;;  %v3245_v17 = vpack.c.bf16 %v3157_v56, %v3149_v28  ;;  %v2357_v56 = vadd.f32 %v5782_v5, %v5844_v16  ;;  %v2476_v5 = vadd.f32 %v5834_v7, %v2373_v52  ;;  %v2371_v7 = vadd.f32 %v5824_v2, %v5844_v16 }
 0x209   : > { %3843 = vmatprep.mubr.bf16.mxu0 %v3237_v45  ;;  %4744 = vmatpush3.bf16.msra.mxu0 %v4972_v43  ;;  %v3156_v45 = vmax.f32 %v2454_v14, 0.0  ;;  %v2464_v14 = vadd.f32 %v5796_v35, %v2361_v62  ;;  %v3253_v32 = vpack.c.bf16 %v3173_v20, %v3165_v11  ;;  %v4982_v62 = vld [vmem:[#allocation5 + $0x110] sm:$0xff]   ;;  %v4983_v20 = vld [vmem:[#allocation5 + $0x148] sm:$0xff]   ;;  %v2379_v2 = vadd.f32 %v5847_v59, %v5817_v29  ;;  %v4985_v59 = vld [vmem:[#allocation5 + $0x140] sm:$0xff]  }
 0x20a   : > { %4745 = vmatprep.subr.bf16.mxu0 %v4973_v19  ;;  %v2460_v22 = vadd.f32 %v5784_v23, %v2357_v56  ;;  %v3189_v52 = vmax.f32 %v2476_v5, 0.0  ;;  %v4988_v56 = vld [vmem:[#allocation5 + $0x1b8] sm:$0xff]  }
 0x20c   : > { %v3164_v11 = vmax.f32 %v2460_v22, 0.0 }
 0x20d   : > { %4746 = vmatpush3.bf16.msra.mxu0 %v4974_v21  ;;  %v4979_v21 = vld [vmem:[#allocation5 + $0x158] sm:$0xff]  }
 0x20e   : > { %v2532_v10 = vpop.f32.mrf.mxu0  ;;  %4747 = vmatprep.subr.bf16.mxu0 %v4975_v9  ;;  %v3148_v9 = vmax.f32 %v2450_v42, 0.0 }
 0x20f   : > { %v2635_v43 = vpop.f32.mrf.mxu1  ;;  %v2533_v0 = vadd.f32 %v2532_v10, %v5922_v6 }
 0x210   : > { %3844 = vmatmul.mubr.bf16.gmra.mxu0 %v3236_v37  ;;  %v2534_v19 = vpop.f32.mrf.mxu0  ;;  %v4980_v37 = vld [vmem:[#allocation5 + $0x118] sm:$0xff]   ;;  %v3244_v3 = vpack.c.bf16 %v3156_v45, %v3148_v9 }
 0x211   : > { %3851 = vmatprep.mubr.bf16.mxu0 %v3245_v17  ;;  %v2535_v27 = vadd.f32 %v2534_v19, %v5916_v33  ;;  %v2637_v49 = vpop.f32.mrf.mxu1  ;;  %4748 = vmatpush3.bf16.msra.mxu0 %v4976_v46  ;;  %v2636_v10 = vadd.f32 %v2635_v43, %v2533_v0  ;;  %v3172_v0 = vmax.f32 %v2464_v14, 0.0  ;;  %v4984_v14 = vld [vmem:[#allocation5 + $0x108] sm:$0xff]  }
 0x212   : > { %v2536_v1 = vpop.f32.mrf.mxu0  ;;  %4749 = vmatprep.subr.bf16.mxu0 %v4977_v51 }
 0x213   : > { %v2537_v63 = vadd.f32 %v2536_v1, %v5922_v6  ;;  %v2639_v18 = vpop.f32.mrf.mxu1  ;;  %v2638_v53 = vadd.f32 %v2637_v49, %v2535_v27  ;;  %v2472_v49 = vadd.f32 %v5821_v26, %v2369_v50  ;;  %v3118_v1 = vmax.f32 %v2636_v10, 0.0 }
 0x214   : > { %v2538_v38 = vpop.f32.mrf.mxu0  ;;  %v2383_v26 = vadd.f32 %v5865_v39, %v5817_v29  ;;  %v3252_v10 = vpack.c.bf16 %v3172_v0, %v3164_v11 }
 0x215   : > { %v2640_v30 = vadd.f32 %v2639_v18, %v2537_v63  ;;  %v2539_v28 = vadd.f32 %v2538_v38, %v5916_v33  ;;  %v2641_v46 = vpop.f32.mrf.mxu1  ;;  %4750 = vmatpush3.bf16.msra.mxu0 %v4978_v44  ;;  %v3119_v44 = vmax.f32 %v2638_v53, 0.0  ;;  %v2367_v38 = vadd.f32 %v5802_v13, %v5844_v16 }
 0x216   : > { %v2542_v51 = vpop.f32.mrf.mxu0  ;;  %4751 = vmatprep.subr.bf16.mxu0 %v4979_v21  ;;  %v2486_v5 = vadd.f32 %v5869_v57, %v2383_v26 }
 0x217   : > { %v2642_v17 = vadd.f32 %v2641_v46, %v2539_v28  ;;  %v2645_v42 = vpop.f32.mrf.mxu1  ;;  %v3126_v19 = vmax.f32 %v2640_v30, 0.0  ;;  %v2543_v23 = vadd.f32 %v2542_v51, %v5922_v6  ;;  %v4989_v30 = vld [vmem:[#allocation5 + $0x1f0] sm:$0xff]   ;;  %v3181_v28 = vmax.f32 %v2472_v49, 0.0 }
 0x218   : > { %3852 = vmatmul.mubr.bf16.gmra.mxu0 %v3244_v3  ;;  %v2544_v27 = vpop.f32.mrf.mxu0  ;;  %v2474_v51 = vadd.f32 %v5828_v54, %v2371_v7  ;;  %v2482_v54 = vadd.f32 %v5852_v55, %v2379_v2  ;;  %v2381_v7 = vadd.f32 %v5857_v58, %v5844_v16  ;;  %v2393_v55 = vadd.f32 %v5909_v47, %v5817_v29 }
 0x219   : > { %v3127_v45 = vmax.f32 %v2642_v17, 0.0  ;;  %3859 = vmatprep.mubr.bf16.mxu0 %v3253_v32  ;;  %v2545_v35 = vadd.f32 %v2544_v27, %v5916_v33  ;;  %v2647_v43 = vpop.f32.mrf.mxu1  ;;  %4752 = vmatpush3.bf16.msra.mxu0 %v4980_v37  ;;  %v3230_v50 = vpack.c.bf16 %v3126_v19, %v3118_v1  ;;  %v3261_v22 = vpack.c.bf16 %v3189_v52, %v3181_v28  ;;  %v4990_v19 = vld [vmem:[#allocation5 + $0x1b0] sm:$0xff]  }
 0x21a   : > { %v2546_v21 = vpop.f32.mrf.mxu0  ;;  %4753 = vmatprep.subr.bf16.mxu0 %v4981_v48  ;;  %v2646_v48 = vadd.f32 %v2645_v42, %v2543_v23  ;;  %v2470_v27 = vadd.f32 %v5804_v15, %v2367_v38  ;;  %v3188_v0 = vmax.f32 %v2474_v51, 0.0  ;;  %v2389_v58 = vadd.f32 %v5887_v25, %v5817_v29  ;;  %v4993_v38 = vld [vmem:[#allocation5 + $0x1e0] sm:$0xff]  }
 0x21b   : > { %v2547_v63 = vadd.f32 %v2546_v21, %v5922_v6  ;;  %v2649_v18 = vpop.f32.mrf.mxu1  ;;  %v3231_v9 = vpack.c.bf16 %v3127_v45, %v3119_v44  ;;  %v2648_v46 = vadd.f32 %v2647_v43, %v2545_v35  ;;  %v4991_v45 = vld [vmem:[#allocation5 + $0x1e8] sm:$0xff]   ;;  %v3205_v21 = vmax.f32 %v2486_v5, 0.0 }
 0x21c   : > { %v2548_v53 = vpop.f32.mrf.mxu0  ;;  %v3134_v15 = vmax.f32 %v2646_v48, 0.0  ;;  %v3197_v2 = vmax.f32 %v2482_v54, 0.0  ;;  %v2496_v29 = vadd.f32 %v5911_v8, %v2393_v55 }
 0x21d   : > { %v2650_v37 = vadd.f32 %v2649_v18, %v2547_v63  ;;  %v2549_v39 = vadd.f32 %v2548_v53, %v5916_v33  ;;  %v2651_v3 = vpop.f32.mrf.mxu1  ;;  %3924 = vmatprep.mubr.bf16.mxu1 %v3231_v9  ;;  %4754 = vmatpush3.bf16.msra.mxu0 %v4982_v62  ;;  %v3135_v42 = vmax.f32 %v2648_v46, 0.0  ;;  %v4986_v62 = vld [vmem:[#allocation5 + $0x100] sm:$0xff]   ;;  %v4992_v63 = vld [vmem:[#allocation5 + $0x1a8] sm:$0xff]   ;;  %v3180_v18 = vmax.f32 %v2470_v27, 0.0 }
 0x21e   : > { %v2552_v13 = vpop.f32.mrf.mxu0  ;;  %3925 = vmatmul.mubr.bf16.vlgmr.msra.gmra.mxu1 %v3230_v50  ;;  %4755 = vmatprep.subr.bf16.mxu0 %v4983_v20  ;;  %v2377_v9 = vadd.f32 %v5836_v31, %v5844_v16  ;;  %v2484_v46 = vadd.f32 %v5861_v36, %v2381_v7 }
 0x21f   : > { %v2652_v17 = vadd.f32 %v2651_v3, %v2549_v39  ;;  %v2655_v32 = vpop.f32.mrf.mxu1  ;;  %4802 = vmatpush3.bf16.msra.mxu1 %v4988_v56  ;;  %v3142_v49 = vmax.f32 %v2650_v37, 0.0  ;;  %v2553_v1 = vadd.f32 %v2552_v13, %v5922_v6  ;;  %v3260_v28 = vpack.c.bf16 %v3188_v0, %v3180_v18  ;;  %v4995_v13 = vld [vmem:[#allocation5 + $0x1d8] sm:$0xff]  }
 0x220   : > { %3860 = vmatmul.mubr.bf16.gmra.mxu0 %v3252_v10  ;;  %v2554_v44 = vpop.f32.mrf.mxu0  ;;  %4803 = vmatprep.subr.bf16.mxu1 %v4989_v30  ;;  %v3269_v3 = vpack.c.bf16 %v3205_v21, %v3197_v2  ;;  %v2480_v10 = vadd.f32 %v5839_v24, %v2377_v9 }
 0x221   : > { %v3143_v35 = vmax.f32 %v2652_v17, 0.0  ;;  %3867 = vmatprep.mubr.bf16.mxu0 %v3261_v22  ;;  %v2555_v43 = vadd.f32 %v2554_v44, %v5916_v33  ;;  %v2657_v57 = vpop.f32.mrf.mxu1  ;;  %4756 = vmatpush3.bf16.msra.mxu0 %v4984_v14  ;;  %v3238_v56 = vpack.c.bf16 %v3142_v49, %v3134_v15  ;;  %v2656_v37 = vadd.f32 %v2655_v32, %v2553_v1  ;;  %v4994_v14 = vld [vmem:[#allocation5 + $0x1a0] sm:$0xff]  }
 0x222   : > { %v2556_v23 = vpop.f32.mrf.mxu0  ;;  %4757 = vmatprep.subr.bf16.mxu0 %v4985_v59  ;;  %v2492_v59 = vadd.f32 %v5891_v61, %v2389_v58  ;;  %v3204_v32 = vmax.f32 %v2484_v46, 0.0  ;;  %v2391_v22 = vadd.f32 %v5896_v34, %v5844_v16  ;;  %v3221_v49 = vmax.f32 %v2496_v29, 0.0  ;;  %v4996_v61 = vld [vmem:[#allocation5 + $0x198] sm:$0xff]   ;;  %v4999_v58 = vld [vmem:[#allocation5 + $0x1c8] sm:$0xff]  }
 0x223   : > { %v2557_v20 = vadd.f32 %v2556_v23, %v5922_v6  ;;  %v2659_v52 = vpop.f32.mrf.mxu1  ;;  %v3239_v26 = vpack.c.bf16 %v3143_v35, %v3135_v42  ;;  %4804 = vmatpush3.bf16.msra.mxu1 %v4990_v19  ;;  %v2658_v50 = vadd.f32 %v2657_v57, %v2555_v43  ;;  %v3150_v19 = vmax.f32 %v2656_v37, 0.0  ;;  %v5000_v46 = vld [vmem:[#allocation5 + $0x188] sm:$0xff]  }
 0x224   : > { %v2558_v11 = vpop.f32.mrf.mxu0  ;;  %4805 = vmatprep.subr.bf16.mxu1 %v4991_v45  ;;  %v3196_v42 = vmax.f32 %v2480_v10, 0.0  ;;  %v2387_v35 = vadd.f32 %v5875_v4, %v5844_v16  ;;  %v3213_v34 = vmax.f32 %v2492_v59, 0.0  ;;  %v2494_v21 = vadd.f32 %v5899_v60, %v2391_v22  ;;  %v4998_v4 = vld [vmem:[#allocation5 + $0x190] sm:$0xff]  }
 0x225   : > { %v2660_v47 = vadd.f32 %v2659_v52, %v2557_v20  ;;  %v2559_v53 = vadd.f32 %v2558_v11, %v5916_v33  ;;  %v2661_v30 = vpop.f32.mrf.mxu1  ;;  %3932 = vmatprep.mubr.bf16.mxu1 %v3239_v26  ;;  %4758 = vmatpush3.bf16.msra.mxu0 %v4986_v62  ;;  %v3151_v36 = vmax.f32 %v2658_v50, 0.0  ;;  %v4997_v62 = vld [vmem:[#allocation5 + $0x1d0] sm:$0xff]  }
 0x226   : > { %v2562_v31 = vpop.f32.mrf.mxu0  ;;  %3933 = vmatmul.mubr.bf16.gmra.mxu1 %v3238_v56  ;;  %v3268_v23 = vpack.c.bf16 %v3204_v32, %v3196_v42  ;;  %v3277_v16 = vpack.c.bf16 %v3221_v49, %v3213_v34  ;;  %v3220_v2 = vmax.f32 %v2494_v21, 0.0 }
 0x227   : > { %v2662_v25 = vadd.f32 %v2661_v30, %v2559_v53  ;;  %v2665_v39 = vpop.f32.mrf.mxu1  ;;  %4806 = vmatpush3.bf16.msra.mxu1 %v4992_v63  ;;  %v3158_v51 = vmax.f32 %v2660_v47, 0.0  ;;  %v2563_v24 = vadd.f32 %v2562_v31, %v5922_v6  ;;  %v2490_v63 = vadd.f32 %v5879_v41, %v2387_v35 }
 0x228   : > { %3868 = vmatmul.mubr.bf16.gmra.mxu0 %v3260_v28  ;;  %v2564_v48 = vpop.f32.mrf.mxu0  ;;  %4807 = vmatprep.subr.bf16.mxu1 %v4993_v38 }
 0x229   : > { %v3159_v5 = vmax.f32 %v2662_v25, 0.0  ;;  %3875 = vmatprep.mubr.bf16.mxu0 %v3269_v3  ;;  %v2565_v17 = vadd.f32 %v2564_v48, %v5916_v33  ;;  %v2667_v8 = vpop.f32.mrf.mxu1  ;;  %v3246_v43 = vpack.c.bf16 %v3158_v51, %v3150_v19  ;;  %v2666_v55 = vadd.f32 %v2665_v39, %v2563_v24  ;;  %v5001_v25 = vld [vmem:[#allocation5 + $0x1c0] sm:$0xff]  }
 0x22a   : > { %v2566_v27 = vpop.f32.mrf.mxu0  ;;  %v3212_v37 = vmax.f32 %v2490_v63, 0.0 }
 0x22b   : > { %v2567_v44 = vadd.f32 %v2566_v27, %v5922_v6  ;;  %v2669_v45 = vpop.f32.mrf.mxu1  ;;  %v3247_v54 = vpack.c.bf16 %v3159_v5, %v3151_v36  ;;  %4808 = vmatpush3.bf16.msra.mxu1 %v4994_v14  ;;  %v2668_v0 = vadd.f32 %v2667_v8, %v2565_v17  ;;  %v3166_v50 = vmax.f32 %v2666_v55, 0.0  ;;  %v5002_v5 = vld [vmem:[#allocation5 + $0x180] sm:$0xff]  }
 0x22c   : > { %v2568_v57 = vpop.f32.mrf.mxu0  ;;  %4809 = vmatprep.subr.bf16.mxu1 %v4995_v13  ;;  %v3276_v51 = vpack.c.bf16 %v3220_v2, %v3212_v37  ;;  %v994_v37 = vsub.s32 5, %v5353_v40 }
 0x22d   : > { %v2670_v7 = vadd.f32 %v2669_v45, %v2567_v44  ;;  %v2569_v15 = vadd.f32 %v2568_v57, %v5916_v33  ;;  %v2671_v1 = vpop.f32.mrf.mxu1  ;;  %3940 = vmatprep.mubr.bf16.mxu1 %v3247_v54  ;;  %v3167_v56 = vmax.f32 %v2668_v0, 0.0 }
 0x22e   : > { %v2572_v20 = vpop.f32.mrf.mxu0  ;;  %3941 = vmatmul.mubr.bf16.gmra.mxu1 %v3246_v43 }
 0x22f   : > { %v2672_v52 = vadd.f32 %v2671_v1, %v2569_v15  ;;  %v2675_v26 = vpop.f32.mrf.mxu1  ;;  %4810 = vmatpush3.bf16.msra.mxu1 %v4996_v61  ;;  %v3174_v18 = vmax.f32 %v2670_v7, 0.0  ;;  %v2573_v47 = vadd.f32 %v2572_v20, %v5922_v6 }
 0x230   : > { %3876 = vmatmul.mubr.bf16.gmra.mxu0 %v3268_v23  ;;  %v2574_v9 = vpop.f32.mrf.mxu0  ;;  %4811 = vmatprep.subr.bf16.mxu1 %v4997_v62 }
 0x231   : > { %v3175_v11 = vmax.f32 %v2672_v52, 0.0  ;;  %3883 = vmatprep.mubr.bf16.mxu0 %v3277_v16  ;;  %v2575_v60 = vadd.f32 %v2574_v9, %v5916_v33  ;;  %v2677_v38 = vpop.f32.mrf.mxu1  ;;  %v3254_v31 = vpack.c.bf16 %v3174_v18, %v3166_v50  ;;  %v2676_v48 = vadd.f32 %v2675_v26, %v2573_v47 }
 0x232   : > { %v2576_v53 = vpop.f32.mrf.mxu0 }
 0x233   : > { %v2577_v30 = vadd.f32 %v2576_v53, %v5922_v6  ;;  %v2679_v28 = vpop.f32.mrf.mxu1  ;;  %v3255_v41 = vpack.c.bf16 %v3175_v11, %v3167_v56  ;;  %4812 = vmatpush3.bf16.msra.mxu1 %v4998_v4  ;;  %v2678_v39 = vadd.f32 %v2677_v38, %v2575_v60  ;;  %v3182_v27 = vmax.f32 %v2676_v48, 0.0 }
 0x234   : > { %v2578_v29 = vpop.f32.mrf.mxu0  ;;  %4813 = vmatprep.subr.bf16.mxu1 %v4999_v58 }
 0x235   : > { %v2680_v3 = vadd.f32 %v2679_v28, %v2577_v30  ;;  %v2579_v14 = vadd.f32 %v2578_v29, %v5916_v33  ;;  %v2681_v10 = vpop.f32.mrf.mxu1  ;;  %3948 = vmatprep.mubr.bf16.mxu1 %v3255_v41  ;;  %v3183_v32 = vmax.f32 %v2678_v39, 0.0 }
 0x236   : > { %v2582_v13 = vpop.f32.mrf.mxu0  ;;  %3949 = vmatmul.mubr.bf16.gmra.mxu1 %v3254_v31  ;;  %v990_v31 = vsub.s32 4, %v5353_v40 }
 0x237   : > { %v2682_v59 = vadd.f32 %v2681_v10, %v2579_v14  ;;  %v2685_v36 = vpop.f32.mrf.mxu1  ;;  %4814 = vmatpush3.bf16.msra.mxu1 %v5000_v46  ;;  %v3190_v17 = vmax.f32 %v2680_v3, 0.0  ;;  %v2583_v49 = vadd.f32 %v2582_v13, %v5922_v6 }
 0x238   : > { %3884 = vmatmul.mubr.bf16.gmra.mxu0 %v3276_v51  ;;  %v2584_v8 = vpop.f32.mrf.mxu0  ;;  %4815 = vmatprep.subr.bf16.mxu1 %v5001_v25  ;;  %v6000_v25 = vrot.slane %v5809_v12, %v994_v37 }
 0x239   : > { %v3191_v22 = vmax.f32 %v2682_v59, 0.0  ;;  %v2585_v19 = vadd.f32 %v2584_v8, %v5916_v33  ;;  %v2687_v24 = vpop.f32.mrf.mxu1  ;;  %v3262_v42 = vpack.c.bf16 %v3190_v17, %v3182_v27  ;;  %v2686_v0 = vadd.f32 %v2685_v36, %v2583_v49 }
 0x23a   : > { %v2586_v44 = vpop.f32.mrf.mxu0 }
 0x23b   : > { %v2587_v45 = vadd.f32 %v2586_v44, %v5922_v6  ;;  %v2689_v54 = vpop.f32.mrf.mxu1  ;;  %v3263_v61 = vpack.c.bf16 %v3191_v22, %v3183_v32  ;;  %4816 = vmatpush3.bf16.msra.mxu1 %v5002_v5  ;;  %v2688_v43 = vadd.f32 %v2687_v24, %v2585_v19  ;;  %v3198_v16 = vmax.f32 %v2686_v0, 0.0 }
 0x23c   : > { %v2588_v35 = vpop.f32.mrf.mxu0 }
 0x23d   : > { %v2690_v57 = vadd.f32 %v2689_v54, %v2587_v45  ;;  %v2589_v62 = vadd.f32 %v2588_v35, %v5916_v33  ;;  %v2691_v34 = vpop.f32.mrf.mxu1  ;;  %3956 = vmatprep.mubr.bf16.mxu1 %v3263_v61  ;;  %v3199_v55 = vmax.f32 %v2688_v43, 0.0 }
 0x23e   : > { %v2592_v7 = vpop.f32.mrf.mxu0  ;;  %3957 = vmatmul.mubr.bf16.gmra.mxu1 %v3262_v42 }
 0x23f   : > { %v2692_v15 = vadd.f32 %v2691_v34, %v2589_v62  ;;  %v2695_v1 = vpop.f32.mrf.mxu1  ;;  %v3206_v23 = vmax.f32 %v2690_v57, 0.0  ;;  %v2593_v4 = vadd.f32 %v2592_v7, %v5922_v6 }
 0x240   : > { %v2594_v21 = vpop.f32.mrf.mxu0 }
 0x241   : > { %v3207_v20 = vmax.f32 %v2692_v15, 0.0  ;;  %v2595_v52 = vadd.f32 %v2594_v21, %v5916_v33  ;;  %v2697_v26 = vpop.f32.mrf.mxu1  ;;  %v3270_v56 = vpack.c.bf16 %v3206_v23, %v3198_v16  ;;  %v2696_v50 = vadd.f32 %v2695_v1, %v2593_v4 }
 0x242   : > { %v2596_v63 = vpop.f32.mrf.mxu0 }
 0x243   : > { %v2597_v18 = vadd.f32 %v2596_v63, %v5922_v6  ;;  %v2699_v9 = vpop.f32.mrf.mxu1  ;;  %v3271_v58 = vpack.c.bf16 %v3207_v20, %v3199_v55  ;;  %v2698_v60 = vadd.f32 %v2697_v26, %v2595_v52  ;;  %v3214_v46 = vmax.f32 %v2696_v50, 0.0 }
 0x244   : > { %v2598_v11 = vpop.f32.mrf.mxu0 }
 0x245   : > { %v2700_v38 = vadd.f32 %v2699_v9, %v2597_v18  ;;  %v2599_v2 = vadd.f32 %v2598_v11, %v5916_v33  ;;  %3964 = vmatprep.mubr.bf16.mxu1 %v3271_v58  ;;  %v2701_v47 = vpop.f32.mrf.mxu1  ;;  %v3215_v28 = vmax.f32 %v2698_v60, 0.0  ;;  %v6003_v33 = vrot.slane %v5809_v12, %v990_v31 }
 0x246   : > { %3965 = vmatmul.mubr.bf16.gmra.mxu1 %v3270_v56 }
 0x247   : > { %v2702_v53 = vadd.f32 %v2701_v47, %v2599_v2  ;;  %v3222_v30 = vmax.f32 %v2700_v38, 0.0 }
 0x249   : > { %v3223_v41 = vmax.f32 %v2702_v53, 0.0  ;;  %v3278_v29 = vpack.c.bf16 %v3222_v30, %v3214_v46 }
 0x24b   : > { %v3279_v6 = vpack.c.bf16 %v3223_v41, %v3215_v28 }
 0x24d   : > { %3972 = vmatprep.mubr.bf16.mxu1 %v3279_v6 }
 0x24e   : > { %3973 = vmatmul.mubr.bf16.gmra.mxu1 %v3278_v29 }
 0x24f   : > { %v2738_v39 = vpop.f32.mrf.mxu0 }
 0x250   : > { %v2841_v3 = vpop.f32.mrf.mxu1  ;;  %v2739_v48 = vadd.f32 %v2738_v39, %v6003_v33 }
 0x251   : > { %v2740_v14 = vpop.f32.mrf.mxu0 }
 0x252   : > { %v2741_v10 = vadd.f32 %v2740_v14, %v6000_v25  ;;  %v2843_v51 = vpop.f32.mrf.mxu1  ;;  %v2842_v12 = vadd.f32 %v2841_v3, %v2739_v48 }
 0x253   : > { %v2742_v13 = vpop.f32.mrf.mxu0 }
 0x254   : > { %v2743_v59 = vadd.f32 %v2742_v13, %v6003_v33  ;;  %v2845_v36 = vpop.f32.mrf.mxu1  ;;  %v2844_v17 = vadd.f32 %v2843_v51, %v2741_v10  ;;  %v3120_v35 = vmax.f32 %v2842_v12, 0.0 }
 0x255   : > { %v2744_v5 = vpop.f32.mrf.mxu0 }
 0x256   : > { %v2846_v8 = vadd.f32 %v2845_v36, %v2743_v59  ;;  %v2745_v32 = vadd.f32 %v2744_v5, %v6000_v25  ;;  %v2847_v22 = vpop.f32.mrf.mxu1  ;;  %v3121_v45 = vmax.f32 %v2844_v17, 0.0 }
 0x257   : > { %v2748_v19 = vpop.f32.mrf.mxu0 }
 0x258   : > { %v2848_v24 = vadd.f32 %v2847_v22, %v2745_v32  ;;  %v2851_v27 = vpop.f32.mrf.mxu1  ;;  %v3128_v49 = vmax.f32 %v2846_v8, 0.0  ;;  %v2749_v43 = vadd.f32 %v2748_v19, %v6003_v33 }
 0x259   : > { %v2750_v44 = vpop.f32.mrf.mxu0 }
 0x25a   : > { %v3129_v54 = vmax.f32 %v2848_v24, 0.0  ;;  %v2751_v61 = vadd.f32 %v2750_v44, %v6000_v25  ;;  %v2853_v42 = vpop.f32.mrf.mxu1  ;;  %v3232_v7 = vpack.c.bf16 %v3128_v49, %v3120_v35  ;;  %v2852_v20 = vadd.f32 %v2851_v27, %v2749_v43 }
 0x25b   : > { %v2752_v57 = vpop.f32.mrf.mxu0 }
 0x25c   : > { %v3233_v62 = vpack.c.bf16 %v3129_v54, %v3121_v45  ;;  %v2753_v34 = vadd.f32 %v2752_v57, %v6003_v33  ;;  %v2855_v0 = vpop.f32.mrf.mxu1  ;;  %v2854_v1 = vadd.f32 %v2853_v42, %v2751_v61  ;;  %v3136_v11 = vmax.f32 %v2852_v20, 0.0 }
 0x25d   : > { %v2754_v15 = vpop.f32.mrf.mxu0 }
 0x25e   : > { %v2856_v23 = vadd.f32 %v2855_v0, %v2753_v34  ;;  %v2755_v21 = vadd.f32 %v2754_v15, %v6000_v25  ;;  %v2857_v55 = vpop.f32.mrf.mxu1  ;;  %4013 = vmatprep.mubr.bf16.mxu0 %v3233_v62  ;;  %v3137_v18 = vmax.f32 %v2854_v1, 0.0 }
 0x25f   : > { %v2758_v52 = vpop.f32.mrf.mxu0  ;;  %4014 = vmatmul.mubr.bf16.vlgmr.msra.gmra.mxu0 %v3232_v7 }
 0x260   : > { %v2858_v26 = vadd.f32 %v2857_v55, %v2755_v21  ;;  %v2861_v16 = vpop.f32.mrf.mxu1  ;;  %v3144_v4 = vmax.f32 %v2856_v23, 0.0  ;;  %v2759_v60 = vadd.f32 %v2758_v52, %v6003_v33 }
 0x261   : > { %v2760_v63 = vpop.f32.mrf.mxu0 }
 0x262   : > { %v3145_v9 = vmax.f32 %v2858_v26, 0.0  ;;  %v2761_v58 = vadd.f32 %v2760_v63, %v6000_v25  ;;  %v2863_v56 = vpop.f32.mrf.mxu1  ;;  %v3240_v53 = vpack.c.bf16 %v3144_v4, %v3136_v11  ;;  %v2862_v6 = vadd.f32 %v2861_v16, %v2759_v60 }
 0x263   : > { %v2762_v38 = vpop.f32.mrf.mxu0 }
 0x264   : > { %v3241_v2 = vpack.c.bf16 %v3145_v9, %v3137_v18  ;;  %v2763_v50 = vadd.f32 %v2762_v38, %v6003_v33  ;;  %v2865_v47 = vpop.f32.mrf.mxu1  ;;  %v2864_v28 = vadd.f32 %v2863_v56, %v2761_v58  ;;  %v3152_v59 = vmax.f32 %v2862_v6, 0.0 }
 0x265   : > { %v2764_v30 = vpop.f32.mrf.mxu0 }
 0x266   : > { %v2866_v41 = vadd.f32 %v2865_v47, %v2763_v50  ;;  %v2765_v46 = vadd.f32 %v2764_v30, %v6000_v25  ;;  %v2867_v37 = vpop.f32.mrf.mxu1  ;;  %4021 = vmatprep.mubr.bf16.mxu0 %v3241_v2  ;;  %v3153_v10 = vmax.f32 %v2864_v28, 0.0 }
 0x267   : > { %v2768_v31 = vpop.f32.mrf.mxu0  ;;  %4022 = vmatmul.mubr.bf16.gmra.mxu0 %v3240_v53 }
 0x268   : > { %v2868_v29 = vadd.f32 %v2867_v37, %v2765_v46  ;;  %v2871_v39 = vpop.f32.mrf.mxu1  ;;  %v3160_v3 = vmax.f32 %v2866_v41, 0.0  ;;  %v2769_v36 = vadd.f32 %v2768_v31, %v6003_v33 }
 0x269   : > { %v2770_v14 = vpop.f32.mrf.mxu0 }
 0x26a   : > { %v3161_v51 = vmax.f32 %v2868_v29, 0.0  ;;  %v2771_v48 = vadd.f32 %v2770_v14, %v6000_v25  ;;  %v2873_v13 = vpop.f32.mrf.mxu1  ;;  %v3248_v22 = vpack.c.bf16 %v3160_v3, %v3152_v59  ;;  %v2872_v44 = vadd.f32 %v2871_v39, %v2769_v36 }
 0x26b   : > { %v2772_v5 = vpop.f32.mrf.mxu0 }
 0x26c   : > { %v3249_v17 = vpack.c.bf16 %v3161_v51, %v3153_v10  ;;  %v2773_v8 = vadd.f32 %v2772_v5, %v6003_v33  ;;  %v2875_v32 = vpop.f32.mrf.mxu1  ;;  %v2874_v19 = vadd.f32 %v2873_v13, %v2771_v48  ;;  %v3168_v0 = vmax.f32 %v2872_v44, 0.0 }
 0x26d   : > { %v2774_v12 = vpop.f32.mrf.mxu0 }
 0x26e   : > { %v2876_v24 = vadd.f32 %v2875_v32, %v2773_v8  ;;  %v2775_v27 = vadd.f32 %v2774_v12, %v6000_v25  ;;  %v2877_v49 = vpop.f32.mrf.mxu1  ;;  %4029 = vmatprep.mubr.bf16.mxu0 %v3249_v17  ;;  %v3169_v43 = vmax.f32 %v2874_v19, 0.0 }
 0x26f   : > { %v2778_v45 = vpop.f32.mrf.mxu0  ;;  %4030 = vmatmul.mubr.bf16.gmra.mxu0 %v3248_v22 }
 0x270   : > { %v2878_v54 = vadd.f32 %v2877_v49, %v2775_v27  ;;  %v2881_v61 = vpop.f32.mrf.mxu1  ;;  %v3176_v42 = vmax.f32 %v2876_v24, 0.0  ;;  %v2779_v7 = vadd.f32 %v2778_v45, %v6003_v33 }
 0x271   : > { %v2780_v35 = vpop.f32.mrf.mxu0 }
 0x272   : > { %v3177_v57 = vmax.f32 %v2878_v54, 0.0  ;;  %v2781_v62 = vadd.f32 %v2780_v35, %v6000_v25  ;;  %v2883_v34 = vpop.f32.mrf.mxu1  ;;  %v3256_v55 = vpack.c.bf16 %v3176_v42, %v3168_v0  ;;  %v2882_v63 = vadd.f32 %v2881_v61, %v2779_v7 }
 0x273   : > { %v2782_v15 = vpop.f32.mrf.mxu0  ;;  %v1002_v7 = vsub.s32 7, %v5353_v40 }
 0x274   : > { %v3257_v1 = vpack.c.bf16 %v3177_v57, %v3169_v43  ;;  %v2783_v23 = vadd.f32 %v2782_v15, %v6003_v33  ;;  %v2885_v21 = vpop.f32.mrf.mxu1  ;;  %v2884_v52 = vadd.f32 %v2883_v34, %v2781_v62  ;;  %v3184_v47 = vmax.f32 %v2882_v63, 0.0 }
 0x275   : > { %v2784_v20 = vpop.f32.mrf.mxu0 }
 0x276   : > { %v2886_v26 = vadd.f32 %v2885_v21, %v2783_v23  ;;  %v2785_v16 = vadd.f32 %v2784_v20, %v6000_v25  ;;  %v2887_v4 = vpop.f32.mrf.mxu1  ;;  %4037 = vmatprep.mubr.bf16.mxu0 %v3257_v1  ;;  %v3185_v60 = vmax.f32 %v2884_v52, 0.0 }
 0x277   : > { %v2788_v18 = vpop.f32.mrf.mxu0  ;;  %4038 = vmatmul.mubr.bf16.gmra.mxu0 %v3256_v55 }
 0x278   : > { %v2888_v9 = vadd.f32 %v2887_v4, %v2785_v16  ;;  %v2891_v58 = vpop.f32.mrf.mxu1  ;;  %v3192_v56 = vmax.f32 %v2886_v26, 0.0  ;;  %v2789_v53 = vadd.f32 %v2788_v18, %v6003_v33 }
 0x279   : > { %v2790_v11 = vpop.f32.mrf.mxu0 }
 0x27a   : > { %v3193_v38 = vmax.f32 %v2888_v9, 0.0  ;;  %v2791_v2 = vadd.f32 %v2790_v11, %v6000_v25  ;;  %v2893_v50 = vpop.f32.mrf.mxu1  ;;  %v3264_v37 = vpack.c.bf16 %v3192_v56, %v3184_v47  ;;  %v2892_v14 = vadd.f32 %v2891_v58, %v2789_v53 }
 0x27b   : > { %v2792_v30 = vpop.f32.mrf.mxu0 }
 0x27c   : > { %v3265_v28 = vpack.c.bf16 %v3193_v38, %v3185_v60  ;;  %v2793_v41 = vadd.f32 %v2792_v30, %v6003_v33  ;;  %v2895_v46 = vpop.f32.mrf.mxu1  ;;  %v2894_v31 = vadd.f32 %v2893_v50, %v2791_v2  ;;  %v3200_v32 = vmax.f32 %v2892_v14, 0.0 }
 0x27d   : > { %v2794_v6 = vpop.f32.mrf.mxu0 }
 0x27e   : > { %v2896_v29 = vadd.f32 %v2895_v46, %v2793_v41  ;;  %v2795_v39 = vadd.f32 %v2794_v6, %v6000_v25  ;;  %v2897_v3 = vpop.f32.mrf.mxu1  ;;  %4045 = vmatprep.mubr.bf16.mxu0 %v3265_v28  ;;  %v3201_v36 = vmax.f32 %v2894_v31, 0.0 }
 0x27f   : > { %v2798_v10 = vpop.f32.mrf.mxu0  ;;  %4046 = vmatmul.mubr.bf16.gmra.mxu0 %v3264_v37 }
 0x280   : > { %v2898_v51 = vadd.f32 %v2897_v3, %v2795_v39  ;;  %v2901_v48 = vpop.f32.mrf.mxu1  ;;  %v3208_v13 = vmax.f32 %v2896_v29, 0.0  ;;  %v2799_v22 = vadd.f32 %v2798_v10, %v6003_v33 }
 0x281   : > { %v2800_v59 = vpop.f32.mrf.mxu0 }
 0x282   : > { %v3209_v5 = vmax.f32 %v2898_v51, 0.0  ;;  %v2801_v17 = vadd.f32 %v2800_v59, %v6000_v25  ;;  %v2903_v8 = vpop.f32.mrf.mxu1  ;;  %v3272_v49 = vpack.c.bf16 %v3208_v13, %v3200_v32  ;;  %v2902_v42 = vadd.f32 %v2901_v48, %v2799_v22 }
 0x283   : > { %v2802_v12 = vpop.f32.mrf.mxu0 }
 0x284   : > { %v3273_v19 = vpack.c.bf16 %v3209_v5, %v3201_v36  ;;  %v2803_v24 = vadd.f32 %v2802_v12, %v6003_v33  ;;  %v2905_v27 = vpop.f32.mrf.mxu1  ;;  %v2904_v45 = vadd.f32 %v2903_v8, %v2801_v17  ;;  %v3216_v0 = vmax.f32 %v2902_v42, 0.0 }
 0x285   : > { %v2804_v44 = vpop.f32.mrf.mxu0  ;;  %v998_v33 = vsub.s32 6, %v5353_v40 }
 0x286   : > { %v2906_v54 = vadd.f32 %v2905_v27, %v2803_v24  ;;  %v2805_v61 = vadd.f32 %v2804_v44, %v6000_v25  ;;  %4053 = vmatprep.mubr.bf16.mxu0 %v3273_v19  ;;  %v2907_v35 = vpop.f32.mrf.mxu1  ;;  %v3217_v62 = vmax.f32 %v2904_v45, 0.0  ;;  %v5003_v25 = vld [vmem:[%s6355_s4] sm:$0xff] }
 0x287   : > { %4054 = vmatmul.mubr.bf16.gmra.mxu0 %v3272_v49  ;;  %v6038_v23 = vrot.slane %v5003_v25, %v1002_v7  ;;  %v6040_v21 = vrot.slane %v5003_v25, %v998_v33 }
 0x288   : > { %v2908_v43 = vadd.f32 %v2907_v35, %v2805_v61  ;;  %v3224_v57 = vmax.f32 %v2906_v54, 0.0 }
 0x28a   : > { %v3225_v34 = vmax.f32 %v2908_v43, 0.0  ;;  %v3280_v1 = vpack.c.bf16 %v3224_v57, %v3216_v0 }
 0x28c   : > { %v3281_v15 = vpack.c.bf16 %v3225_v34, %v3217_v62 }
 0x28e   : > { %4061 = vmatprep.mubr.bf16.mxu0 %v3281_v15 }
 0x28f   : > { %4062 = vmatmul.mubr.bf16.gmra.mxu0 %v3280_v1 }
 0x290   : > { %v2944_v55 = vpop.f32.mrf.mxu0 }
 0x291   : > { %v3047_v20 = vpop.f32.mrf.mxu1  ;;  %v2945_v4 = vadd.f32 %v2944_v55, %v6040_v21 }
 0x292   : > { %v2946_v52 = vpop.f32.mrf.mxu0 }
 0x293   : > { %v2947_v26 = vadd.f32 %v2946_v52, %v6038_v23  ;;  %v3049_v16 = vpop.f32.mrf.mxu1  ;;  %v3048_v38 = vadd.f32 %v3047_v20, %v2945_v4 }
 0x294   : > { %v2948_v40 = vpop.f32.mrf.mxu0 }
 0x295   : > { %v2949_v63 = vadd.f32 %v2948_v40, %v6040_v21  ;;  %v3051_v18 = vpop.f32.mrf.mxu1  ;;  %v3050_v58 = vadd.f32 %v3049_v16, %v2947_v26  ;;  %v3122_v6 = vmax.f32 %v3048_v38, 0.0 }
 0x296   : > { %v2950_v9 = vpop.f32.mrf.mxu0 }
 0x297   : > { %v3052_v56 = vadd.f32 %v3051_v18, %v2949_v63  ;;  %v2951_v11 = vadd.f32 %v2950_v9, %v6038_v23  ;;  %v3053_v60 = vpop.f32.mrf.mxu1  ;;  %v3123_v28 = vmax.f32 %v3050_v58, 0.0 }
 0x298   : > { %v2954_v2 = vpop.f32.mrf.mxu0 }
 0x299   : > { %v3054_v50 = vadd.f32 %v3053_v60, %v2951_v11  ;;  %v3057_v47 = vpop.f32.mrf.mxu1  ;;  %v3130_v53 = vmax.f32 %v3052_v56, 0.0  ;;  %v2955_v31 = vadd.f32 %v2954_v2, %v6040_v21 }
 0x29a   : > { %v2956_v30 = vpop.f32.mrf.mxu0 }
 0x29b   : > { %v3131_v41 = vmax.f32 %v3054_v50, 0.0  ;;  %v2957_v46 = vadd.f32 %v2956_v30, %v6038_v23  ;;  %v3059_v37 = vpop.f32.mrf.mxu1  ;;  %v3234_v10 = vpack.c.bf16 %v3130_v53, %v3122_v6  ;;  %v3058_v5 = vadd.f32 %v3057_v47, %v2955_v31 }
 0x29c   : > { %v2958_v29 = vpop.f32.mrf.mxu0 }
 0x29d   : > { %v3235_v39 = vpack.c.bf16 %v3131_v41, %v3123_v28  ;;  %v2959_v3 = vadd.f32 %v2958_v29, %v6040_v21  ;;  %v3061_v14 = vpop.f32.mrf.mxu1  ;;  %v3060_v48 = vadd.f32 %v3059_v37, %v2957_v46  ;;  %v3138_v44 = vmax.f32 %v3058_v5, 0.0 }
 0x29e   : > { %v2960_v51 = vpop.f32.mrf.mxu0 }
 0x29f   : > { %v3062_v13 = vadd.f32 %v3061_v14, %v2959_v3  ;;  %v2961_v59 = vadd.f32 %v2960_v51, %v6038_v23  ;;  %v3063_v36 = vpop.f32.mrf.mxu1  ;;  %4102 = vmatprep.mubr.bf16.mxu1 %v3235_v39  ;;  %v3139_v19 = vmax.f32 %v3060_v48, 0.0 }
 0x2a0   : > { %v2964_v17 = vpop.f32.mrf.mxu0  ;;  %4103 = vmatmul.mubr.bf16.vlgmr.msra.gmra.mxu1 %v3234_v10 }
 0x2a1   : > { %v3064_v8 = vadd.f32 %v3063_v36, %v2961_v59  ;;  %v3067_v32 = vpop.f32.mrf.mxu1  ;;  %v3146_v22 = vmax.f32 %v3062_v13, 0.0  ;;  %v2965_v45 = vadd.f32 %v2964_v17, %v6040_v21 }
 0x2a2   : > { %v2966_v12 = vpop.f32.mrf.mxu0 }
 0x2a3   : > { %v3147_v24 = vmax.f32 %v3064_v8, 0.0  ;;  %v2967_v27 = vadd.f32 %v2966_v12, %v6038_v23  ;;  %v3069_v49 = vpop.f32.mrf.mxu1  ;;  %v3242_v43 = vpack.c.bf16 %v3146_v22, %v3138_v44  ;;  %v3068_v15 = vadd.f32 %v3067_v32, %v2965_v45 }
 0x2a4   : > { %v2968_v54 = vpop.f32.mrf.mxu0 }
 0x2a5   : > { %v3243_v61 = vpack.c.bf16 %v3147_v24, %v3139_v19  ;;  %v2969_v42 = vadd.f32 %v2968_v54, %v6040_v21  ;;  %v3071_v35 = vpop.f32.mrf.mxu1  ;;  %v3070_v62 = vadd.f32 %v3069_v49, %v2967_v27  ;;  %v3154_v40 = vmax.f32 %v3068_v15, 0.0 }
 0x2a6   : > { %v2970_v57 = vpop.f32.mrf.mxu0 }
 0x2a7   : > { %v3072_v34 = vadd.f32 %v3071_v35, %v2969_v42  ;;  %v2971_v0 = vadd.f32 %v2970_v57, %v6038_v23  ;;  %v3073_v7 = vpop.f32.mrf.mxu1  ;;  %4110 = vmatprep.mubr.bf16.mxu1 %v3243_v61  ;;  %v3155_v52 = vmax.f32 %v3070_v62, 0.0 }
 0x2a8   : > { %v2974_v33 = vpop.f32.mrf.mxu0  ;;  %4111 = vmatmul.mubr.bf16.gmra.mxu1 %v3242_v43 }
 0x2a9   : > { %v3074_v1 = vadd.f32 %v3073_v7, %v2971_v0  ;;  %v3077_v25 = vpop.f32.mrf.mxu1  ;;  %v3162_v55 = vmax.f32 %v3072_v34, 0.0  ;;  %v2975_v63 = vadd.f32 %v2974_v33, %v6040_v21 }
 0x2aa   : > { %v2976_v20 = vpop.f32.mrf.mxu0 }
 0x2ab   : > { %v3163_v26 = vmax.f32 %v3074_v1, 0.0  ;;  %v2977_v16 = vadd.f32 %v2976_v20, %v6038_v23  ;;  %v3079_v4 = vpop.f32.mrf.mxu1  ;;  %v3250_v11 = vpack.c.bf16 %v3162_v55, %v3154_v40  ;;  %v3078_v53 = vadd.f32 %v3077_v25, %v2975_v63 }
 0x2ac   : > { %v2978_v18 = vpop.f32.mrf.mxu0 }
 0x2ad   : > { %v3251_v9 = vpack.c.bf16 %v3163_v26, %v3155_v52  ;;  %v2979_v58 = vadd.f32 %v2978_v18, %v6040_v21  ;;  %v3081_v56 = vpop.f32.mrf.mxu1  ;;  %v3080_v38 = vadd.f32 %v3079_v4, %v2977_v16  ;;  %v3170_v3 = vmax.f32 %v3078_v53, 0.0 }
 0x2ae   : > { %v2980_v60 = vpop.f32.mrf.mxu0 }
 0x2af   : > { %v3082_v2 = vadd.f32 %v3081_v56, %v2979_v58  ;;  %v2981_v50 = vadd.f32 %v2980_v60, %v6038_v23  ;;  %v3083_v47 = vpop.f32.mrf.mxu1  ;;  %4118 = vmatprep.mubr.bf16.mxu1 %v3251_v9  ;;  %v3171_v6 = vmax.f32 %v3080_v38, 0.0 }
 0x2b0   : > { %v2984_v30 = vpop.f32.mrf.mxu0  ;;  %4119 = vmatmul.mubr.bf16.gmra.mxu1 %v3250_v11 }
 0x2b1   : > { %v3084_v28 = vadd.f32 %v3083_v47, %v2981_v50  ;;  %v3087_v41 = vpop.f32.mrf.mxu1  ;;  %v3178_v46 = vmax.f32 %v3082_v2, 0.0  ;;  %v2985_v14 = vadd.f32 %v2984_v30, %v6040_v21 }
 0x2b2   : > { %v2986_v37 = vpop.f32.mrf.mxu0 }
 0x2b3   : > { %v3179_v31 = vmax.f32 %v3084_v28, 0.0  ;;  %v2987_v29 = vadd.f32 %v2986_v37, %v6038_v23  ;;  %v3089_v39 = vpop.f32.mrf.mxu1  ;;  %v3258_v59 = vpack.c.bf16 %v3178_v46, %v3170_v3  ;;  %v3088_v22 = vadd.f32 %v3087_v41, %v2985_v14 }
 0x2b4   : > { %v2988_v10 = vpop.f32.mrf.mxu0 }
 0x2b5   : > { %v3259_v51 = vpack.c.bf16 %v3179_v31, %v3171_v6  ;;  %v2989_v48 = vadd.f32 %v2988_v10, %v6040_v21  ;;  %v3091_v13 = vpop.f32.mrf.mxu1  ;;  %v3090_v5 = vadd.f32 %v3089_v39, %v2987_v29  ;;  %v3186_v42 = vmax.f32 %v3088_v22, 0.0 }
 0x2b6   : > { %v2990_v36 = vpop.f32.mrf.mxu0 }
 0x2b7   : > { %v3092_v17 = vadd.f32 %v3091_v13, %v2989_v48  ;;  %v2991_v8 = vadd.f32 %v2990_v36, %v6038_v23  ;;  %v3093_v32 = vpop.f32.mrf.mxu1  ;;  %4126 = vmatprep.mubr.bf16.mxu1 %v3259_v51  ;;  %v3187_v44 = vmax.f32 %v3090_v5, 0.0 }
 0x2b8   : > { %v2994_v12 = vpop.f32.mrf.mxu0  ;;  %4127 = vmatmul.mubr.bf16.gmra.mxu1 %v3258_v59 }
 0x2b9   : > { %v3094_v19 = vadd.f32 %v3093_v32, %v2991_v8  ;;  %v3097_v24 = vpop.f32.mrf.mxu1  ;;  %v3194_v27 = vmax.f32 %v3092_v17, 0.0  ;;  %v2995_v35 = vadd.f32 %v2994_v12, %v6040_v21 }
 0x2ba   : > { %v2996_v49 = vpop.f32.mrf.mxu0 }
 0x2bb   : > { %v3195_v45 = vmax.f32 %v3094_v19, 0.0  ;;  %v2997_v54 = vadd.f32 %v2996_v49, %v6038_v23  ;;  %v3099_v61 = vpop.f32.mrf.mxu1  ;;  %v3266_v0 = vpack.c.bf16 %v3194_v27, %v3186_v42  ;;  %v3098_v55 = vadd.f32 %v3097_v24, %v2995_v35 }
 0x2bc   : > { %v2998_v43 = vpop.f32.mrf.mxu0 }
 0x2bd   : > { %v3267_v57 = vpack.c.bf16 %v3195_v45, %v3187_v44  ;;  %v2999_v62 = vadd.f32 %v2998_v43, %v6040_v21  ;;  %v3101_v34 = vpop.f32.mrf.mxu1  ;;  %v3100_v15 = vadd.f32 %v3099_v61, %v2997_v54  ;;  %v3202_v58 = vmax.f32 %v3098_v55, 0.0 }
 0x2be   : > { %v3000_v7 = vpop.f32.mrf.mxu0 }
 0x2bf   : > { %v3102_v33 = vadd.f32 %v3101_v34, %v2999_v62  ;;  %v3001_v1 = vadd.f32 %v3000_v7, %v6038_v23  ;;  %v3103_v25 = vpop.f32.mrf.mxu1  ;;  %4134 = vmatprep.mubr.bf16.mxu1 %v3267_v57  ;;  %v3203_v40 = vmax.f32 %v3100_v15, 0.0 }
 0x2c0   : > { %v3004_v20 = vpop.f32.mrf.mxu0  ;;  %4135 = vmatmul.mubr.bf16.gmra.mxu1 %v3266_v0 }
 0x2c1   : > { %v3104_v52 = vadd.f32 %v3103_v25, %v3001_v1  ;;  %v3107_v26 = vpop.f32.mrf.mxu1  ;;  %v3210_v16 = vmax.f32 %v3102_v33, 0.0  ;;  %v3005_v56 = vadd.f32 %v3004_v20, %v6040_v21 }
 0x2c2   : > { %v3006_v4 = vpop.f32.mrf.mxu0 }
 0x2c3   : > { %v3211_v63 = vmax.f32 %v3104_v52, 0.0  ;;  %v3007_v18 = vadd.f32 %v3006_v4, %v6038_v23  ;;  %v3109_v9 = vpop.f32.mrf.mxu1  ;;  %v3274_v50 = vpack.c.bf16 %v3210_v16, %v3202_v58  ;;  %v3108_v41 = vadd.f32 %v3107_v26, %v3005_v56 }
 0x2c4   : > { %v3008_v11 = vpop.f32.mrf.mxu0 }
 0x2c5   : > { %v3275_v60 = vpack.c.bf16 %v3211_v63, %v3203_v40  ;;  %v3009_v38 = vadd.f32 %v3008_v11, %v6040_v21  ;;  %v3111_v2 = vpop.f32.mrf.mxu1  ;;  %v3110_v53 = vadd.f32 %v3109_v9, %v3007_v18  ;;  %v3218_v21 = vmax.f32 %v3108_v41, 0.0 }
 0x2c6   : > { %v3010_v47 = vpop.f32.mrf.mxu0 }
 0x2c7   : > { %v3112_v30 = vadd.f32 %v3111_v2, %v3009_v38  ;;  %v3011_v28 = vadd.f32 %v3010_v47, %v6038_v23  ;;  %4142 = vmatprep.mubr.bf16.mxu1 %v3275_v60  ;;  %v3113_v46 = vpop.f32.mrf.mxu1  ;;  %v3219_v39 = vmax.f32 %v3110_v53, 0.0 }
 0x2c8   : > { %v6070_v37 = vpop.f32.mrf.mxu0  ;;  %4143 = vmatmul.mubr.bf16.gmra.mxu1 %v3274_v50 }
 0x2c9   : > { %v3114_v6 = vadd.f32 %v3113_v46, %v3011_v28  ;;  %v3226_v31 = vmax.f32 %v3112_v30, 0.0 }
 0x2ca   : > { %v6072_v29 = vpop.f32.mrf.mxu0 }
 0x2cb   : > { %v3227_v3 = vmax.f32 %v3114_v6, 0.0  ;;  %v3282_v51 = vpack.c.bf16 %v3226_v31, %v3218_v21 }
 0x2cc   : > { %v6074_v14 = vpop.f32.mrf.mxu0 }
 0x2cd   : > { %v3283_v10 = vpack.c.bf16 %v3227_v3, %v3219_v39 }
 0x2ce   : > { %v6076_v48 = vpop.f32.mrf.mxu0 }
 0x2cf   : > { %4150 = vmatprep.mubr.bf16.mxu1 %v3283_v10 }
 0x2d0   : > { %v6078_v23 = vpop.f32.mrf.mxu0  ;;  %4151 = vmatmul.mubr.bf16.gmra.mxu1 %v3282_v51 }
 0x2d2   : > { %v6080_v13 = vpop.f32.mrf.mxu0 }
 0x2d4   : > { %v6082_v59 = vpop.f32.mrf.mxu0 }
 0x2d6   : > { %v6084_v36 = vpop.f32.mrf.mxu0 }
 0x2d8   : > { %v6086_v5 = vpop.f32.mrf.mxu0 }
 0x2da   : > { %v6088_v17 = vpop.f32.mrf.mxu0 }
 0x2dc   : > { %v6090_v8 = vpop.f32.mrf.mxu0 }
 0x2de   : > { %v6092_v32 = vpop.f32.mrf.mxu0  ;;  %v4701_v24 = vpop.f32.mrf.mxu1 }
 0x2e0   : > { %v6094_v22 = vpop.f32.mrf.mxu0  ;;  %v4702_v49 = vpop.f32.mrf.mxu1 }
 0x2e2   : > { %v6096_v12 = vpop.f32.mrf.mxu0  ;;  %v6104_v45 = vpop.f32.mrf.mxu1 }
 0x2e4   : > { %v6098_v19 = vpop.f32.mrf.mxu0  ;;  %v4705_v61 = vpop.f32.mrf.mxu1 }
 0x2e6   : > { %v6100_v27 = vpop.f32.mrf.mxu0  ;;  %v6110_v35 = vpop.f32.mrf.mxu1 }
 0x2e8   : > { %v6102_v44 = vpop.f32.mrf.mxu0  ;;  %v6114_v57 = vpop.f32.mrf.mxu1 }
 0x2ea   : > { %v6106_v54 = vpop.f32.mrf.mxu0  ;;  %v6118_v34 = vpop.f32.mrf.mxu1 }
 0x2ec   : > { %v6108_v42 = vpop.f32.mrf.mxu0  ;;  %v6122_v7 = vpop.f32.mrf.mxu1 }
 0x2ee   : > { %v6112_v43 = vpop.f32.mrf.mxu0  ;;  %v6126_v33 = vpop.f32.mrf.mxu1 }
 0x2ef   : > { %6368 = vst [vmem:[#allocation11_spill] sm:$0xff] %v6112_v43 }
 0x2f0   : > { %v6116_v62 = vpop.f32.mrf.mxu0  ;;  %v6130_v25 = vpop.f32.mrf.mxu1 }
 0x2f1   : > { %6369 = vst [vmem:[#allocation12_spill] sm:$0xff] %v6116_v62  ;;  %v4706_v62 = vadd.f32 %v4705_v61, %v6104_v45 }
 0x2f2   : > { %v6120_v0 = vpop.f32.mrf.mxu0  ;;  %v6134_v20 = vpop.f32.mrf.mxu1 }
 0x2f3   : > { %6370 = vst [vmem:[#allocation13_spill] sm:$0xff] %v6120_v0 }
 0x2f4   : > { %v6124_v15 = vpop.f32.mrf.mxu0  ;;  %v6138_v26 = vpop.f32.mrf.mxu1 }
 0x2f5   : > { %6371 = vst [vmem:[#allocation14_spill] sm:$0xff] %v6124_v15 }
 0x2f6   : > { %v6128_v1 = vpop.f32.mrf.mxu0  ;;  %v6142_v4 = vpop.f32.mrf.mxu1 }
 0x2f7   : > { %6372 = vst [vmem:[#allocation15_spill] sm:$0xff] %v6128_v1 }
 0x2f8   : > { %v6132_v55 = vpop.f32.mrf.mxu0  ;;  %v6146_v18 = vpop.f32.mrf.mxu1 }
 0x2f9   : > { %6373 = vst [vmem:[#allocation16_spill] sm:$0xff] %v6132_v55 }
 0x2fa   : > { %v6136_v52 = vpop.f32.mrf.mxu0  ;;  %v6148_v58 = vpop.f32.mrf.mxu1 }
 0x2fb   : > { %6374 = vst [vmem:[#allocation17_spill] sm:$0xff] %v6136_v52 }
 0x2fc   : > { %v6140_v16 = vpop.f32.mrf.mxu0  ;;  %v6150_v11 = vpop.f32.mrf.mxu1 }
 0x2fd   : > { %6375 = vst [vmem:[#allocation18_spill] sm:$0xff] %v6140_v16 }
 0x2fe   : > { %v6144_v40 = vpop.f32.mrf.mxu0  ;;  %v6152_v38 = vpop.f32.mrf.mxu1 }
 0x2ff   : > { %6376 = vst [vmem:[#allocation19_spill] sm:$0xff] %v6144_v40 }
 0x300   : > { %v6154_v50 = vpop.f32.mrf.mxu1 }
 0x302   : > { %v6156_v53 = vpop.f32.mrf.mxu1 }
 0x303   : > { %6377 = vst [vmem:[#allocation20_spill] sm:$0xff] %v6156_v53 }
 0x304   : > { %v6158_v28 = vpop.f32.mrf.mxu1 }
 0x305   : > { %6378 = vst [vmem:[#allocation21_spill] sm:$0xff] %v6158_v28 }
 0x306   : > { %v6160_v46 = vpop.f32.mrf.mxu1 }
 0x307   : > { %6379 = vst [vmem:[#allocation22_spill] sm:$0xff] %v6160_v46  ;;  %v4648_v46 = vadd.f32 %v6076_v48, %v6074_v14 }
 0x308   : > { %v6164_v31 = vpop.f32.mrf.mxu1 }
 0x309   : > { %6380 = vst [vmem:[#allocation23_spill] sm:$0xff] %v6164_v31 }
 0x30a   : > { %v6168_v3 = vpop.f32.mrf.mxu1 }
 0x30b   : > { %6381 = vst [vmem:[#allocation24_spill] sm:$0xff] %v6168_v3  ;;  %v4645_v3 = vadd.f32 %v6072_v29, %v6070_v37 }
 0x30c   : > { %v6172_v10 = vpop.f32.mrf.mxu1 }
 0x30d   : > { %6382 = vst [vmem:[#allocation25_spill] sm:$0xff] %v6172_v10  ;;  %v6191_v10 = vld [vmem:[%s6357_s6] ss:$0 sm:$0xff] }
 0x30e   : > { %v6176_v40 = vpop.f32.mrf.mxu1 }
 0x30f   : > { %6383 = vst [vmem:[#allocation26_spill] sm:$0xff] %v6176_v40  ;;  %v4703_v40 = vadd.f32 %v4702_v49, %v4701_v24  ;;  %v4651_v24 = vadd.f32 %v6080_v13, %v6078_v23  ;;  %v4654_v23 = vadd.f32 %v6084_v36, %v6082_v59 }
 0x310   : > { %v6180_v52 = vpop.f32.mrf.mxu1 }
 0x311   : > { %6384 = vst [vmem:[#allocation27_spill] sm:$0xff] %v6180_v52  ;;  %v3838_v52 = vadd.f32 %v4645_v3, %v6191_v10  ;;  %v3849_v36 = vadd.f32 %v4654_v23, %v6191_v10 }
 0x312   : > { %v6184_v1 = vpop.f32.mrf.mxu1 }
 0x313   : > { %6385 = vst [vmem:[#allocation28_spill] sm:$0xff] %v6184_v1  ;;  %v3927_v29 = vadd.f32 %v4703_v40, %v3838_v52  ;;  %v3846_v52 = vadd.f32 %v4651_v24, %v6191_v10 }
 0x314   : > { %v6196_v31 = vpop.f32.mrf.mxu1 }
 0x315   : > { %6386 = vst [vmem:[#allocation29_spill] sm:$0xff] %v6196_v31  ;;  %v3841_v31 = vadd.f32 %v4648_v46, %v6191_v10 }
 0x317   : > { %v3930_v48 = vadd.f32 %v4706_v62, %v3841_v31 }
 0x31f   : > { %v4759_v63 = vpop.f32.mrf.mxu0 }
 0x321   : > { %v4760_v9 = vpop.f32.mrf.mxu0 }
 0x322   : > { %v4761_v1 = vadd.f32 %v4760_v9, %v4759_v63  ;;  %v4709_v63 = vadd.f32 %v6114_v57, %v6110_v35  ;;  %v4712_v35 = vadd.f32 %v6122_v7, %v6118_v34 }
 0x323   : > { %v4762_v56 = vpop.f32.mrf.mxu0 }
 0x324   : > { %v4016_v28 = vadd.f32 %v4761_v1, %v3927_v29  ;;  %v3938_v31 = vadd.f32 %v4712_v35, %v3849_v36 }
 0x325   : > { %v4763_v60 = vpop.f32.mrf.mxu0 }
 0x326   : > { %v4764_v3 = vadd.f32 %v4763_v60, %v4762_v56  ;;  %v3935_v56 = vadd.f32 %v4709_v63, %v3846_v52  ;;  %v4657_v60 = vadd.f32 %v6088_v17, %v6086_v5  ;;  %v4660_v5 = vadd.f32 %v6092_v32, %v6090_v8 }
 0x327   : > { %v4765_v2 = vpop.f32.mrf.mxu0 }
 0x328   : > { %v4019_v13 = vadd.f32 %v4764_v3, %v3930_v48  ;;  %v3854_v7 = vadd.f32 %v4657_v60, %v6191_v10  ;;  %v3857_v8 = vadd.f32 %v4660_v5, %v6191_v10 }
 0x329   : > { %v4766_v47 = vpop.f32.mrf.mxu0 }
 0x32a   : > { %v4767_v61 = vadd.f32 %v4766_v47, %v4765_v2 }
 0x32b   : > { %v4768_v30 = vpop.f32.mrf.mxu0 }
 0x32c   : > { %v4024_v2 = vadd.f32 %v4767_v61, %v3935_v56 }
 0x32d   : > { %v4769_v41 = vpop.f32.mrf.mxu0 }
 0x32e   : > { %v4770_v47 = vadd.f32 %v4769_v41, %v4768_v30 }
 0x32f   : > { %v6162_v6 = vpop.f32.mrf.mxu0 }
 0x330   : > { %v4027_v17 = vadd.f32 %v4770_v47, %v3938_v31  ;;  %v6388_v31 = vld [vmem:[#allocation20_spill] sm:$0xff] }
 0x331   : > { %v6166_v39 = vpop.f32.mrf.mxu0 }
 0x332   : > { %v4773_v30 = vadd.f32 %v6166_v39, %v6162_v6 }
 0x333   : > { %v6170_v21 = vpop.f32.mrf.mxu0 }
 0x335   : > { %v6174_v51 = vpop.f32.mrf.mxu0 }
 0x336   : > { %v4776_v6 = vadd.f32 %v6174_v51, %v6170_v21 }
 0x337   : > { %v6178_v16 = vpop.f32.mrf.mxu0 }
 0x339   : > { %v6182_v55 = vpop.f32.mrf.mxu0 }
 0x33a   : > { %v4779_v21 = vadd.f32 %v6182_v55, %v6178_v16 }
 0x33b   : > { %v6193_v15 = vpop.f32.mrf.mxu0 }
 0x33d   : > { %v6201_v0 = vpop.f32.mrf.mxu0 }
 0x33e   : > { %v4782_v55 = vadd.f32 %v6201_v0, %v6193_v15 }
 0x33f   : > { %v6209_v43 = vpop.f32.mrf.mxu0 }
 0x341   : > { %v6219_v40 = vpop.f32.mrf.mxu0 }
 0x342   : > { %v4785_v0 = vadd.f32 %v6219_v40, %v6209_v43 }
 0x360   : > { %v4817_v37 = vpop.f32.mrf.mxu1 }
 0x362   : > { %v4818_v49 = vpop.f32.mrf.mxu1 }
 0x363   : > { %v4819_v53 = vadd.f32 %v4818_v49, %v4817_v37  ;;  %v4715_v37 = vadd.f32 %v6130_v25, %v6126_v33  ;;  %v4718_v33 = vadd.f32 %v6138_v26, %v6134_v20  ;;  %v4721_v20 = vadd.f32 %v6146_v18, %v6142_v4 }
 0x364   : > { %v4820_v14 = vpop.f32.mrf.mxu1  ;;  %v4724_v4 = vadd.f32 %v6150_v11, %v6148_v58  ;;  %v4727_v58 = vadd.f32 %v6154_v50, %v6152_v38 }
 0x365   : > { %v4105_v9 = vadd.f32 %v4819_v53, %v4016_v28  ;;  %v6227_v28 = vpop.f32.mrf.mxu0  ;;  %v3943_v3 = vadd.f32 %v4715_v37, %v3854_v7  ;;  %v3946_v52 = vadd.f32 %v4718_v33, %v3857_v8  ;;  %v6389_v37 = vld [vmem:[#allocation21_spill] sm:$0xff]  ;;  %v6393_v33 = vld [vmem:[#allocation23_spill] sm:$0xff] }
 0x366   : > { %v4821_v45 = vpop.f32.mrf.mxu1  ;;  %v4730_v38 = vadd.f32 %v6389_v37, %v6388_v31  ;;  %v6391_v7 = vld [vmem:[#allocation13_spill] sm:$0xff] }
 0x367   : > { %4159 = vst [vmem:[%s6216_s19] sm:$0xff] %v4105_v9  ;;  %v4822_v1 = vadd.f32 %v4821_v45, %v4820_v14  ;;  %v4787_v24 = vpop.f32.mrf.mxu0  ;;  %v4663_v14 = vadd.f32 %v6096_v12, %v6094_v22  ;;  %v4032_v32 = vadd.f32 %v4773_v30, %v3943_v3  ;;  %v4666_v12 = vadd.f32 %v6100_v27, %v6098_v19  ;;  %v6392_v3 = vld [vmem:[#allocation22_spill] sm:$0xff] }
 0x368   : > { %v4823_v62 = vpop.f32.mrf.mxu1  ;;  %v4035_v23 = vadd.f32 %v4776_v6, %v3946_v52  ;;  %v4788_v30 = vadd.f32 %v4787_v24, %v6227_v28  ;;  %v6395_v6 = vld [vmem:[#allocation15_spill] sm:$0xff] }
 0x369   : > { %v4108_v57 = vadd.f32 %v4822_v1, %v4019_v13  ;;  %v4789_v63 = vpop.f32.mrf.mxu0  ;;  %v3862_v45 = vadd.f32 %v4663_v14, %v6191_v10  ;;  %v3865_v19 = vadd.f32 %v4666_v12, %v6191_v10 }
 0x36a   : > { %v4824_v59 = vpop.f32.mrf.mxu1 }
 0x36b   : > { %4160 = vst [vmem:[%s6216_s19 + $0x8] sm:$0xff] %v4108_v57  ;;  %v4825_v53 = vadd.f32 %v4824_v59, %v4823_v62  ;;  %v4790_v13 = vpop.f32.mrf.mxu0  ;;  %v3951_v1 = vadd.f32 %v4721_v20, %v3862_v45  ;;  %v4669_v62 = vadd.f32 %v6106_v54, %v6102_v44  ;;  %v3954_v60 = vadd.f32 %v4724_v4, %v3865_v19  ;;  %v6387_v54 = vld [vmem:[#allocation11_spill] sm:$0xff]  ;;  %v6396_v45 = vld [vmem:[#allocation24_spill] sm:$0xff] }
 0x36c   : > { %v4826_v46 = vpop.f32.mrf.mxu1  ;;  %v4672_v36 = vadd.f32 %v6387_v54, %v6108_v42  ;;  %v4791_v52 = vadd.f32 %v4790_v13, %v4789_v63 }
 0x36d   : > { %v4113_v34 = vadd.f32 %v4825_v53, %v4024_v2  ;;  %v4040_v27 = vadd.f32 %v4779_v21, %v3951_v1  ;;  %v4792_v35 = vpop.f32.mrf.mxu0  ;;  %v3870_v59 = vadd.f32 %v4669_v62, %v6191_v10  ;;  %v4043_v2 = vadd.f32 %v4782_v55, %v3954_v60  ;;  %v6398_v21 = vld [vmem:[#allocation16_spill] sm:$0xff]  ;;  %v6401_v55 = vld [vmem:[#allocation27_spill] sm:$0xff] }
 0x36e   : > { %v4827_v29 = vpop.f32.mrf.mxu1  ;;  %v3873_v42 = vadd.f32 %v4672_v36, %v6191_v10 }
 0x36f   : > { %4161 = vst [vmem:[%s6216_s19 + $0x10] sm:$0xff] %v4113_v34  ;;  %v4828_v41 = vadd.f32 %v4827_v29, %v4826_v46  ;;  %v4793_v47 = vpop.f32.mrf.mxu0  ;;  %v3959_v46 = vadd.f32 %v4727_v58, %v3870_v59  ;;  %v6390_v34 = vld [vmem:[#allocation12_spill] sm:$0xff]  ;;  %v6403_v59 = vld [vmem:[#allocation19_spill] sm:$0xff] }
 0x370   : > { %v4829_v49 = vpop.f32.mrf.mxu1  ;;  %v4675_v29 = vadd.f32 %v6391_v7, %v6390_v34  ;;  %v4794_v62 = vadd.f32 %v4793_v47, %v4792_v35  ;;  %v6404_v47 = vld [vmem:[#allocation28_spill] sm:$0xff] }
 0x371   : > { %v4116_v25 = vadd.f32 %v4828_v41, %v4027_v17  ;;  %v4048_v17 = vadd.f32 %v4785_v0, %v3959_v46  ;;  %v4795_v40 = vpop.f32.mrf.mxu0 }
 0x372   : > { %v4830_v48 = vpop.f32.mrf.mxu1 }
 0x373   : > { %4162 = vst [vmem:[%s6216_s19 + $0x18] sm:$0xff] %v4116_v25  ;;  %v4831_v39 = vadd.f32 %v4830_v48, %v4829_v49  ;;  %v3962_v49 = vadd.f32 %v4730_v38, %v3873_v42  ;;  %v4733_v25 = vadd.f32 %v6393_v33, %v6392_v3  ;;  %v3878_v48 = vadd.f32 %v4675_v29, %v6191_v10  ;;  %v4796_v24 = vpop.f32.mrf.mxu0 }
 0x374   : > { %v4832_v9 = vpop.f32.mrf.mxu1  ;;  %v4797_v36 = vadd.f32 %v4796_v24, %v4795_v40 }
 0x375   : > { %v4121_v26 = vadd.f32 %v4831_v39, %v4032_v32  ;;  %v6394_v32 = vld [vmem:[#allocation14_spill] sm:$0xff]  ;;  %v4798_v13 = vpop.f32.mrf.mxu0 }
 0x376   : > { %v4833_v22 = vpop.f32.mrf.mxu1  ;;  %v4678_v39 = vadd.f32 %v6395_v6, %v6394_v32 }
 0x377   : > { %4163 = vst [vmem:[%s6216_s19 + $0x20] sm:$0xff] %v4121_v26  ;;  %v4834_v51 = vadd.f32 %v4833_v22, %v4832_v9  ;;  %v4051_v9 = vadd.f32 %v4788_v30, %v3962_v49  ;;  %v3967_v26 = vadd.f32 %v4733_v25, %v3878_v48  ;;  %v6397_v22 = vld [vmem:[#allocation25_spill] sm:$0xff] }
 0x378   : > { %v4835_v61 = vpop.f32.mrf.mxu1  ;;  %v4736_v12 = vadd.f32 %v6397_v22, %v6396_v45  ;;  %v3881_v4 = vadd.f32 %v4678_v39, %v6191_v10 }
 0x379   : > { %v4124_v18 = vadd.f32 %v4834_v51, %v4035_v23  ;;  %v6399_v51 = vld [vmem:[#allocation17_spill] sm:$0xff] }
 0x37a   : > { %v4836_v56 = vpop.f32.mrf.mxu1  ;;  %v3970_v19 = vadd.f32 %v4736_v12, %v3881_v4 }
 0x37b   : > { %4164 = vst [vmem:[%s6216_s19 + $0x28] sm:$0xff] %v4124_v18  ;;  %v4837_v16 = vadd.f32 %v4836_v56, %v4835_v61  ;;  %v4681_v61 = vadd.f32 %v6399_v51, %v6398_v21  ;;  %v4056_v18 = vadd.f32 %v4791_v52, %v3967_v26 }
 0x37c   : > { %v4838_v57 = vpop.f32.mrf.mxu1  ;;  %v4059_v54 = vadd.f32 %v4794_v62, %v3970_v19 }
 0x37d   : > { %v4129_v11 = vadd.f32 %v4837_v16, %v4040_v27  ;;  %v6400_v27 = vld [vmem:[#allocation26_spill] sm:$0xff]  ;;  %v3886_v60 = vadd.f32 %v4681_v61, %v6191_v10 }
 0x37e   : > { %v4839_v44 = vpop.f32.mrf.mxu1  ;;  %v4739_v16 = vadd.f32 %v6401_v55, %v6400_v27 }
 0x37f   : > { %4165 = vst [vmem:[%s6216_s19 + $0x30] sm:$0xff] %v4129_v11  ;;  %v4840_v15 = vadd.f32 %v4839_v44, %v4838_v57  ;;  %v6402_v11 = vld [vmem:[#allocation18_spill] sm:$0xff] }
 0x380   : > { %v4841_v53 = vpop.f32.mrf.mxu1  ;;  %v4684_v44 = vadd.f32 %v6403_v59, %v6402_v11 }
 0x381   : > { %v4132_v50 = vadd.f32 %v4840_v15, %v4043_v2  ;;  %v4799_v2 = vpop.f32.mrf.mxu0  ;;  %v3975_v15 = vadd.f32 %v4739_v16, %v3886_v60 }
 0x382   : > { %v4842_v5 = vpop.f32.mrf.mxu1  ;;  %v3889_v38 = vadd.f32 %v4684_v44, %v6191_v10  ;;  %v4800_v34 = vadd.f32 %v4799_v2, %v4798_v13 }
 0x383   : > { %4166 = vst [vmem:[%s6216_s19 + $0x38] sm:$0xff] %v4132_v50  ;;  %v4843_v43 = vadd.f32 %v4842_v5, %v4841_v53  ;;  %v6405_v53 = vld [vmem:[#allocation29_spill] sm:$0xff]  ;;  %v4064_v50 = vadd.f32 %v4797_v36, %v3975_v15 }
 0x384   : > { %v4844_v41 = vpop.f32.mrf.mxu1  ;;  %v4742_v46 = vadd.f32 %v6405_v53, %v6404_v47 }
 0x385   : > { %v4137_v14 = vadd.f32 %v4843_v43, %v4048_v17 }
 0x386   : > { %v4845_v8 = vpop.f32.mrf.mxu1  ;;  %v3978_v5 = vadd.f32 %v4742_v46, %v3889_v38 }
 0x387   : > { %4167 = vst [vmem:[%s6216_s19 + $0x40] sm:$0xff] %v4137_v14  ;;  %v4846_v28 = vadd.f32 %v4845_v8, %v4844_v41 }
 0x388   : > { %v4847_v20 = vpop.f32.mrf.mxu1  ;;  %v4067_v30 = vadd.f32 %v4800_v34, %v3978_v5 }
 0x389   : > { %v4140_v23 = vadd.f32 %v4846_v28, %v4051_v9 }
 0x38a   : > { %v4848_v1 = vpop.f32.mrf.mxu1 }
 0x38b   : > { %4168 = vst [vmem:[%s6216_s19 + $0x48] sm:$0xff] %v4140_v23  ;;  %v4849_v63 = vadd.f32 %v4848_v1, %v4847_v20 }
 0x38c   : > { %v4850_v56 = vpop.f32.mrf.mxu1 }
 0x38d   : > { %v4145_v57 = vadd.f32 %v4849_v63, %v4056_v18 }
 0x38e   : > { %v4851_v58 = vpop.f32.mrf.mxu1 }
 0x38f   : > { %4169 = vst [vmem:[%s6216_s19 + $0x50] sm:$0xff] %v4145_v57  ;;  %v4852_v35 = vadd.f32 %v4851_v58, %v4850_v56 }
 0x390   : > { %v4853_v0 = vpop.f32.mrf.mxu1 }
 0x391   : > { %v4148_v31 = vadd.f32 %v4852_v35, %v4059_v54 }
 0x392   : > { %v4854_v37 = vpop.f32.mrf.mxu1 }
 0x393   : > { %4170 = vst [vmem:[%s6216_s19 + $0x58] sm:$0xff] %v4148_v31  ;;  %v4855_v7 = vadd.f32 %v4854_v37, %v4853_v0 }
 0x394   : > { %v4856_v29 = vpop.f32.mrf.mxu1 }
 0x395   : > { %v4153_v42 = vadd.f32 %v4855_v7, %v4064_v50 }
 0x396   : > { %v4857_v17 = vpop.f32.mrf.mxu1 }
 0x397   : > { %4171 = vst [vmem:[%s6216_s19 + $0x60] sm:$0xff] %v4153_v42  ;;  %v4858_v43 = vadd.f32 %v4857_v17, %v4856_v29 }
 0x399   : > { %v4156_v10 = vadd.f32 %v4858_v43, %v4067_v30 }
 0x39b   : > { %4172 = vst [vmem:[%s6216_s19 + $0x68] sm:$0xff] %v4156_v10 }
 0x39c   : > { %5069 = shalt.err (!%p5066_p3)
}
 0x39d   : > { %s5070_s17 = scalar_lea.hbm %s6304_s23, 1792  ;;  %s5074_s18 = scalar_lea.hbm %s6358_s7, 3584 }
 0x39e   : > { %p5071_p2 = scmp.ne.s32.totalorder %s6304_s23, %s5070_s17  ;;  %p5075_p6 = scmp.lt.s32.totalorder %s6304_s23, %s6358_s7 }
 0x39f   : > { %p5076_p9 = scmp.lt.s32.totalorder %s5074_s18, %s5070_s17 }
 0x3a0   : > { %p5072_p4 = pnand %p5071_p2, %p5214_p5 }
 0x3a1   : > { %p5077_p10 = por %p5076_p9, %p5075_p6 }
 0x3a2   : > { %p5073_p13 = pneg %p5072_p4 }
 0x3a4   : > { %p5078_p12 = pnand %p5077_p10, %p5073_p13 }
 0x3a6   : > { %5081 = shalt.err (!%p5078_p12)
}
 0x3a7   : > { %s5134_s21 = smov 128   ;;  %s5135_s22 = smov 8  }
 0x3a8   : > { %4868 = dma.vmem_to_hbm [thread:$0]  (%p5214_p5), %s6306_s13, 1792, %s6304_s23, %s6311_s28, %s5134_s21, %s5134_s21, %s5135_s22  }
 0x3a9 PF: > { %p4885_p7 = scmp.ge.s32.totalorder %s5124_s27, 2  ;;  %s4202_s29 = sand.u32 1, %s5112_s24  }
 0x3aa   : > { %p6406_p8 = scmp.ne.s32.totalorder %s6361_s12, 0  ;;  %s4203_s8 = scalar_lea.sflag [#allocation4], %s4202_s29 }
 0x3ac   : > { %p4878_p11 = pnand %p4885_p7, %p6406_p8 }
 0x3ae   : > { %p4879_p0 = pneg %p4878_p11 }
 0x3b0   : > { %5107 = dma.done.wait (%p4879_p0), %s4203_s8, 1792  }
 0x3b1   : > { %5109 = vsyncadd (%p4879_p0), %s4203_s8, 4294965504  ;;  %p19_p1 = scmp.ge.s32.totalorder %s5201_s30, 4   ;;  %s6407_s24 = smov %s5116_s25 }
 0x3b2   : > { %s6408_s25 = smov %s5120_s26  ;;  %s6409_s26 = smov %s5212_s10 }
 0x3b3   : > { %s6410_s27 = smov %s5201_s30  ;;  %21 = sbr.rel (!%p19_p1) target bundleno = 5 (0x5), region = 92 }
 0x3b8   :  { %4208 = vsyncpa [#allocation3], 1 }
 0x3b9   :  { %4210 = vsyncpa [#allocation3 + $0x1], 1 }
 0x3ba   :  { %4211 = vsyncpa [#allocation6], 1 }
 0x3bb   :  { %4212 = vsyncpa [#allocation4], 1 }
 0x3bc   :  { %4214 = vsyncpa [#allocation4 + $0x1], 1 }

</bundles_post_ra>
